<compile_context>
chip_gen: v7x
topology: tpu7x:2x2x1
jax: 0.10.0
libtpu: 0.0.40
codegen_flags: <defaults>
</compile_context>

<pallas_src>
import functools

import jax
import jax.numpy as jnp
from jax.experimental import pallas as pl
from jax.experimental.pallas import tpu as pltpu

KH = KW = 4          # kernel_size = 4
PAD = 1              # padw = 1 (PatchGAN)
BN_EPS = 1e-5        # nn.BatchNorm2d default eps
NEG_SLOPE = 0.2      # LeakyReLU(0.2)

TM_TARGET = 512      # M-tile target (multiple of 8/256; MXU + sublane aligned)
TN = 128             # Cout tile (one lane group)


def _round_up(x, m):
    return (x + m - 1) // m * m


# ---------------------------------------------------------------------------
# Pallas kernels
# ---------------------------------------------------------------------------
def _conv_bias_act_kernel(p_ref, w_ref, b_ref, o_ref, *, use_act):
    # p_ref: (TM, Kp) bf16, w_ref: (Kp, TN) bf16, b_ref: (1, TN) f32, o_ref: (TM, TN)
    acc = jnp.dot(p_ref[...], w_ref[...], preferred_element_type=jnp.float32)
    acc = acc + b_ref[...]
    if use_act:
        acc = jnp.where(acc >= 0, acc, NEG_SLOPE * acc)
    o_ref[...] = acc.astype(o_ref.dtype)


def _conv_stats_kernel(p_ref, w_ref, o_ref, sum_ref, sq_ref):
    # Conv matmul (no bias: conv+BN layers use bias=False) + per-tile channel stats.
    # o_ref: (TM, TN) f32; sum_ref / sq_ref: (1, 1, TN) f32 (this tile's own block).
    acc = jnp.dot(p_ref[...], w_ref[...], preferred_element_type=jnp.float32)
    o_ref[...] = acc
    tn = acc.shape[-1]
    sum_ref[...] = jnp.sum(acc, axis=0, keepdims=True).reshape(1, 1, tn)
    sq_ref[...] = jnp.sum(acc * acc, axis=0, keepdims=True).reshape(1, 1, tn)


def _scale_shift_act_kernel(x_ref, s_ref, t_ref, o_ref, *, use_act):
    # Fused BatchNorm affine (precomputed per-channel scale/shift) + LeakyReLU.
    y = x_ref[...] * s_ref[...] + t_ref[...]
    if use_act:
        y = jnp.where(y >= 0, y, NEG_SLOPE * y)
    o_ref[...] = y.astype(o_ref.dtype)


# ---------------------------------------------------------------------------
# One Conv2d(k=4, pad=1) [+BN] [+LeakyReLU] block
# ---------------------------------------------------------------------------
def conv_block(x_nhwc, w_hwio, bias, gamma, beta, *, stride, use_bn, use_act,
               out_dtype):
    N, H, W, Cin = x_nhwc.shape
    Cout = w_hwio.shape[-1]

    # bf16 activations feeding the MXU (cast before im2col: half the glue bytes).
    x_bf = x_nhwc.astype(jnp.bfloat16)
    xp = jnp.pad(x_bf, ((0, 0), (PAD, PAD), (PAD, PAD), (0, 0)))
    Ho = (H + 2 * PAD - KH) // stride + 1
    Wo = (W + 2 * PAD - KW) // stride + 1

    # im2col (data-movement glue); window order (dy, dx, cin) matches w.reshape below.
    cols = []
    for dy in range(KH):
        for dx in range(KW):
            cols.append(
                xp[:, dy:dy + stride * (Ho - 1) + 1:stride,
                      dx:dx + stride * (Wo - 1) + 1:stride, :]
            )
    patches = jnp.concatenate(cols, axis=-1).reshape(N * Ho * Wo, KH * KW * Cin)

    M, K = patches.shape
    Kp = _round_up(K, 128)                 # full MXU contraction lanes
    Cp = _round_up(Cout, TN)               # lane-dense output channels
    TM = min(TM_TARGET, _round_up(M, 8))   # M tile (sublane aligned)
    Mp = _round_up(M, TM)
    grid_m, grid_n = Mp // TM, Cp // TN

    # Zero-pad M, K, Cout (padded rows/cols contribute nothing; BN layers have no bias).
    patches = jnp.pad(patches, ((0, Mp - M), (0, Kp - K)))
    wmat = jnp.pad(w_hwio.reshape(K, Cout),
                   ((0, Kp - K), (0, Cp - Cout))).astype(jnp.bfloat16)

    p_spec = pl.BlockSpec((TM, Kp), lambda i, j: (i, 0))
    w_spec = pl.BlockSpec((Kp, TN), lambda i, j: (0, j))     # resident across M tiles
    vec_spec = pl.BlockSpec((1, TN), lambda i, j: (0, j))
    o_spec = pl.BlockSpec((TM, TN), lambda i, j: (i, j))
    stat_spec = pl.BlockSpec((1, 1, TN), lambda i, j: (i, 0, j))

    cparams = pltpu.CompilerParams(dimension_semantics=("parallel", "parallel"))

    if use_bn:
        # Pass 1: matmul + per-tile channel stats (f32 intermediate for BN fidelity).
        conv_out, psum, psq = pl.pallas_call(
            _conv_stats_kernel,
            grid=(grid_m, grid_n),
            in_specs=[p_spec, w_spec],
            out_specs=[o_spec, stat_spec, stat_spec],
            out_shape=[
                jax.ShapeDtypeStruct((Mp, Cp), jnp.float32),
                jax.ShapeDtypeStruct((grid_m, 1, Cp), jnp.float32),
                jax.ShapeDtypeStruct((grid_m, 1, Cp), jnp.float32),
            ],
            compiler_params=cparams,
        )(patches, wmat)

        # Finalize batch statistics (tiny per-channel math: glue).
        # Padded M rows are all-zero (no bias on BN layers) so they contribute nothing.
        total = jnp.sum(psum, axis=0)                      # (1, Cp)
        total_sq = jnp.sum(psq, axis=0)                    # (1, Cp)
        mean = total / M
        var = jnp.maximum(total_sq / M - mean * mean, 0.0)  # biased (training) variance
        inv_std = jax.lax.rsqrt(var + BN_EPS)
        g = jnp.pad(gamma, (0, Cp - Cout)).reshape(1, Cp)
        b = jnp.pad(beta, (0, Cp - Cout)).reshape(1, Cp)
        scale = g * inv_std
        shift = b - mean * scale

        # Pass 2: fused scale/shift + LeakyReLU.
        out = pl.pallas_call(
            functools.partial(_scale_shift_act_kernel, use_act=use_act),
            grid=(grid_m, grid_n),
            in_specs=[o_spec, vec_spec, vec_spec],
            out_specs=o_spec,
            out_shape=jax.ShapeDtypeStruct((Mp, Cp), out_dtype),
            compiler_params=cparams,
        )(conv_out, scale, shift)
    else:
        bvec = jnp.pad(bias, (0, Cp - Cout)).reshape(1, Cp).astype(jnp.float32)
        out = pl.pallas_call(
            functools.partial(_conv_bias_act_kernel, use_act=use_act),
            grid=(grid_m, grid_n),
            in_specs=[p_spec, w_spec, vec_spec],
            out_specs=o_spec,
            out_shape=jax.ShapeDtypeStruct((Mp, Cp), out_dtype),
            compiler_params=cparams,
        )(patches, wmat, bvec)

    return out[:M, :Cout].reshape(N, Ho, Wo, Cout)


# ---------------------------------------------------------------------------
# Module construction (mirrors NLayerDiscriminator.__init__: kw=4, padw=1,
# BatchNorm2d norm layer => use_bias=False on conv+BN layers)
# ---------------------------------------------------------------------------
def init_params(key, input_nc, ndf=16, n_layers=3):
    # (cin, cout, stride, use_bn, use_act, use_bias)
    specs = [(input_nc, ndf, 2, False, True, True)]
    nf = ndf
    for n in range(1, n_layers):
        nf_prev, nf = nf, ndf * min(2 ** n, 8)
        specs.append((nf_prev, nf, 2, True, True, False))
    nf_prev, nf = nf, ndf * min(2 ** n_layers, 8)
    specs.append((nf_prev, nf, 1, True, True, False))
    specs.append((nf, 1, 1, False, False, True))     # final 1-channel conv, no act

    params, cfg = [], []
    for (cin, cout, stride, use_bn, use_act, use_bias) in specs:
        key, kw_key, kb_key = jax.random.split(key, 3)
        fan_in = cin * KH * KW
        bound = 1.0 / jnp.sqrt(jnp.float32(fan_in))
        w = jax.random.uniform(kw_key, (KH, KW, cin, cout), jnp.float32, -bound, bound)
        if use_bias:
            b = jax.random.uniform(kb_key, (cout,), jnp.float32, -bound, bound)
        else:
            b = jnp.zeros((cout,), jnp.float32)       # unused (conv+BN => bias=False)
        params.append(dict(
            w=w, b=b,
            gamma=jnp.ones((cout,), jnp.float32),     # BatchNorm2d default init
            beta=jnp.zeros((cout,), jnp.float32)))
        cfg.append((stride, use_bn, use_act))
    return params, cfg


def nlayer_discriminator(x_nchw, params, cfg):
    x = jnp.transpose(x_nchw, (0, 2, 3, 1))           # NCHW -> NHWC (once, at the edge)
    n_blocks = len(cfg)
    for li, (p, (stride, use_bn, use_act)) in enumerate(zip(params, cfg)):
        is_last = li == n_blocks - 1
        # Intermediate activations stay bf16 (next layer's MXU consumes bf16 anyway,
        # so matmul numerics are unchanged while HBM traffic is halved).
        out_dtype = jnp.float32 if is_last else jnp.bfloat16
        x = conv_block(x, p["w"], p["b"], p["gamma"], p["beta"],
                       stride=stride, use_bn=use_bn, use_act=use_act,
                       out_dtype=out_dtype)
    return jnp.transpose(x, (0, 3, 1, 2))             # NHWC -> NCHW


# Pure-JAX reference (numerical sanity check)
def _reference(x_nchw, params, cfg):
    x = jnp.transpose(x_nchw, (0, 2, 3, 1))
    for p, (stride, use_bn, use_act) in zip(params, cfg):
        y = jax.lax.conv_general_dilated(
            x, p["w"], window_strides=(stride, stride),
            padding=((PAD, PAD), (PAD, PAD)),
            dimension_numbers=("NHWC", "HWIO", "NHWC"),
            precision=jax.lax.Precision.HIGHEST)
        if use_bn:
            mean = jnp.mean(y, axis=(0, 1, 2), keepdims=True)
            var = jnp.mean(jnp.square(y - mean), axis=(0, 1, 2), keepdims=True)
            y = (y - mean) * jax.lax.rsqrt(var + BN_EPS)
            y = y * p["gamma"] + p["beta"]
        else:
            y = y + p["b"]
        if use_act:
            y = jnp.where(y >= 0, y, NEG_SLOPE * y)
        x = y
    return jnp.transpose(x, (0, 3, 1, 2))


if __name__ == "__main__":
    key = jax.random.PRNGKey(0)
    kx, kp = jax.random.split(key)

    # Small synthetic config: input_nc=4, ndf=16, n_layers=3.
    # Spatial size 64 keeps every layer valid with padw=1 (64->32->16->8->7->6)
    # and exercises multi-tile M pipelining + multi-tile BN stats reduction.
    N, C, H, W = 2, 4, 64, 64
    x = jax.random.normal(kx, (N, C, H, W), jnp.float32)
    params, cfg = init_params(kp, input_nc=C, ndf=16, n_layers=3)

    fwd = jax.jit(functools.partial(nlayer_discriminator, cfg=cfg))
    out = jax.block_until_ready(fwd(x, params))

    assert out.shape == (N, 1, 6, 6), out.shape
    assert bool(jnp.all(jnp.isfinite(out)))

    ref = jax.block_until_ready(_reference(x, params, cfg))
    assert bool(jnp.allclose(out, ref, rtol=5e-2, atol=5e-2)), \
        float(jnp.max(jnp.abs(out - ref)))

    print("KERNEL_OK")
</pallas_src>

<mosaic_0001>
module attributes {stable_mosaic.version = 11 : i64} {
  func.func @_conv_bias_act_kernel(%arg0: i32, %arg1: i32, %arg2: memref<512x128xbf16, #tpu.memory_space<vmem>>, %arg3: memref<128x128xbf16, #tpu.memory_space<vmem>>, %arg4: memref<1x128xf32, #tpu.memory_space<vmem>>, %arg5: memref<512x128xbf16, #tpu.memory_space<vmem>>) attributes {dimension_semantics = [#tpu.dimension_semantics<parallel>, #tpu.dimension_semantics<parallel>], iteration_bounds = array<i64: 4, 1>, scalar_prefetch = 0 : i64, scratch_operands = 0 : i64, tpu.core_type = #tpu.core_type<tc>, window_params = [{transform_indices = @transform_0, window_bounds = array<i64: 512, 128>}, {transform_indices = @transform_1, window_bounds = array<i64: 128, 128>}, {transform_indices = @transform_2, window_bounds = array<i64: 1, 128>}, {transform_indices = @transform_3, window_bounds = array<i64: 512, 128>}]} {
    %c0 = arith.constant 0 : index
    %c0_0 = arith.constant 0 : index
    %0 = vector.load %arg2[%c0, %c0_0] : memref<512x128xbf16, #tpu.memory_space<vmem>>, vector<512x128xbf16>
    %c0_1 = arith.constant 0 : index
    %c0_2 = arith.constant 0 : index
    %1 = vector.load %arg3[%c0_1, %c0_2] : memref<128x128xbf16, #tpu.memory_space<vmem>>, vector<128x128xbf16>
    %cst = arith.constant dense<0.000000e+00> : vector<512x128xf32>
    %2 = tpu.matmul %0, %1, %cst {dimension_numbers = #tpu.dot_dimension_numbers<[1], [0], [0], [1], [0, 0, 1, 1], [], []>} : vector<512x128xbf16>, vector<128x128xbf16>, vector<512x128xf32> -> vector<512x128xf32>
    %c0_3 = arith.constant 0 : index
    %c0_4 = arith.constant 0 : index
    %3 = vector.load %arg4[%c0_3, %c0_4] : memref<1x128xf32, #tpu.memory_space<vmem>>, vector<1x128xf32>
    %4 = vector.broadcast %3 : vector<1x128xf32> to vector<512x128xf32>
    %5 = arith.addf %2, %4 : vector<512x128xf32>
    %cst_5 = arith.constant 0.000000e+00 : f32
    %6 = vector.broadcast %cst_5 : f32 to vector<512x128xf32>
    %7 = arith.cmpf oge, %5, %6 : vector<512x128xf32>
    %cst_6 = arith.constant 2.000000e-01 : f32
    %8 = vector.broadcast %cst_6 : f32 to vector<512x128xf32>
    %9 = arith.mulf %8, %5 : vector<512x128xf32>
    %10 = arith.select %7, %5, %9 : vector<512x128xi1>, vector<512x128xf32>
    %11 = arith.truncf %10 : vector<512x128xf32> to vector<512x128xbf16>
    %c0_7 = arith.constant 0 : index
    %c0_8 = arith.constant 0 : index
    %12 = vector.load %arg5[%c0_7, %c0_8] : memref<512x128xbf16, #tpu.memory_space<vmem>>, vector<512x128xbf16>
    tpu.vector_store %arg5[%c0_7, %c0_8], %11 {strides = array<i32>} : memref<512x128xbf16, #tpu.memory_space<vmem>>, vector<512x128xbf16>,
    return
  }
  func.func @transform_0(%arg0: i32, %arg1: i32) -> (i32, i32) {
    %c0_i32 = arith.constant 0 : i32
    %c0_i32_0 = arith.constant 0 : i32
    return %arg0, %c0_i32 : i32, i32
  }
  func.func @transform_1(%arg0: i32, %arg1: i32) -> (i32, i32) {
    %c0_i32 = arith.constant 0 : i32
    %c0_i32_0 = arith.constant 0 : i32
    return %c0_i32, %arg1 : i32, i32
  }
  func.func @transform_2(%arg0: i32, %arg1: i32) -> (i32, i32) {
    %c0_i32 = arith.constant 0 : i32
    %c0_i32_0 = arith.constant 0 : i32
    return %c0_i32, %arg1 : i32, i32
  }
  func.func @transform_3(%arg0: i32, %arg1: i32) -> (i32, i32) {
    %c0_i32 = arith.constant 0 : i32
    return %arg0, %arg1 : i32, i32
  }
}

module attributes {stable_mosaic.version = 11 : i64} {
  func.func @_conv_stats_kernel(%arg0: i32, %arg1: i32, %arg2: memref<512x256xbf16, #tpu.memory_space<vmem>>, %arg3: memref<256x128xbf16, #tpu.memory_space<vmem>>, %arg4: memref<512x128xf32, #tpu.memory_space<vmem>>, %arg5: memref<1x1x128xf32, #tpu.memory_space<vmem>>, %arg6: memref<1x1x128xf32, #tpu.memory_space<vmem>>) attributes {dimension_semantics = [#tpu.dimension_semantics<parallel>, #tpu.dimension_semantics<parallel>], iteration_bounds = array<i64: 1, 1>, scalar_prefetch = 0 : i64, scratch_operands = 0 : i64, tpu.core_type = #tpu.core_type<tc>, window_params = [{transform_indices = @transform_0, window_bounds = array<i64: 512, 256>}, {transform_indices = @transform_1, window_bounds = array<i64: 256, 128>}, {transform_indices = @transform_2, window_bounds = array<i64: 512, 128>}, {transform_indices = @transform_3, window_bounds = array<i64: 1, 1, 128>}, {transform_indices = @transform_4, window_bounds = array<i64: 1, 1, 128>}]} {
    %c0 = arith.constant 0 : index
    %c0_0 = arith.constant 0 : index
    %0 = vector.load %arg2[%c0, %c0_0] : memref<512x256xbf16, #tpu.memory_space<vmem>>, vector<512x256xbf16>
    %c0_1 = arith.constant 0 : index
    %c0_2 = arith.constant 0 : index
    %1 = vector.load %arg3[%c0_1, %c0_2] : memref<256x128xbf16, #tpu.memory_space<vmem>>, vector<256x128xbf16>
    %cst = arith.constant dense<0.000000e+00> : vector<512x128xf32>
    %2 = tpu.matmul %0, %1, %cst {dimension_numbers = #tpu.dot_dimension_numbers<[1], [0], [0], [1], [0, 0, 1, 1], [], []>} : vector<512x256xbf16>, vector<256x128xbf16>, vector<512x128xf32> -> vector<512x128xf32>
    %c0_3 = arith.constant 0 : index
    %c0_4 = arith.constant 0 : index
    %3 = vector.load %arg4[%c0_3, %c0_4] : memref<512x128xf32, #tpu.memory_space<vmem>>, vector<512x128xf32>
    tpu.vector_store %arg4[%c0_3, %c0_4], %2 {strides = array<i32>} : memref<512x128xf32, #tpu.memory_space<vmem>>, vector<512x128xf32>,
    %cst_5 = arith.constant dense<0.000000e+00> : vector<128xf32>
    %4 = vector.multi_reduction <add>, %2, %cst_5 [0] : vector<512x128xf32> to vector<128xf32>
    %5 = vector.shape_cast %4 : vector<128xf32> to vector<1x128xf32>
    %6 = vector.shape_cast %5 : vector<1x128xf32> to vector<1x1x128xf32>
    %c0_6 = arith.constant 0 : index
    %c0_7 = arith.constant 0 : index
    %c0_8 = arith.constant 0 : index
    %7 = vector.load %arg5[%c0_6, %c0_7, %c0_8] : memref<1x1x128xf32, #tpu.memory_space<vmem>>, vector<1x1x128xf32>
    tpu.vector_store %arg5[%c0_6, %c0_7, %c0_8], %6 {strides = array<i32>} : memref<1x1x128xf32, #tpu.memory_space<vmem>>, vector<1x1x128xf32>,
    %8 = arith.mulf %2, %2 : vector<512x128xf32>
    %cst_9 = arith.constant dense<0.000000e+00> : vector<128xf32>
    %9 = vector.multi_reduction <add>, %8, %cst_9 [0] : vector<512x128xf32> to vector<128xf32>
    %10 = vector.shape_cast %9 : vector<128xf32> to vector<1x128xf32>
    %11 = vector.shape_cast %10 : vector<1x128xf32> to vector<1x1x128xf32>
    %c0_10 = arith.constant 0 : index
    %c0_11 = arith.constant 0 : index
    %c0_12 = arith.constant 0 : index
    %12 = vector.load %arg6[%c0_10, %c0_11, %c0_12] : memref<1x1x128xf32, #tpu.memory_space<vmem>>, vector<1x1x128xf32>
    tpu.vector_store %arg6[%c0_10, %c0_11, %c0_12], %11 {strides = array<i32>} : memref<1x1x128xf32, #tpu.memory_space<vmem>>, vector<1x1x128xf32>,
    return
  }
  func.func @transform_0(%arg0: i32, %arg1: i32) -> (i32, i32) {
    %c0_i32 = arith.constant 0 : i32
    %c0_i32_0 = arith.constant 0 : i32
    return %arg0, %c0_i32 : i32, i32
  }
  func.func @transform_1(%arg0: i32, %arg1: i32) -> (i32, i32) {
    %c0_i32 = arith.constant 0 : i32
    %c0_i32_0 = arith.constant 0 : i32
    return %c0_i32, %arg1 : i32, i32
  }
  func.func @transform_2(%arg0: i32, %arg1: i32) -> (i32, i32) {
    %c0_i32 = arith.constant 0 : i32
    return %arg0, %arg1 : i32, i32
  }
  func.func @transform_3(%arg0: i32, %arg1: i32) -> (i32, i32, i32) {
    %c0_i32 = arith.constant 0 : i32
    %c0_i32_0 = arith.constant 0 : i32
    return %arg0, %c0_i32, %arg1 : i32, i32, i32
  }
  func.func @transform_4(%arg0: i32, %arg1: i32) -> (i32, i32, i32) {
    %c0_i32 = arith.constant 0 : i32
    %c0_i32_0 = arith.constant 0 : i32
    return %arg0, %c0_i32, %arg1 : i32, i32, i32
  }
}

module attributes {stable_mosaic.version = 11 : i64} {
  func.func @_scale_shift_act_kernel(%arg0: i32, %arg1: i32, %arg2: memref<512x128xf32, #tpu.memory_space<vmem>>, %arg3: memref<1x128xf32, #tpu.memory_space<vmem>>, %arg4: memref<1x128xf32, #tpu.memory_space<vmem>>, %arg5: memref<512x128xbf16, #tpu.memory_space<vmem>>) attributes {dimension_semantics = [#tpu.dimension_semantics<parallel>, #tpu.dimension_semantics<parallel>], iteration_bounds = array<i64: 1, 1>, scalar_prefetch = 0 : i64, scratch_operands = 0 : i64, tpu.core_type = #tpu.core_type<tc>, window_params = [{transform_indices = @transform_0, window_bounds = array<i64: 512, 128>}, {transform_indices = @transform_1, window_bounds = array<i64: 1, 128>}, {transform_indices = @transform_2, window_bounds = array<i64: 1, 128>}, {transform_indices = @transform_3, window_bounds = array<i64: 512, 128>}]} {
    %c0 = arith.constant 0 : index
    %c0_0 = arith.constant 0 : index
    %0 = vector.load %arg2[%c0, %c0_0] : memref<512x128xf32, #tpu.memory_space<vmem>>, vector<512x128xf32>
    %c0_1 = arith.constant 0 : index
    %c0_2 = arith.constant 0 : index
    %1 = vector.load %arg3[%c0_1, %c0_2] : memref<1x128xf32, #tpu.memory_space<vmem>>, vector<1x128xf32>
    %2 = vector.broadcast %1 : vector<1x128xf32> to vector<512x128xf32>
    %3 = arith.mulf %0, %2 : vector<512x128xf32>
    %c0_3 = arith.constant 0 : index
    %c0_4 = arith.constant 0 : index
    %4 = vector.load %arg4[%c0_3, %c0_4] : memref<1x128xf32, #tpu.memory_space<vmem>>, vector<1x128xf32>
    %5 = vector.broadcast %4 : vector<1x128xf32> to vector<512x128xf32>
    %6 = arith.addf %3, %5 : vector<512x128xf32>
    %cst = arith.constant 0.000000e+00 : f32
    %7 = vector.broadcast %cst : f32 to vector<512x128xf32>
    %8 = arith.cmpf oge, %6, %7 : vector<512x128xf32>
    %cst_5 = arith.constant 2.000000e-01 : f32
    %9 = vector.broadcast %cst_5 : f32 to vector<512x128xf32>
    %10 = arith.mulf %9, %6 : vector<512x128xf32>
    %11 = arith.select %8, %6, %10 : vector<512x128xi1>, vector<512x128xf32>
    %12 = arith.truncf %11 : vector<512x128xf32> to vector<512x128xbf16>
    %c0_6 = arith.constant 0 : index
    %c0_7 = arith.constant 0 : index
    %13 = vector.load %arg5[%c0_6, %c0_7] : memref<512x128xbf16, #tpu.memory_space<vmem>>, vector<512x128xbf16>
    tpu.vector_store %arg5[%c0_6, %c0_7], %12 {strides = array<i32>} : memref<512x128xbf16, #tpu.memory_space<vmem>>, vector<512x128xbf16>,
    return
  }
  func.func @transform_0(%arg0: i32, %arg1: i32) -> (i32, i32) {
    %c0_i32 = arith.constant 0 : i32
    return %arg0, %arg1 : i32, i32
  }
  func.func @transform_1(%arg0: i32, %arg1: i32) -> (i32, i32) {
    %c0_i32 = arith.constant 0 : i32
    %c0_i32_0 = arith.constant 0 : i32
    return %c0_i32, %arg1 : i32, i32
  }
  func.func @transform_2(%arg0: i32, %arg1: i32) -> (i32, i32) {
    %c0_i32 = arith.constant 0 : i32
    %c0_i32_0 = arith.constant 0 : i32
    return %c0_i32, %arg1 : i32, i32
  }
  func.func @transform_3(%arg0: i32, %arg1: i32) -> (i32, i32) {
    %c0_i32 = arith.constant 0 : i32
    return %arg0, %arg1 : i32, i32
  }
}

module attributes {stable_mosaic.version = 11 : i64} {
  func.func @_conv_stats_kernel(%arg0: i32, %arg1: i32, %arg2: memref<128x512xbf16, #tpu.memory_space<vmem>>, %arg3: memref<512x128xbf16, #tpu.memory_space<vmem>>, %arg4: memref<128x128xf32, #tpu.memory_space<vmem>>, %arg5: memref<1x1x128xf32, #tpu.memory_space<vmem>>, %arg6: memref<1x1x128xf32, #tpu.memory_space<vmem>>) attributes {dimension_semantics = [#tpu.dimension_semantics<parallel>, #tpu.dimension_semantics<parallel>], iteration_bounds = array<i64: 1, 1>, scalar_prefetch = 0 : i64, scratch_operands = 0 : i64, tpu.core_type = #tpu.core_type<tc>, window_params = [{transform_indices = @transform_0, window_bounds = array<i64: 128, 512>}, {transform_indices = @transform_1, window_bounds = array<i64: 512, 128>}, {transform_indices = @transform_2, window_bounds = array<i64: 128, 128>}, {transform_indices = @transform_3, window_bounds = array<i64: 1, 1, 128>}, {transform_indices = @transform_4, window_bounds = array<i64: 1, 1, 128>}]} {
    %c0 = arith.constant 0 : index
    %c0_0 = arith.constant 0 : index
    %0 = vector.load %arg2[%c0, %c0_0] : memref<128x512xbf16, #tpu.memory_space<vmem>>, vector<128x512xbf16>
    %c0_1 = arith.constant 0 : index
    %c0_2 = arith.constant 0 : index
    %1 = vector.load %arg3[%c0_1, %c0_2] : memref<512x128xbf16, #tpu.memory_space<vmem>>, vector<512x128xbf16>
    %cst = arith.constant dense<0.000000e+00> : vector<128x128xf32>
    %2 = tpu.matmul %0, %1, %cst {dimension_numbers = #tpu.dot_dimension_numbers<[1], [0], [0], [1], [0, 0, 1, 1], [], []>} : vector<128x512xbf16>, vector<512x128xbf16>, vector<128x128xf32> -> vector<128x128xf32>
    %c0_3 = arith.constant 0 : index
    %c0_4 = arith.constant 0 : index
    %3 = vector.load %arg4[%c0_3, %c0_4] : memref<128x128xf32, #tpu.memory_space<vmem>>, vector<128x128xf32>
    tpu.vector_store %arg4[%c0_3, %c0_4], %2 {strides = array<i32>} : memref<128x128xf32, #tpu.memory_space<vmem>>, vector<128x128xf32>,
    %cst_5 = arith.constant dense<0.000000e+00> : vector<128xf32>
    %4 = vector.multi_reduction <add>, %2, %cst_5 [0] : vector<128x128xf32> to vector<128xf32>
    %5 = vector.shape_cast %4 : vector<128xf32> to vector<1x128xf32>
    %6 = vector.shape_cast %5 : vector<1x128xf32> to vector<1x1x128xf32>
    %c0_6 = arith.constant 0 : index
    %c0_7 = arith.constant 0 : index
    %c0_8 = arith.constant 0 : index
    %7 = vector.load %arg5[%c0_6, %c0_7, %c0_8] : memref<1x1x128xf32, #tpu.memory_space<vmem>>, vector<1x1x128xf32>
    tpu.vector_store %arg5[%c0_6, %c0_7, %c0_8], %6 {strides = array<i32>} : memref<1x1x128xf32, #tpu.memory_space<vmem>>, vector<1x1x128xf32>,
    %8 = arith.mulf %2, %2 : vector<128x128xf32>
    %cst_9 = arith.constant dense<0.000000e+00> : vector<128xf32>
    %9 = vector.multi_reduction <add>, %8, %cst_9 [0] : vector<128x128xf32> to vector<128xf32>
    %10 = vector.shape_cast %9 : vector<128xf32> to vector<1x128xf32>
    %11 = vector.shape_cast %10 : vector<1x128xf32> to vector<1x1x128xf32>
    %c0_10 = arith.constant 0 : index
    %c0_11 = arith.constant 0 : index
    %c0_12 = arith.constant 0 : index
    %12 = vector.load %arg6[%c0_10, %c0_11, %c0_12] : memref<1x1x128xf32, #tpu.memory_space<vmem>>, vector<1x1x128xf32>
    tpu.vector_store %arg6[%c0_10, %c0_11, %c0_12], %11 {strides = array<i32>} : memref<1x1x128xf32, #tpu.memory_space<vmem>>, vector<1x1x128xf32>,
    return
  }
  func.func @transform_0(%arg0: i32, %arg1: i32) -> (i32, i32) {
    %c0_i32 = arith.constant 0 : i32
    %c0_i32_0 = arith.constant 0 : i32
    return %arg0, %c0_i32 : i32, i32
  }
  func.func @transform_1(%arg0: i32, %arg1: i32) -> (i32, i32) {
    %c0_i32 = arith.constant 0 : i32
    %c0_i32_0 = arith.constant 0 : i32
    return %c0_i32, %arg1 : i32, i32
  }
  func.func @transform_2(%arg0: i32, %arg1: i32) -> (i32, i32) {
    %c0_i32 = arith.constant 0 : i32
    return %arg0, %arg1 : i32, i32
  }
  func.func @transform_3(%arg0: i32, %arg1: i32) -> (i32, i32, i32) {
    %c0_i32 = arith.constant 0 : i32
    %c0_i32_0 = arith.constant 0 : i32
    return %arg0, %c0_i32, %arg1 : i32, i32, i32
  }
  func.func @transform_4(%arg0: i32, %arg1: i32) -> (i32, i32, i32) {
    %c0_i32 = arith.constant 0 : i32
    %c0_i32_0 = arith.constant 0 : i32
    return %arg0, %c0_i32, %arg1 : i32, i32, i32
  }
}

module attributes {stable_mosaic.version = 11 : i64} {
  func.func @_scale_shift_act_kernel(%arg0: i32, %arg1: i32, %arg2: memref<128x128xf32, #tpu.memory_space<vmem>>, %arg3: memref<1x128xf32, #tpu.memory_space<vmem>>, %arg4: memref<1x128xf32, #tpu.memory_space<vmem>>, %arg5: memref<128x128xbf16, #tpu.memory_space<vmem>>) attributes {dimension_semantics = [#tpu.dimension_semantics<parallel>, #tpu.dimension_semantics<parallel>], iteration_bounds = array<i64: 1, 1>, scalar_prefetch = 0 : i64, scratch_operands = 0 : i64, tpu.core_type = #tpu.core_type<tc>, window_params = [{transform_indices = @transform_0, window_bounds = array<i64: 128, 128>}, {transform_indices = @transform_1, window_bounds = array<i64: 1, 128>}, {transform_indices = @transform_2, window_bounds = array<i64: 1, 128>}, {transform_indices = @transform_3, window_bounds = array<i64: 128, 128>}]} {
    %c0 = arith.constant 0 : index
    %c0_0 = arith.constant 0 : index
    %0 = vector.load %arg2[%c0, %c0_0] : memref<128x128xf32, #tpu.memory_space<vmem>>, vector<128x128xf32>
    %c0_1 = arith.constant 0 : index
    %c0_2 = arith.constant 0 : index
    %1 = vector.load %arg3[%c0_1, %c0_2] : memref<1x128xf32, #tpu.memory_space<vmem>>, vector<1x128xf32>
    %2 = vector.broadcast %1 : vector<1x128xf32> to vector<128x128xf32>
    %3 = arith.mulf %0, %2 : vector<128x128xf32>
    %c0_3 = arith.constant 0 : index
    %c0_4 = arith.constant 0 : index
    %4 = vector.load %arg4[%c0_3, %c0_4] : memref<1x128xf32, #tpu.memory_space<vmem>>, vector<1x128xf32>
    %5 = vector.broadcast %4 : vector<1x128xf32> to vector<128x128xf32>
    %6 = arith.addf %3, %5 : vector<128x128xf32>
    %cst = arith.constant 0.000000e+00 : f32
    %7 = vector.broadcast %cst : f32 to vector<128x128xf32>
    %8 = arith.cmpf oge, %6, %7 : vector<128x128xf32>
    %cst_5 = arith.constant 2.000000e-01 : f32
    %9 = vector.broadcast %cst_5 : f32 to vector<128x128xf32>
    %10 = arith.mulf %9, %6 : vector<128x128xf32>
    %11 = arith.select %8, %6, %10 : vector<128x128xi1>, vector<128x128xf32>
    %12 = arith.truncf %11 : vector<128x128xf32> to vector<128x128xbf16>
    %c0_6 = arith.constant 0 : index
    %c0_7 = arith.constant 0 : index
    %13 = vector.load %arg5[%c0_6, %c0_7] : memref<128x128xbf16, #tpu.memory_space<vmem>>, vector<128x128xbf16>
    tpu.vector_store %arg5[%c0_6, %c0_7], %12 {strides = array<i32>} : memref<128x128xbf16, #tpu.memory_space<vmem>>, vector<128x128xbf16>,
    return
  }
  func.func @transform_0(%arg0: i32, %arg1: i32) -> (i32, i32) {
    %c0_i32 = arith.constant 0 : i32
    return %arg0, %arg1 : i32, i32
  }
  func.func @transform_1(%arg0: i32, %arg1: i32) -> (i32, i32) {
    %c0_i32 = arith.constant 0 : i32
    %c0_i32_0 = arith.constant 0 : i32
    return %c0_i32, %arg1 : i32, i32
  }
  func.func @transform_2(%arg0: i32, %arg1: i32) -> (i32, i32) {
    %c0_i32 = arith.constant 0 : i32
    %c0_i32_0 = arith.constant 0 : i32
    return %c0_i32, %arg1 : i32, i32
  }
  func.func @transform_3(%arg0: i32, %arg1: i32) -> (i32, i32) {
    %c0_i32 = arith.constant 0 : i32
    return %arg0, %arg1 : i32, i32
  }
}

module attributes {stable_mosaic.version = 11 : i64} {
  func.func @_conv_stats_kernel(%arg0: i32, %arg1: i32, %arg2: memref<104x1024xbf16, #tpu.memory_space<vmem>>, %arg3: memref<1024x128xbf16, #tpu.memory_space<vmem>>, %arg4: memref<104x128xf32, #tpu.memory_space<vmem>>, %arg5: memref<1x1x128xf32, #tpu.memory_space<vmem>>, %arg6: memref<1x1x128xf32, #tpu.memory_space<vmem>>) attributes {dimension_semantics = [#tpu.dimension_semantics<parallel>, #tpu.dimension_semantics<parallel>], iteration_bounds = array<i64: 1, 1>, scalar_prefetch = 0 : i64, scratch_operands = 0 : i64, tpu.core_type = #tpu.core_type<tc>, window_params = [{transform_indices = @transform_0, window_bounds = array<i64: 104, 1024>}, {transform_indices = @transform_1, window_bounds = array<i64: 1024, 128>}, {transform_indices = @transform_2, window_bounds = array<i64: 104, 128>}, {transform_indices = @transform_3, window_bounds = array<i64: 1, 1, 128>}, {transform_indices = @transform_4, window_bounds = array<i64: 1, 1, 128>}]} {
    %c0 = arith.constant 0 : index
    %c0_0 = arith.constant 0 : index
    %0 = vector.load %arg2[%c0, %c0_0] : memref<104x1024xbf16, #tpu.memory_space<vmem>>, vector<104x1024xbf16>
    %c0_1 = arith.constant 0 : index
    %c0_2 = arith.constant 0 : index
    %1 = vector.load %arg3[%c0_1, %c0_2] : memref<1024x128xbf16, #tpu.memory_space<vmem>>, vector<1024x128xbf16>
    %cst = arith.constant dense<0.000000e+00> : vector<104x128xf32>
    %2 = tpu.matmul %0, %1, %cst {dimension_numbers = #tpu.dot_dimension_numbers<[1], [0], [0], [1], [0, 0, 1, 1], [], []>} : vector<104x1024xbf16>, vector<1024x128xbf16>, vector<104x128xf32> -> vector<104x128xf32>
    %c0_3 = arith.constant 0 : index
    %c0_4 = arith.constant 0 : index
    %3 = vector.load %arg4[%c0_3, %c0_4] : memref<104x128xf32, #tpu.memory_space<vmem>>, vector<104x128xf32>
    tpu.vector_store %arg4[%c0_3, %c0_4], %2 {strides = array<i32>} : memref<104x128xf32, #tpu.memory_space<vmem>>, vector<104x128xf32>,
    %cst_5 = arith.constant dense<0.000000e+00> : vector<128xf32>
    %4 = vector.multi_reduction <add>, %2, %cst_5 [0] : vector<104x128xf32> to vector<128xf32>
    %5 = vector.shape_cast %4 : vector<128xf32> to vector<1x128xf32>
    %6 = vector.shape_cast %5 : vector<1x128xf32> to vector<1x1x128xf32>
    %c0_6 = arith.constant 0 : index
    %c0_7 = arith.constant 0 : index
    %c0_8 = arith.constant 0 : index
    %7 = vector.load %arg5[%c0_6, %c0_7, %c0_8] : memref<1x1x128xf32, #tpu.memory_space<vmem>>, vector<1x1x128xf32>
    tpu.vector_store %arg5[%c0_6, %c0_7, %c0_8], %6 {strides = array<i32>} : memref<1x1x128xf32, #tpu.memory_space<vmem>>, vector<1x1x128xf32>,
    %8 = arith.mulf %2, %2 : vector<104x128xf32>
    %cst_9 = arith.constant dense<0.000000e+00> : vector<128xf32>
    %9 = vector.multi_reduction <add>, %8, %cst_9 [0] : vector<104x128xf32> to vector<128xf32>
    %10 = vector.shape_cast %9 : vector<128xf32> to vector<1x128xf32>
    %11 = vector.shape_cast %10 : vector<1x128xf32> to vector<1x1x128xf32>
    %c0_10 = arith.constant 0 : index
    %c0_11 = arith.constant 0 : index
    %c0_12 = arith.constant 0 : index
    %12 = vector.load %arg6[%c0_10, %c0_11, %c0_12] : memref<1x1x128xf32, #tpu.memory_space<vmem>>, vector<1x1x128xf32>
    tpu.vector_store %arg6[%c0_10, %c0_11, %c0_12], %11 {strides = array<i32>} : memref<1x1x128xf32, #tpu.memory_space<vmem>>, vector<1x1x128xf32>,
    return
  }
  func.func @transform_0(%arg0: i32, %arg1: i32) -> (i32, i32) {
    %c0_i32 = arith.constant 0 : i32
    %c0_i32_0 = arith.constant 0 : i32
    return %arg0, %c0_i32 : i32, i32
  }
  func.func @transform_1(%arg0: i32, %arg1: i32) -> (i32, i32) {
    %c0_i32 = arith.constant 0 : i32
    %c0_i32_0 = arith.constant 0 : i32
    return %c0_i32, %arg1 : i32, i32
  }
  func.func @transform_2(%arg0: i32, %arg1: i32) -> (i32, i32) {
    %c0_i32 = arith.constant 0 : i32
    return %arg0, %arg1 : i32, i32
  }
  func.func @transform_3(%arg0: i32, %arg1: i32) -> (i32, i32, i32) {
    %c0_i32 = arith.constant 0 : i32
    %c0_i32_0 = arith.constant 0 : i32
    return %arg0, %c0_i32, %arg1 : i32, i32, i32
  }
  func.func @transform_4(%arg0: i32, %arg1: i32) -> (i32, i32, i32) {
    %c0_i32 = arith.constant 0 : i32
    %c0_i32_0 = arith.constant 0 : i32
    return %arg0, %c0_i32, %arg1 : i32, i32, i32
  }
}

module attributes {stable_mosaic.version = 11 : i64} {
  func.func @_scale_shift_act_kernel(%arg0: i32, %arg1: i32, %arg2: memref<104x128xf32, #tpu.memory_space<vmem>>, %arg3: memref<1x128xf32, #tpu.memory_space<vmem>>, %arg4: memref<1x128xf32, #tpu.memory_space<vmem>>, %arg5: memref<104x128xbf16, #tpu.memory_space<vmem>>) attributes {dimension_semantics = [#tpu.dimension_semantics<parallel>, #tpu.dimension_semantics<parallel>], iteration_bounds = array<i64: 1, 1>, scalar_prefetch = 0 : i64, scratch_operands = 0 : i64, tpu.core_type = #tpu.core_type<tc>, window_params = [{transform_indices = @transform_0, window_bounds = array<i64: 104, 128>}, {transform_indices = @transform_1, window_bounds = array<i64: 1, 128>}, {transform_indices = @transform_2, window_bounds = array<i64: 1, 128>}, {transform_indices = @transform_3, window_bounds = array<i64: 104, 128>}]} {
    %c0 = arith.constant 0 : index
    %c0_0 = arith.constant 0 : index
    %0 = vector.load %arg2[%c0, %c0_0] : memref<104x128xf32, #tpu.memory_space<vmem>>, vector<104x128xf32>
    %c0_1 = arith.constant 0 : index
    %c0_2 = arith.constant 0 : index
    %1 = vector.load %arg3[%c0_1, %c0_2] : memref<1x128xf32, #tpu.memory_space<vmem>>, vector<1x128xf32>
    %2 = vector.broadcast %1 : vector<1x128xf32> to vector<104x128xf32>
    %3 = arith.mulf %0, %2 : vector<104x128xf32>
    %c0_3 = arith.constant 0 : index
    %c0_4 = arith.constant 0 : index
    %4 = vector.load %arg4[%c0_3, %c0_4] : memref<1x128xf32, #tpu.memory_space<vmem>>, vector<1x128xf32>
    %5 = vector.broadcast %4 : vector<1x128xf32> to vector<104x128xf32>
    %6 = arith.addf %3, %5 : vector<104x128xf32>
    %cst = arith.constant 0.000000e+00 : f32
    %7 = vector.broadcast %cst : f32 to vector<104x128xf32>
    %8 = arith.cmpf oge, %6, %7 : vector<104x128xf32>
    %cst_5 = arith.constant 2.000000e-01 : f32
    %9 = vector.broadcast %cst_5 : f32 to vector<104x128xf32>
    %10 = arith.mulf %9, %6 : vector<104x128xf32>
    %11 = arith.select %8, %6, %10 : vector<104x128xi1>, vector<104x128xf32>
    %12 = arith.truncf %11 : vector<104x128xf32> to vector<104x128xbf16>
    %c0_6 = arith.constant 0 : index
    %c0_7 = arith.constant 0 : index
    %13 = vector.load %arg5[%c0_6, %c0_7] : memref<104x128xbf16, #tpu.memory_space<vmem>>, vector<104x128xbf16>
    tpu.vector_store %arg5[%c0_6, %c0_7], %12 {strides = array<i32>} : memref<104x128xbf16, #tpu.memory_space<vmem>>, vector<104x128xbf16>,
    return
  }
  func.func @transform_0(%arg0: i32, %arg1: i32) -> (i32, i32) {
    %c0_i32 = arith.constant 0 : i32
    return %arg0, %arg1 : i32, i32
  }
  func.func @transform_1(%arg0: i32, %arg1: i32) -> (i32, i32) {
    %c0_i32 = arith.constant 0 : i32
    %c0_i32_0 = arith.constant 0 : i32
    return %c0_i32, %arg1 : i32, i32
  }
  func.func @transform_2(%arg0: i32, %arg1: i32) -> (i32, i32) {
    %c0_i32 = arith.constant 0 : i32
    %c0_i32_0 = arith.constant 0 : i32
    return %c0_i32, %arg1 : i32, i32
  }
  func.func @transform_3(%arg0: i32, %arg1: i32) -> (i32, i32) {
    %c0_i32 = arith.constant 0 : i32
    return %arg0, %arg1 : i32, i32
  }
}

module attributes {stable_mosaic.version = 11 : i64} {
  func.func @_conv_bias_act_kernel(%arg0: i32, %arg1: i32, %arg2: memref<72x2048xbf16, #tpu.memory_space<vmem>>, %arg3: memref<2048x128xbf16, #tpu.memory_space<vmem>>, %arg4: memref<1x128xf32, #tpu.memory_space<vmem>>, %arg5: memref<72x128xf32, #tpu.memory_space<vmem>>) attributes {dimension_semantics = [#tpu.dimension_semantics<parallel>, #tpu.dimension_semantics<parallel>], iteration_bounds = array<i64: 1, 1>, scalar_prefetch = 0 : i64, scratch_operands = 0 : i64, tpu.core_type = #tpu.core_type<tc>, window_params = [{transform_indices = @transform_0, window_bounds = array<i64: 72, 2048>}, {transform_indices = @transform_1, window_bounds = array<i64: 2048, 128>}, {transform_indices = @transform_2, window_bounds = array<i64: 1, 128>}, {transform_indices = @transform_3, window_bounds = array<i64: 72, 128>}]} {
    %c0 = arith.constant 0 : index
    %c0_0 = arith.constant 0 : index
    %0 = vector.load %arg2[%c0, %c0_0] : memref<72x2048xbf16, #tpu.memory_space<vmem>>, vector<72x2048xbf16>
    %c0_1 = arith.constant 0 : index
    %c0_2 = arith.constant 0 : index
    %1 = vector.load %arg3[%c0_1, %c0_2] : memref<2048x128xbf16, #tpu.memory_space<vmem>>, vector<2048x128xbf16>
    %cst = arith.constant dense<0.000000e+00> : vector<72x128xf32>
    %2 = tpu.matmul %0, %1, %cst {dimension_numbers = #tpu.dot_dimension_numbers<[1], [0], [0], [1], [0, 0, 1, 1], [], []>} : vector<72x2048xbf16>, vector<2048x128xbf16>, vector<72x128xf32> -> vector<72x128xf32>
    %c0_3 = arith.constant 0 : index
    %c0_4 = arith.constant 0 : index
    %3 = vector.load %arg4[%c0_3, %c0_4] : memref<1x128xf32, #tpu.memory_space<vmem>>, vector<1x128xf32>
    %4 = vector.broadcast %3 : vector<1x128xf32> to vector<72x128xf32>
    %5 = arith.addf %2, %4 : vector<72x128xf32>
    %c0_5 = arith.constant 0 : index
    %c0_6 = arith.constant 0 : index
    %6 = vector.load %arg5[%c0_5, %c0_6] : memref<72x128xf32, #tpu.memory_space<vmem>>, vector<72x128xf32>
    tpu.vector_store %arg5[%c0_5, %c0_6], %5 {strides = array<i32>} : memref<72x128xf32, #tpu.memory_space<vmem>>, vector<72x128xf32>,
    return
  }
  func.func @transform_0(%arg0: i32, %arg1: i32) -> (i32, i32) {
    %c0_i32 = arith.constant 0 : i32
    %c0_i32_0 = arith.constant 0 : i32
    return %arg0, %c0_i32 : i32, i32
  }
  func.func @transform_1(%arg0: i32, %arg1: i32) -> (i32, i32) {
    %c0_i32 = arith.constant 0 : i32
    %c0_i32_0 = arith.constant 0 : i32
    return %c0_i32, %arg1 : i32, i32
  }
  func.func @transform_2(%arg0: i32, %arg1: i32) -> (i32, i32) {
    %c0_i32 = arith.constant 0 : i32
    %c0_i32_0 = arith.constant 0 : i32
    return %c0_i32, %arg1 : i32, i32
  }
  func.func @transform_3(%arg0: i32, %arg1: i32) -> (i32, i32) {
    %c0_i32 = arith.constant 0 : i32
    return %arg0, %arg1 : i32, i32
  }
}

</mosaic_0001>

<bundles_post_ra>
// kernel: nlayer_discriminator.8
= control target key start
LH: loop header
LB: loop body
LE: loop exit
PB: predicated region body
PF: predicated region fallthrough
CT: control target
= control target key end

     0   :  { %s2073_s12 = smov 0   ;;  %s2075_s13 = smov 0   ;;  %s2283_s0 = inlined_call_operand.vmem [shape: bf16[2048,128], index: 0, kind: input, shape index: {}]   ;;  %s2284_s1 = inlined_call_operand.vmem [shape: bf16[128,128], index: 1, kind: input, shape index: {}]   ;;  %s2285_s2 = inlined_call_operand.vmem [shape: f32[1,128], index: 2, kind: input, shape index: {}]   ;;  %s2286_s3 = inlined_call_operand.vmem [shape: bf16[2048,128], index: 3, kind: output, shape index: {}]  }
   0x1   :  { %s2077_s14 = smov 0  }
   0x2 LB: > { %s25_s15 = sadd.s32 1, %s2047_s13  ;;  %p1462_p0 = scmp.ge.s32.totalorder %s2051_s14, 1  ;;  %s2051_s14 = sphi %s2077_s14, %s13_s14   ;;  %s2047_s13 = sphi %s2075_s13, %s2288_s13   ;;  %s2043_s12 = sphi %s2073_s12, %s2287_s12  }
   0x3   : > { %p27_p1 = scmp.ge.s32.totalorder %s25_s15, 4  ;;  %p169_p2 = scmp.lt.s32.totalorder %s2051_s14, 5 }
   0x5   : > { %s2290_s15 = smov (%p27_p1, %s25_s15), 0  ;;  %p170_p3 = pnand %p1462_p0, %p169_p2 }
   0x6   : > { %v1989_v0 = vld [vmem:[%s2284_s1] sm:$0xff] (!%p170_p3)   ;;  %s1463_s18 = sshll.u32 (!%p170_p3), %s2043_s12, 6  ;;  %v1990_v1 = vld [vmem:[%s2284_s1 + $0x8] sm:$0xff] (!%p170_p3)   ;;  %v1991_v2 = vld [vmem:[%s2284_s1 + $0x10] sm:$0xff] (!%p170_p3)  }
   0x7   : > { %173 = sbr.rel (%p170_p3) target bundleno = 328 (0x148), region = 32  ;;  %p204_p4 = scmp.lt.s32.totalorder (!%p170_p3), %s1463_s18, 255  ;;  %1869 = vmatprep.subr.bf16.mxu0 (!%p170_p3), %v1989_v0  ;;  %1949 = vmatprep.subr.bf16.mxu1 (!%p170_p3), %v1989_v0  ;;  %v1992_v3 = vld [vmem:[%s2284_s1 + $0x18] sm:$0xff] (!%p170_p3)   ;;  %v1993_v6 = vld [vmem:[%s2284_s1 + $0x20] sm:$0xff] (!%p170_p3)   ;;  %v1994_v7 = vld [vmem:[%s2284_s1 + $0x28] sm:$0xff] (!%p170_p3)  }
   0x8   : > { %1870 = vmatpush3.bf16.msra.mxu0 (!%p170_p3), %v1989_v0  ;;  %1957 = vmatpush3.bf16.msra.mxu1 (!%p170_p3), %v1989_v0  ;;  %v1995_v8 = vld [vmem:[%s2284_s1 + $0x30] sm:$0xff] (!%p170_p3)   ;;  %v1996_v9 = vld [vmem:[%s2284_s1 + $0x38] sm:$0xff] (!%p170_p3)   ;;  %v2160_v40 = vld [vmem:[%s2285_s2] ss:$0 sm:$0xff] (!%p170_p3) }
   0x9   : > { %1871 = vmatprep.subr.bf16.mxu0 (!%p170_p3), %v1990_v1  ;;  %1950 = vmatprep.subr.bf16.mxu1 (!%p170_p3), %v1990_v1 }
   0xc   : > { %1872 = vmatpush3.bf16.msra.mxu0 (!%p170_p3), %v1990_v1  ;;  %1958 = vmatpush3.bf16.msra.mxu1 (!%p170_p3), %v1990_v1 }
   0xd   : > { %1873 = vmatprep.subr.bf16.mxu0 (!%p170_p3), %v1991_v2  ;;  %1951 = vmatprep.subr.bf16.mxu1 (!%p170_p3), %v1991_v2 }
   0xe   : > { %s2292_s18 = smov (!%p204_p4, %s1463_s18), 255 }
   0xf   : > { %s1464_s23 = sshll.u32 %s2292_s18, 2 }
  0x10   : > { %s2108_s26 = scalar_lea.vmem %s2283_s0, %s1464_s23  ;;  %1874 = vmatpush3.bf16.msra.mxu0 %v1991_v2  ;;  %1959 = vmatpush3.bf16.msra.mxu1 %v1991_v2  ;;  %s2177_s17 = scalar_lea.vmem %s2286_s3, %s1464_s23 }
  0x11   : > { %v1997_v4 = vld [vmem:[%s2108_s26] sm:$0xff]   ;;  %1875 = vmatprep.subr.bf16.mxu0 %v1992_v3  ;;  %1952 = vmatprep.subr.bf16.mxu1 %v1992_v3  ;;  %v1999_v10 = vld [vmem:[%s2108_s26 + $0x8] sm:$0xff]   ;;  %v2001_v12 = vld [vmem:[%s2108_s26 + $0x10] sm:$0xff]  }
  0x12   : > { %v1998_v5 = vld [vmem:[%s2108_s26 + $0x80] sm:$0xff]   ;;  %1885 = vmatprep.mubr.bf16.mxu0 %v1997_v4  ;;  %v2000_v11 = vld [vmem:[%s2108_s26 + $0x88] sm:$0xff]   ;;  %v2002_v13 = vld [vmem:[%s2108_s26 + $0x90] sm:$0xff]  }
  0x13   : > { %1917 = vmatprep.mubr.bf16.mxu1 %v1998_v5  ;;  %v2003_v14 = vld [vmem:[%s2108_s26 + $0x18] sm:$0xff]   ;;  %v2005_v16 = vld [vmem:[%s2108_s26 + $0x20] sm:$0xff]   ;;  %v2007_v18 = vld [vmem:[%s2108_s26 + $0x28] sm:$0xff]  }
  0x14   : > { %1876 = vmatpush3.bf16.msra.mxu0 %v1992_v3  ;;  %1960 = vmatpush3.bf16.msra.mxu1 %v1992_v3  ;;  %v2004_v15 = vld [vmem:[%s2108_s26 + $0x98] sm:$0xff]   ;;  %v2006_v17 = vld [vmem:[%s2108_s26 + $0xa0] sm:$0xff]   ;;  %v2008_v19 = vld [vmem:[%s2108_s26 + $0xa8] sm:$0xff]  }
  0x15   : > { %1877 = vmatprep.subr.bf16.mxu0 %v1993_v6  ;;  %1953 = vmatprep.subr.bf16.mxu1 %v1993_v6  ;;  %v2009_v20 = vld [vmem:[%s2108_s26 + $0x30] sm:$0xff]   ;;  %v2011_v22 = vld [vmem:[%s2108_s26 + $0x38] sm:$0xff]   ;;  %v2013_v24 = vld [vmem:[%s2108_s26 + $0x40] sm:$0xff]  }
  0x16   : > { %v2010_v21 = vld [vmem:[%s2108_s26 + $0xb0] sm:$0xff]   ;;  %v2012_v23 = vld [vmem:[%s2108_s26 + $0xb8] sm:$0xff]   ;;  %v2014_v25 = vld [vmem:[%s2108_s26 + $0xc0] sm:$0xff]  }
  0x17   : > { %v2015_v26 = vld [vmem:[%s2108_s26 + $0x48] sm:$0xff]   ;;  %v2017_v28 = vld [vmem:[%s2108_s26 + $0x50] sm:$0xff]   ;;  %v2019_v30 = vld [vmem:[%s2108_s26 + $0x58] sm:$0xff]  }
  0x18   : > { %1878 = vmatpush3.bf16.msra.mxu0 %v1993_v6  ;;  %1961 = vmatpush3.bf16.msra.mxu1 %v1993_v6  ;;  %v2016_v27 = vld [vmem:[%s2108_s26 + $0xc8] sm:$0xff]   ;;  %v2018_v29 = vld [vmem:[%s2108_s26 + $0xd0] sm:$0xff]   ;;  %v2020_v31 = vld [vmem:[%s2108_s26 + $0xd8] sm:$0xff]  }
  0x19   : > { %1879 = vmatprep.subr.bf16.mxu0 %v1994_v7  ;;  %1954 = vmatprep.subr.bf16.mxu1 %v1994_v7  ;;  %v2021_v32 = vld [vmem:[%s2108_s26 + $0x60] sm:$0xff]   ;;  %v2023_v34 = vld [vmem:[%s2108_s26 + $0x68] sm:$0xff]   ;;  %v2025_v36 = vld [vmem:[%s2108_s26 + $0x70] sm:$0xff]  }
  0x1a   : > { %v2022_v33 = vld [vmem:[%s2108_s26 + $0xe0] sm:$0xff]   ;;  %v2024_v35 = vld [vmem:[%s2108_s26 + $0xe8] sm:$0xff]   ;;  %v2026_v37 = vld [vmem:[%s2108_s26 + $0xf0] sm:$0xff]  }
  0x1b   : > { %v2027_v38 = vld [vmem:[%s2108_s26 + $0x78] sm:$0xff]  }
  0x1c   : > { %1880 = vmatpush3.bf16.msra.mxu0 %v1994_v7  ;;  %1962 = vmatpush3.bf16.msra.mxu1 %v1994_v7  ;;  %v2028_v39 = vld [vmem:[%s2108_s26 + $0xf8] sm:$0xff]  }
  0x1d   : > { %1881 = vmatprep.subr.bf16.mxu0 %v1995_v8  ;;  %1955 = vmatprep.subr.bf16.mxu1 %v1995_v8 }
  0x20   : > { %1882 = vmatpush3.bf16.msra.mxu0 %v1995_v8  ;;  %1963 = vmatpush3.bf16.msra.mxu1 %v1995_v8 }
  0x21   : > { %1883 = vmatprep.subr.bf16.mxu0 %v1996_v9  ;;  %1956 = vmatprep.subr.bf16.mxu1 %v1996_v9 }
  0x24   : > { %1884 = vmatpush3.bf16.msra.mxu0 %v1996_v9  ;;  %1964 = vmatpush3.bf16.msra.mxu1 %v1996_v9 }
  0x27   : > { %1886 = vmatmul.mubr.bf16.vlgmr.msra.gmra.mrb[0].mxu0 %v1999_v10  ;;  %1918 = vmatmul.mubr.bf16.vlgmr.msra.gmra.mrb[0].mxu1 %v2000_v11 }
  0x28   : > { %1889 = vmatprep.mubr.bf16.mxu0 %v2001_v12  ;;  %1921 = vmatprep.mubr.bf16.mxu1 %v2002_v13 }
  0x2f   : > { %1890 = vmatmul.mubr.bf16.gmra.mrb[4].mxu0 %v2003_v14  ;;  %1922 = vmatmul.mubr.bf16.gmra.mrb[4].mxu1 %v2004_v15 }
  0x30   : > { %1893 = vmatprep.mubr.bf16.mxu0 %v2005_v16  ;;  %1925 = vmatprep.mubr.bf16.mxu1 %v2006_v17 }
  0x37   : > { %1894 = vmatmul.mubr.bf16.gmra.mrb[8].mxu0 %v2007_v18  ;;  %1926 = vmatmul.mubr.bf16.gmra.mrb[8].mxu1 %v2008_v19 }
  0x38   : > { %1897 = vmatprep.mubr.bf16.mxu0 %v2009_v20  ;;  %1929 = vmatprep.mubr.bf16.mxu1 %v2010_v21 }
  0x3f   : > { %1898 = vmatmul.mubr.bf16.gmra.mrb[12].mxu0 %v2011_v22  ;;  %1930 = vmatmul.mubr.bf16.gmra.mrb[12].mxu1 %v2012_v23 }
  0x40   : > { %1901 = vmatprep.mubr.bf16.mxu0 %v2013_v24  ;;  %1933 = vmatprep.mubr.bf16.mxu1 %v2014_v25 }
  0x47   : > { %1902 = vmatmul.mubr.bf16.gmra.mrb[16].mxu0 %v2015_v26  ;;  %1934 = vmatmul.mubr.bf16.gmra.mrb[16].mxu1 %v2016_v27 }
  0x48   : > { %1905 = vmatprep.mubr.bf16.mxu0 %v2017_v28  ;;  %1937 = vmatprep.mubr.bf16.mxu1 %v2018_v29 }
  0x4f   : > { %1906 = vmatmul.mubr.bf16.gmra.mrb[20].mxu0 %v2019_v30  ;;  %1938 = vmatmul.mubr.bf16.gmra.mrb[20].mxu1 %v2020_v31 }
  0x50   : > { %1909 = vmatprep.mubr.bf16.mxu0 %v2021_v32  ;;  %1941 = vmatprep.mubr.bf16.mxu1 %v2022_v33 }
  0x57   : > { %1910 = vmatmul.mubr.bf16.gmra.mrb[24].mxu0 %v2023_v34  ;;  %1942 = vmatmul.mubr.bf16.gmra.mrb[24].mxu1 %v2024_v35 }
  0x58   : > { %1913 = vmatprep.mubr.bf16.mxu0 %v2025_v36  ;;  %1945 = vmatprep.mubr.bf16.mxu1 %v2026_v37 }
  0x5f   : > { %1914 = vmatmul.mubr.bf16.gmra.mrb[28].mxu0 %v2027_v38  ;;  %1946 = vmatmul.mubr.bf16.gmra.mrb[28].mxu1 %v2028_v39 }
  0xfa   : > { %v1887_v41 = vpop.f32.mrb[0].mxu0  ;;  %v1919_v42 = vpop.f32.mrb[0].mxu1 }
  0xfb   : > { %v596_v43 = vadd.f32 %v1887_v41, %v2160_v40  ;;  %v724_v44 = vadd.f32 %v1919_v42, %v2160_v40  ;;  %v587_v45 = vpop.f32.mrb[1].mxu0  ;;  %v715_v46 = vpop.f32.mrb[1].mxu1 }
  0xfc   : > { %v588_v47 = vadd.f32 %v2160_v40, %v587_v45  ;;  %v716_v48 = vadd.f32 %v2160_v40, %v715_v46  ;;  %v1888_v49 = vpop.f32.mrb[2].mxu0  ;;  %v1920_v50 = vpop.f32.mrb[2].mxu1 }
  0xfd   : > { %vm844_vm0 = vcmp.ge.f32.partialorder %v596_v43, 0.0  ;;  %v908_v51 = vmul.f32 0.2, %v596_v43  ;;  %vm876_vm1 = vcmp.ge.f32.partialorder %v724_v44, 0.0  ;;  %v940_v52 = vmul.f32 0.2, %v724_v44 }
  0xfe   : > { %vm842_vm2 = vcmp.ge.f32.partialorder %v588_v47, 0.0  ;;  %v906_v53 = vmul.f32 0.2, %v588_v47  ;;  %vm874_vm3 = vcmp.ge.f32.partialorder %v716_v48, 0.0  ;;  %v938_v54 = vmul.f32 0.2, %v716_v48 }
  0xff   : > { %v599_v55 = vadd.f32 %v1888_v49, %v2160_v40  ;;  %v727_v56 = vadd.f32 %v1920_v50, %v2160_v40  ;;  %v590_v57 = vpop.f32.mrb[3].mxu0  ;;  %v718_v58 = vpop.f32.mrb[3].mxu1  ;;  %v972_v59 = vsel %vm844_vm0, %v596_v43, %v908_v51  ;;  %v1004_v60 = vsel %vm876_vm1, %v724_v44, %v940_v52 }
 0x100   : > { %v591_v61 = vadd.f32 %v2160_v40, %v590_v57  ;;  %v719_v62 = vadd.f32 %v2160_v40, %v718_v58  ;;  %v970_v3 = vsel %vm842_vm2, %v588_v47, %v906_v53  ;;  %v1002_v4 = vsel %vm874_vm3, %v716_v48, %v938_v54 }
 0x101   : > { %vm845_vm4 = vcmp.ge.f32.partialorder %v599_v55, 0.0  ;;  %v909_v63 = vmul.f32 0.2, %v599_v55  ;;  %vm877_vm5 = vcmp.ge.f32.partialorder %v727_v56, 0.0  ;;  %v941_v0 = vmul.f32 0.2, %v727_v56 }
 0x102   : > { %vm843_vm6 = vcmp.ge.f32.partialorder %v591_v61, 0.0  ;;  %v907_v1 = vmul.f32 0.2, %v591_v61  ;;  %vm875_vm7 = vcmp.ge.f32.partialorder %v719_v62, 0.0  ;;  %v939_v2 = vmul.f32 0.2, %v719_v62 }
 0x103   : > { %v973_v5 = vsel %vm845_vm4, %v599_v55, %v909_v63  ;;  %v1005_v6 = vsel %vm877_vm5, %v727_v56, %v941_v0  ;;  %v1891_v7 = vpop.f32.mrb[4].mxu0  ;;  %v1923_v8 = vpop.f32.mrb[4].mxu1 }
 0x104   : > { %v1646_v9 = vpack.c.bf16 %v973_v5, %v972_v59  ;;  %v1726_v10 = vpack.c.bf16 %v1005_v6, %v1004_v60  ;;  %v971_v11 = vsel %vm843_vm6, %v591_v61, %v907_v1  ;;  %v1003_v12 = vsel %vm875_vm7, %v719_v62, %v939_v2  ;;  %v603_v13 = vpop.f32.mrb[5].mxu0  ;;  %v731_v14 = vpop.f32.mrb[5].mxu1 }
 0x105   : > { %v1641_v15 = vpack.c.bf16 %v971_v11, %v970_v3  ;;  %v1721_v16 = vpack.c.bf16 %v1003_v12, %v1002_v4  ;;  %v612_v17 = vadd.f32 %v1891_v7, %v2160_v40  ;;  %v740_v18 = vadd.f32 %v1923_v8, %v2160_v40  ;;  %v1892_v19 = vpop.f32.mrb[6].mxu0  ;;  %v1924_v20 = vpop.f32.mrb[6].mxu1 }
 0x106   : > { %1798 = vst [vmem:[%s2177_s17 + $0x8] sm:$0xff] %v1646_v9   ;;  %1814 = vst [vmem:[%s2177_s17 + $0x88] sm:$0xff] %v1726_v10   ;;  %v604_v21 = vadd.f32 %v2160_v40, %v603_v13  ;;  %v732_v22 = vadd.f32 %v2160_v40, %v731_v14  ;;  %v615_v23 = vadd.f32 %v1892_v19, %v2160_v40  ;;  %v606_v25 = vpop.f32.mrb[7].mxu0  ;;  %v734_v26 = vpop.f32.mrb[7].mxu1 }
 0x107   : > { %v743_v24 = vadd.f32 %v1924_v20, %v2160_v40  ;;  %1642 = vst [vmem:[%s2177_s17] sm:$0xff] %v1641_v15   ;;  %1813 = vst [vmem:[%s2177_s17 + $0x80] sm:$0xff] %v1721_v16   ;;  %vm848_vm8 = vcmp.ge.f32.partialorder %v612_v17, 0.0  ;;  %v912_v27 = vmul.f32 0.2, %v612_v17  ;;  %vm880_vm9 = vcmp.ge.f32.partialorder %v740_v18, 0.0 }
 0x108   : > { %v944_v28 = vmul.f32 0.2, %v740_v18  ;;  %vm846_vm10 = vcmp.ge.f32.partialorder %v604_v21, 0.0  ;;  %v910_v29 = vmul.f32 0.2, %v604_v21  ;;  %vm878_vm11 = vcmp.ge.f32.partialorder %v732_v22, 0.0 }
 0x109   : > { %v942_v30 = vmul.f32 0.2, %v732_v22  ;;  %v976_v31 = vsel %vm848_vm8, %v612_v17, %v912_v27  ;;  %vm849_vm12 = vcmp.ge.f32.partialorder %v615_v23, 0.0  ;;  %v913_v33 = vmul.f32 0.2, %v615_v23 }
 0x10a   : > { %v1008_v32 = vsel %vm880_vm9, %v740_v18, %v944_v28  ;;  %v974_v34 = vsel %vm846_vm10, %v604_v21, %v910_v29  ;;  %vm881_vm13 = vcmp.ge.f32.partialorder %v743_v24, 0.0  ;;  %v945_v36 = vmul.f32 0.2, %v743_v24  ;;  %v1895_v37 = vpop.f32.mrb[8].mxu0  ;;  %v1927_v38 = vpop.f32.mrb[8].mxu1 }
 0x10b   : > { %v1006_v35 = vsel %vm878_vm11, %v732_v22, %v942_v30  ;;  %v977_v39 = vsel %vm849_vm12, %v615_v23, %v913_v33  ;;  %v607_v41 = vadd.f32 %v2160_v40, %v606_v25  ;;  %v735_v42 = vadd.f32 %v2160_v40, %v734_v26  ;;  %v619_v44 = vpop.f32.mrb[9].mxu0  ;;  %v747_v45 = vpop.f32.mrb[9].mxu1 }
 0x10c   : > { %v628_v43 = vadd.f32 %v1895_v37, %v2160_v40  ;;  %v1656_v46 = vpack.c.bf16 %v977_v39, %v976_v31  ;;  %v1009_v47 = vsel %vm881_vm13, %v743_v24, %v945_v36  ;;  %v756_v48 = vadd.f32 %v1927_v38, %v2160_v40  ;;  %v1896_v50 = vpop.f32.mrb[10].mxu0  ;;  %v1928_v51 = vpop.f32.mrb[10].mxu1 }
 0x10d   : > { %v620_v49 = vadd.f32 %v2160_v40, %v619_v44  ;;  %v1736_v52 = vpack.c.bf16 %v1009_v47, %v1008_v32  ;;  %vm847_vm14 = vcmp.ge.f32.partialorder %v607_v41, 0.0  ;;  %v911_v53 = vmul.f32 0.2, %v607_v41  ;;  %v622_v54 = vpop.f32.mrb[11].mxu0  ;;  %v750_v55 = vpop.f32.mrb[11].mxu1 }
 0x10e   : > { %vm879_vm15 = vcmp.ge.f32.partialorder %v735_v42, 0.0  ;;  %1800 = vst [vmem:[%s2177_s17 + $0x18] sm:$0xff] %v1656_v46   ;;  %v943_v56 = vmul.f32 0.2, %v735_v42  ;;  %vm852_vm0 = vcmp.ge.f32.partialorder %v628_v43, 0.0  ;;  %vm884_vm1 = vcmp.ge.f32.partialorder %v756_v48, 0.0 }
 0x10f   : > { %v916_v57 = vmul.f32 0.2, %v628_v43  ;;  %1816 = vst [vmem:[%s2177_s17 + $0x98] sm:$0xff] %v1736_v52   ;;  %v975_v58 = vsel %vm847_vm14, %v607_v41, %v911_v53  ;;  %v948_v59 = vmul.f32 0.2, %v756_v48  ;;  %vm850_vm2 = vcmp.ge.f32.partialorder %v620_v49, 0.0 }
 0x110   : > { %v914_v60 = vmul.f32 0.2, %v620_v49  ;;  %v1651_v61 = vpack.c.bf16 %v975_v58, %v974_v34  ;;  %v1007_v62 = vsel %vm879_vm15, %v735_v42, %v943_v56  ;;  %v748_v0 = vadd.f32 %v2160_v40, %v747_v45 }
 0x111   : > { %v980_v63 = vsel %vm852_vm0, %v628_v43, %v916_v57  ;;  %v1731_v1 = vpack.c.bf16 %v1007_v62, %v1006_v35  ;;  %v1012_v2 = vsel %vm884_vm1, %v756_v48, %v948_v59  ;;  %v631_v4 = vadd.f32 %v1896_v50, %v2160_v40 }
 0x112   : > { %v978_v3 = vsel %vm850_vm2, %v620_v49, %v914_v60  ;;  %1799 = vst [vmem:[%s2177_s17 + $0x10] sm:$0xff] %v1651_v61   ;;  %vm882_vm3 = vcmp.ge.f32.partialorder %v748_v0, 0.0  ;;  %v946_v5 = vmul.f32 0.2, %v748_v0  ;;  %v759_v6 = vadd.f32 %v1928_v51, %v2160_v40  ;;  %v1899_v8 = vpop.f32.mrb[12].mxu0  ;;  %v1931_v9 = vpop.f32.mrb[12].mxu1 }
 0x113   : > { %v623_v7 = vadd.f32 %v2160_v40, %v622_v54  ;;  %1815 = vst [vmem:[%s2177_s17 + $0x90] sm:$0xff] %v1731_v1   ;;  %vm853_vm4 = vcmp.ge.f32.partialorder %v631_v4, 0.0  ;;  %v917_v10 = vmul.f32 0.2, %v631_v4  ;;  %v751_v11 = vadd.f32 %v2160_v40, %v750_v55  ;;  %v635_v13 = vpop.f32.mrb[13].mxu0  ;;  %v763_v14 = vpop.f32.mrb[13].mxu1 }
 0x114   : > { %v644_v12 = vadd.f32 %v1899_v8, %v2160_v40  ;;  %v1010_v15 = vsel %vm882_vm3, %v748_v0, %v946_v5  ;;  %vm885_vm5 = vcmp.ge.f32.partialorder %v759_v6, 0.0  ;;  %v949_v16 = vmul.f32 0.2, %v759_v6  ;;  %v1900_v17 = vpop.f32.mrb[14].mxu0  ;;  %v1932_v18 = vpop.f32.mrb[14].mxu1 }
 0x115   : > { %vm851_vm6 = vcmp.ge.f32.partialorder %v623_v7, 0.0  ;;  %v981_v19 = vsel %vm853_vm4, %v631_v4, %v917_v10  ;;  %v915_v20 = vmul.f32 0.2, %v623_v7  ;;  %vm883_vm7 = vcmp.ge.f32.partialorder %v751_v11, 0.0  ;;  %v638_v22 = vpop.f32.mrb[15].mxu0  ;;  %v766_v26 = vpop.f32.mrb[15].mxu1 }
 0x116   : > { %v947_v21 = vmul.f32 0.2, %v751_v11  ;;  %v1666_v23 = vpack.c.bf16 %v981_v19, %v980_v63  ;;  %v1013_v24 = vsel %vm885_vm5, %v759_v6, %v949_v16  ;;  %vm856_vm8 = vcmp.ge.f32.partialorder %v644_v12, 0.0 }
 0x117   : > { %v920_v25 = vmul.f32 0.2, %v644_v12  ;;  %v1746_v27 = vpack.c.bf16 %v1013_v24, %v1012_v2  ;;  %v979_v28 = vsel %vm851_vm6, %v623_v7, %v915_v20  ;;  %v772_v30 = vadd.f32 %v1931_v9, %v2160_v40 }
 0x118   : > { %v1011_v29 = vsel %vm883_vm7, %v751_v11, %v947_v21  ;;  %1802 = vst [vmem:[%s2177_s17 + $0x28] sm:$0xff] %v1666_v23   ;;  %v1661_v31 = vpack.c.bf16 %v979_v28, %v978_v3  ;;  %v636_v34 = vadd.f32 %v2160_v40, %v635_v13  ;;  %v764_v36 = vadd.f32 %v2160_v40, %v763_v14 }
 0x119   : > { %v1741_v32 = vpack.c.bf16 %v1011_v29, %v1010_v15  ;;  %v984_v33 = vsel %vm856_vm8, %v644_v12, %v920_v25  ;;  %1818 = vst [vmem:[%s2177_s17 + $0xa8] sm:$0xff] %v1746_v27   ;;  %vm888_vm9 = vcmp.ge.f32.partialorder %v772_v30, 0.0  ;;  %v952_v35 = vmul.f32 0.2, %v772_v30 }
 0x11a   : > { %v647_v37 = vadd.f32 %v1900_v17, %v2160_v40  ;;  %1801 = vst [vmem:[%s2177_s17 + $0x20] sm:$0xff] %v1661_v31   ;;  %vm854_vm10 = vcmp.ge.f32.partialorder %v636_v34, 0.0  ;;  %v918_v38 = vmul.f32 0.2, %v636_v34  ;;  %v775_v39 = vadd.f32 %v1932_v18, %v2160_v40  ;;  %v1903_v42 = vpop.f32.mrb[16].mxu0  ;;  %v1935_v43 = vpop.f32.mrb[16].mxu1 }
 0x11b   : > { %1817 = vst [vmem:[%s2177_s17 + $0xa0] sm:$0xff] %v1741_v32   ;;  %v639_v41 = vadd.f32 %v2160_v40, %v638_v22  ;;  %v1016_v44 = vsel %vm888_vm9, %v772_v30, %v952_v35  ;;  %vm886_vm11 = vcmp.ge.f32.partialorder %v764_v36, 0.0  ;;  %v950_v45 = vmul.f32 0.2, %v764_v36  ;;  %v651_v46 = vpop.f32.mrb[17].mxu0  ;;  %v779_v47 = vpop.f32.mrb[17].mxu1 }
 0x11c   : > { %vm857_vm12 = vcmp.ge.f32.partialorder %v647_v37, 0.0  ;;  %v982_v48 = vsel %vm854_vm10, %v636_v34, %v918_v38  ;;  %v921_v49 = vmul.f32 0.2, %v647_v37  ;;  %vm889_vm13 = vcmp.ge.f32.partialorder %v775_v39, 0.0  ;;  %v1904_v51 = vpop.f32.mrb[18].mxu0  ;;  %v1936_v55 = vpop.f32.mrb[18].mxu1 }
 0x11d   : > { %v953_v50 = vmul.f32 0.2, %v775_v39  ;;  %v1014_v52 = vsel %vm886_vm11, %v764_v36, %v950_v45  ;;  %vm855_vm14 = vcmp.ge.f32.partialorder %v639_v41, 0.0  ;;  %v919_v53 = vmul.f32 0.2, %v639_v41  ;;  %v654_v56 = vpop.f32.mrb[19].mxu0 }
 0x11e   : > { %v767_v54 = vadd.f32 %v2160_v40, %v766_v26  ;;  %v985_v57 = vsel %vm857_vm12, %v647_v37, %v921_v49  ;;  %v660_v59 = vadd.f32 %v1903_v42, %v2160_v40  ;;  %v788_v60 = vadd.f32 %v1935_v43, %v2160_v40  ;;  %v782_v61 = vpop.f32.mrb[19].mxu1 }
 0x11f   : > { %v1017_v58 = vsel %vm889_vm13, %v775_v39, %v953_v50  ;;  %v1676_v62 = vpack.c.bf16 %v985_v57, %v984_v33  ;;  %v983_v0 = vsel %vm855_vm14, %v639_v41, %v919_v53  ;;  %v652_v5 = vadd.f32 %v2160_v40, %v651_v46 }
 0x120   : > { %v1756_v63 = vpack.c.bf16 %v1017_v58, %v1016_v44  ;;  %vm887_vm15 = vcmp.ge.f32.partialorder %v767_v54, 0.0  ;;  %v1671_v1 = vpack.c.bf16 %v983_v0, %v982_v48  ;;  %v951_v2 = vmul.f32 0.2, %v767_v54 }
 0x121   : > { %vm860_vm0 = vcmp.ge.f32.partialorder %v660_v59, 0.0  ;;  %v924_v3 = vmul.f32 0.2, %v660_v59  ;;  %1804 = vst [vmem:[%s2177_s17 + $0x38] sm:$0xff] %v1676_v62   ;;  %vm892_vm1 = vcmp.ge.f32.partialorder %v788_v60, 0.0  ;;  %v780_v6 = vadd.f32 %v2160_v40, %v779_v47 }
 0x122   : > { %1820 = vst [vmem:[%s2177_s17 + $0xb8] sm:$0xff] %v1756_v63   ;;  %v956_v4 = vmul.f32 0.2, %v788_v60  ;;  %1803 = vst [vmem:[%s2177_s17 + $0x30] sm:$0xff] %v1671_v1   ;;  %v1015_v7 = vsel %vm887_vm15, %v767_v54, %v951_v2  ;;  %v663_v9 = vadd.f32 %v1904_v51, %v2160_v40  ;;  %v791_v10 = vadd.f32 %v1936_v55, %v2160_v40  ;;  %v1907_v11 = vpop.f32.mrb[20].mxu0  ;;  %v1939_v12 = vpop.f32.mrb[20].mxu1 }
 0x123   : > { %v988_v8 = vsel %vm860_vm0, %v660_v59, %v924_v3  ;;  %v1751_v13 = vpack.c.bf16 %v1015_v7, %v1014_v52  ;;  %vm858_vm2 = vcmp.ge.f32.partialorder %v652_v5, 0.0  ;;  %v922_v15 = vmul.f32 0.2, %v652_v5  ;;  %v667_v16 = vpop.f32.mrb[21].mxu0  ;;  %v795_v17 = vpop.f32.mrb[21].mxu1 }
 0x124   : > { %v1020_v14 = vsel %vm892_vm1, %v788_v60, %v956_v4  ;;  %vm890_vm3 = vcmp.ge.f32.partialorder %v780_v6, 0.0  ;;  %v954_v18 = vmul.f32 0.2, %v780_v6  ;;  %vm861_vm4 = vcmp.ge.f32.partialorder %v663_v9, 0.0  ;;  %v1908_v23 = vpop.f32.mrb[22].mxu0  ;;  %v1940_v24 = vpop.f32.mrb[22].mxu1 }
 0x125   : > { %v925_v19 = vmul.f32 0.2, %v663_v9  ;;  %1819 = vst [vmem:[%s2177_s17 + $0xb0] sm:$0xff] %v1751_v13   ;;  %v986_v20 = vsel %vm858_vm2, %v652_v5, %v922_v15  ;;  %vm893_vm5 = vcmp.ge.f32.partialorder %v791_v10, 0.0  ;;  %v957_v21 = vmul.f32 0.2, %v791_v10 }
 0x126   : > { %v655_v22 = vadd.f32 %v2160_v40, %v654_v56  ;;  %v1018_v25 = vsel %vm890_vm3, %v780_v6, %v954_v18  ;;  %v783_v27 = vadd.f32 %v2160_v40, %v782_v61  ;;  %v676_v28 = vadd.f32 %v1907_v11, %v2160_v40  ;;  %v670_v29 = vpop.f32.mrb[23].mxu0  ;;  %v798_v30 = vpop.f32.mrb[23].mxu1 }
 0x127   : > { %v989_v26 = vsel %vm861_vm4, %v663_v9, %v925_v19  ;;  %v1021_v32 = vsel %vm893_vm5, %v791_v10, %v957_v21  ;;  %v804_v38 = vadd.f32 %v1939_v12, %v2160_v40  ;;  %v668_v39 = vadd.f32 %v2160_v40, %v667_v16 }
 0x128   : > { %v1686_v31 = vpack.c.bf16 %v989_v26, %v988_v8  ;;  %vm859_vm6 = vcmp.ge.f32.partialorder %v655_v22, 0.0  ;;  %v923_v33 = vmul.f32 0.2, %v655_v22  ;;  %v1766_v34 = vpack.c.bf16 %v1021_v32, %v1020_v14 }
 0x129   : > { %vm891_vm7 = vcmp.ge.f32.partialorder %v783_v27, 0.0  ;;  %v955_v35 = vmul.f32 0.2, %v783_v27  ;;  %vm864_vm8 = vcmp.ge.f32.partialorder %v676_v28, 0.0  ;;  %v928_v37 = vmul.f32 0.2, %v676_v28 }
 0x12a   : > { %1806 = vst [vmem:[%s2177_s17 + $0x48] sm:$0xff] %v1686_v31   ;;  %v987_v36 = vsel %vm859_vm6, %v655_v22, %v923_v33  ;;  %1822 = vst [vmem:[%s2177_s17 + $0xc8] sm:$0xff] %v1766_v34   ;;  %v796_v43 = vadd.f32 %v2160_v40, %v795_v17  ;;  %v679_v44 = vadd.f32 %v1908_v23, %v2160_v40  ;;  %v1911_v45 = vpop.f32.mrb[24].mxu0  ;;  %v1943_v46 = vpop.f32.mrb[24].mxu1  ;;  %vm896_vm9 = vcmp.ge.f32.partialorder %v804_v38, 0.0 }
 0x12b   : > { %v1681_v41 = vpack.c.bf16 %v987_v36, %v986_v20  ;;  %v1019_v42 = vsel %vm891_vm7, %v783_v27, %v955_v35  ;;  %v960_v48 = vmul.f32 0.2, %v804_v38  ;;  %v683_v49 = vpop.f32.mrb[25].mxu0  ;;  %v811_v50 = vpop.f32.mrb[25].mxu1  ;;  %v992_v51 = vsel %vm864_vm8, %v676_v28, %v928_v37 }
 0x12c   : > { %v1761_v47 = vpack.c.bf16 %v1019_v42, %v1018_v25  ;;  %vm862_vm10 = vcmp.ge.f32.partialorder %v668_v39, 0.0  ;;  %v926_v52 = vmul.f32 0.2, %v668_v39  ;;  %v958_v53 = vmul.f32 0.2, %v796_v43  ;;  %v1912_v56 = vpop.f32.mrb[26].mxu0 }
 0x12d   : > { %1805 = vst [vmem:[%s2177_s17 + $0x40] sm:$0xff] %v1681_v41   ;;  %vm894_vm11 = vcmp.ge.f32.partialorder %v796_v43, 0.0  ;;  %vm865_vm12 = vcmp.ge.f32.partialorder %v679_v44, 0.0  ;;  %v929_v54 = vmul.f32 0.2, %v679_v44  ;;  %v807_v55 = vadd.f32 %v1940_v24, %v2160_v40  ;;  %v1944_v57 = vpop.f32.mrb[26].mxu1 }
 0x12e   : > { %1821 = vst [vmem:[%s2177_s17 + $0xc0] sm:$0xff] %v1761_v47   ;;  %v1024_v58 = vsel %vm896_vm9, %v804_v38, %v960_v48  ;;  %v990_v59 = vsel %vm862_vm10, %v668_v39, %v926_v52  ;;  %v671_v60 = vadd.f32 %v2160_v40, %v670_v29  ;;  %v799_v61 = vadd.f32 %v2160_v40, %v798_v30  ;;  %v686_v62 = vpop.f32.mrb[27].mxu0  ;;  %v814_v63 = vpop.f32.mrb[27].mxu1 }
 0x12f   : > { %v993_v0 = vsel %vm865_vm12, %v679_v44, %v929_v54  ;;  %vm897_vm13 = vcmp.ge.f32.partialorder %v807_v55, 0.0  ;;  %v961_v1 = vmul.f32 0.2, %v807_v55  ;;  %v692_v2 = vadd.f32 %v1911_v45, %v2160_v40 }
 0x130   : > { %v1696_v3 = vpack.c.bf16 %v993_v0, %v992_v51  ;;  %vm863_vm14 = vcmp.ge.f32.partialorder %v671_v60, 0.0  ;;  %v927_v4 = vmul.f32 0.2, %v671_v60  ;;  %vm895_vm15 = vcmp.ge.f32.partialorder %v799_v61, 0.0 }
 0x131   : > { %v1025_v5 = vsel %vm897_vm13, %v807_v55, %v961_v1  ;;  %v959_v6 = vmul.f32 0.2, %v799_v61  ;;  %vm868_vm0 = vcmp.ge.f32.partialorder %v692_v2, 0.0  ;;  %v932_v7 = vmul.f32 0.2, %v692_v2 }
 0x132   : > { %1808 = vst [vmem:[%s2177_s17 + $0x58] sm:$0xff] %v1696_v3   ;;  %v1776_v8 = vpack.c.bf16 %v1025_v5, %v1024_v58  ;;  %v991_v9 = vsel %vm863_vm14, %v671_v60, %v927_v4  ;;  %v820_v10 = vadd.f32 %v1943_v46, %v2160_v40  ;;  %v684_v11 = vadd.f32 %v2160_v40, %v683_v49  ;;  %v1915_v12 = vpop.f32.mrb[28].mxu0  ;;  %v1947_v13 = vpop.f32.mrb[28].mxu1 }
 0x133   : > { %v1022_v14 = vsel %vm894_vm11, %v796_v43, %v958_v53  ;;  %v1691_v15 = vpack.c.bf16 %v991_v9, %v990_v59  ;;  %v1023_v16 = vsel %vm895_vm15, %v799_v61, %v959_v6  ;;  %v812_v17 = vadd.f32 %v2160_v40, %v811_v50  ;;  %v699_v18 = vpop.f32.mrb[29].mxu0  ;;  %v827_v19 = vpop.f32.mrb[29].mxu1 }
 0x134   : > { %1824 = vst [vmem:[%s2177_s17 + $0xd8] sm:$0xff] %v1776_v8   ;;  %v1771_v20 = vpack.c.bf16 %v1023_v16, %v1022_v14  ;;  %vm900_vm1 = vcmp.ge.f32.partialorder %v820_v10, 0.0  ;;  %v964_v21 = vmul.f32 0.2, %v820_v10  ;;  %vm866_vm2 = vcmp.ge.f32.partialorder %v684_v11, 0.0  ;;  %v1916_v22 = vpop.f32.mrb[30].mxu0 }
 0x135   : > { %v1948_v23 = vpop.f32.mrb[30].mxu1  ;;  %1807 = vst [vmem:[%s2177_s17 + $0x50] sm:$0xff] %v1691_v15   ;;  %v996_v24 = vsel %vm868_vm0, %v692_v2, %v932_v7  ;;  %v930_v25 = vmul.f32 0.2, %v684_v11  ;;  %vm898_vm3 = vcmp.ge.f32.partialorder %v812_v17, 0.0  ;;  %v695_v26 = vadd.f32 %v1912_v56, %v2160_v40  ;;  %v702_v27 = vpop.f32.mrb[31].mxu0 }
 0x136   : > { %1823 = vst [vmem:[%s2177_s17 + $0xd0] sm:$0xff] %v1771_v20   ;;  %v962_v28 = vmul.f32 0.2, %v812_v17  ;;  %v823_v29 = vadd.f32 %v1944_v57, %v2160_v40  ;;  %v687_v30 = vadd.f32 %v2160_v40, %v686_v62  ;;  %v815_v31 = vadd.f32 %v2160_v40, %v814_v63  ;;  %v830_v32 = vpop.f32.mrb[31].mxu1 }
 0x137   : > { %v1028_v33 = vsel %vm900_vm1, %v820_v10, %v964_v21  ;;  %v994_v34 = vsel %vm866_vm2, %v684_v11, %v930_v25  ;;  %vm869_vm4 = vcmp.ge.f32.partialorder %v695_v26, 0.0  ;;  %v933_v35 = vmul.f32 0.2, %v695_v26 }
 0x138   : > { %vm901_vm5 = vcmp.ge.f32.partialorder %v823_v29, 0.0  ;;  %v965_v36 = vmul.f32 0.2, %v823_v29  ;;  %vm867_vm6 = vcmp.ge.f32.partialorder %v687_v30, 0.0  ;;  %v931_v37 = vmul.f32 0.2, %v687_v30 }
 0x139   : > { %v997_v38 = vsel %vm869_vm4, %v695_v26, %v933_v35  ;;  %vm899_vm7 = vcmp.ge.f32.partialorder %v815_v31, 0.0  ;;  %v963_v39 = vmul.f32 0.2, %v815_v31  ;;  %v708_v41 = vadd.f32 %v1915_v12, %v2160_v40 }
 0x13a   : > { %v1706_v42 = vpack.c.bf16 %v997_v38, %v996_v24  ;;  %v1029_v43 = vsel %vm901_vm5, %v823_v29, %v965_v36  ;;  %v995_v44 = vsel %vm867_vm6, %v687_v30, %v931_v37  ;;  %v836_v45 = vadd.f32 %v1947_v13, %v2160_v40 }
 0x13b   : > { %v1026_v46 = vsel %vm898_vm3, %v812_v17, %v962_v28  ;;  %v1786_v47 = vpack.c.bf16 %v1029_v43, %v1028_v33  ;;  %v1701_v48 = vpack.c.bf16 %v995_v44, %v994_v34  ;;  %v1027_v49 = vsel %vm899_vm7, %v815_v31, %v963_v39 }
 0x13c   : > { %1810 = vst [vmem:[%s2177_s17 + $0x68] sm:$0xff] %v1706_v42   ;;  %v1781_v50 = vpack.c.bf16 %v1027_v49, %v1026_v46  ;;  %vm872_vm8 = vcmp.ge.f32.partialorder %v708_v41, 0.0  ;;  %v936_v51 = vmul.f32 0.2, %v708_v41  ;;  %v968_v52 = vmul.f32 0.2, %v836_v45 }
 0x13d   : > { %1826 = vst [vmem:[%s2177_s17 + $0xe8] sm:$0xff] %v1786_v47   ;;  %1809 = vst [vmem:[%s2177_s17 + $0x60] sm:$0xff] %v1701_v48   ;;  %v700_v53 = vadd.f32 %v2160_v40, %v699_v18  ;;  %v828_v54 = vadd.f32 %v2160_v40, %v827_v19  ;;  %v711_v55 = vadd.f32 %v1916_v22, %v2160_v40  ;;  %vm904_vm9 = vcmp.ge.f32.partialorder %v836_v45, 0.0 }
 0x13e   : > { %v839_v56 = vadd.f32 %v1948_v23, %v2160_v40  ;;  %1825 = vst [vmem:[%s2177_s17 + $0xe0] sm:$0xff] %v1781_v50   ;;  %v703_v57 = vadd.f32 %v2160_v40, %v702_v27  ;;  %v831_v58 = vadd.f32 %v2160_v40, %v830_v32  ;;  %v1000_v59 = vsel %vm872_vm8, %v708_v41, %v936_v51 }
 0x13f   : > { %vm870_vm10 = vcmp.ge.f32.partialorder %v700_v53, 0.0  ;;  %v934_v60 = vmul.f32 0.2, %v700_v53  ;;  %v966_v61 = vmul.f32 0.2, %v828_v54  ;;  %vm873_vm11 = vcmp.ge.f32.partialorder %v711_v55, 0.0 }
 0x140   : > { %v937_v62 = vmul.f32 0.2, %v711_v55  ;;  %vm905_vm12 = vcmp.ge.f32.partialorder %v839_v56, 0.0  ;;  %v969_v63 = vmul.f32 0.2, %v839_v56  ;;  %v1032_v0 = vsel %vm904_vm9, %v836_v45, %v968_v52 }
 0x141   : > { %vm902_vm13 = vcmp.ge.f32.partialorder %v828_v54, 0.0  ;;  %vm871_vm14 = vcmp.ge.f32.partialorder %v703_v57, 0.0  ;;  %v935_v1 = vmul.f32 0.2, %v703_v57  ;;  %vm903_vm15 = vcmp.ge.f32.partialorder %v831_v58, 0.0 }
 0x142   : > { %v1001_v2 = vsel %vm873_vm11, %v711_v55, %v937_v62  ;;  %v1033_v3 = vsel %vm905_vm12, %v839_v56, %v969_v63  ;;  %v967_v40 = vmul.f32 0.2, %v831_v58  ;;  %v998_v4 = vsel %vm870_vm10, %v700_v53, %v934_v60 }
 0x143   : > { %v1716_v5 = vpack.c.bf16 %v1001_v2, %v1000_v59  ;;  %v1796_v6 = vpack.c.bf16 %v1033_v3, %v1032_v0  ;;  %v999_v7 = vsel %vm871_vm14, %v703_v57, %v935_v1  ;;  %v1030_v8 = vsel %vm902_vm13, %v828_v54, %v966_v61 }
 0x144   : > { %v1711_v9 = vpack.c.bf16 %v999_v7, %v998_v4  ;;  %v1031_v10 = vsel %vm903_vm15, %v831_v58, %v967_v40 }
 0x145   : > { %1812 = vst [vmem:[%s2177_s17 + $0x78] sm:$0xff] %v1716_v5   ;;  %1828 = vst [vmem:[%s2177_s17 + $0xf8] sm:$0xff] %v1796_v6   ;;  %v1791_v11 = vpack.c.bf16 %v1031_v10, %v1030_v8 }
 0x146   : > { %1811 = vst [vmem:[%s2177_s17 + $0x70] sm:$0xff] %v1711_v9  }
 0x147   : > { %1827 = vst [vmem:[%s2177_s17 + $0xf0] sm:$0xff] %v1791_v11  }
 0x148 PF: > { %s13_s14 = sadd.s32 1, %s2051_s14   ;;  %s2287_s12 = smov %s2047_s13 }
 0x149   : > { %p10_p5 = scmp.ge.s32.totalorder %s13_s14, 6   ;;  %s2288_s13 = smov %s2290_s15 }
 0x14b   :  { %12 = sbr.rel (!%p10_p5) target bundleno = 2 (0x2), region = 68 }

// kernel: nlayer_discriminator.9
= control target key start
LH: loop header
LB: loop body
LE: loop exit
PB: predicated region body
PF: predicated region fallthrough
CT: control target
= control target key end

     0   :  { %v1321_v0 = vmov 0   ;;  %s2009_s1 = inlined_call_operand.vmem [shape: bf16[256,128], index: 1, kind: input, shape index: {}]   ;;  %s2010_s0 = inlined_call_operand.vmem [shape: bf16[512,256], index: 0, kind: input, shape index: {}]   ;;  %s2011_s2 = inlined_call_operand.vmem [shape: f32[512,128], index: 2, kind: output, shape index: {0}]   ;;  %s2012_s3 = inlined_call_operand.vmem [shape: f32[1,1,128], index: 3, kind: output, shape index: {1}]   ;;  %s2013_s4 = inlined_call_operand.vmem [shape: f32[1,1,128], index: 4, kind: output, shape index: {2}]  }
   0x1   :  { %527 = vmatprep.subr.bf16.mxu0 %v1321_v0  ;;  %v1209_v1 = vld [vmem:[%s2009_s1] sm:$0xff]   ;;  %1176 = vmatprep.subr.bf16.mxu1 %v1321_v0  ;;  %v1210_v2 = vld [vmem:[%s2009_s1 + $0x8] sm:$0xff]   ;;  %v1211_v3 = vld [vmem:[%s2009_s1 + $0x10] sm:$0xff]  }
   0x2   :  { %528 = vmatpush1.bf16.msra.mxu0 %v1209_v1  ;;  %1192 = vmatpush1.bf16.msra.mxu1 %v1209_v1  ;;  %v1212_v4 = vld [vmem:[%s2009_s1 + $0x18] sm:$0xff]   ;;  %v1213_v5 = vld [vmem:[%s2009_s1 + $0x20] sm:$0xff]   ;;  %v1214_v7 = vld [vmem:[%s2009_s1 + $0x28] sm:$0xff]  }
   0x3   :  { %529 = vmatprep.subr.bf16.mxu0 %v1321_v0  ;;  %1177 = vmatprep.subr.bf16.mxu1 %v1321_v0  ;;  %v1227_v6 = vld [vmem:[%s2010_s0 + $0x4] ss:$8 sps:$4 sm:$0xff]   ;;  %v1215_v8 = vld [vmem:[%s2009_s1 + $0x30] sm:$0xff]   ;;  %v1216_v9 = vld [vmem:[%s2009_s1 + $0x38] sm:$0xff]  }
   0x4   :  { %559 = vmatprep.mubr.bf16.mxu0 %v1227_v6  ;;  %v1251_v10 = vld [vmem:[%s2010_s0 + $0x104] ss:$8 sps:$4 sm:$0xff]   ;;  %v1219_v13 = vld [vmem:[%s2009_s1 + $0x50] sm:$0xff]   ;;  %v1220_v14 = vld [vmem:[%s2009_s1 + $0x58] sm:$0xff]  }
   0x5   :  { %687 = vmatprep.mubr.bf16.mxu1 %v1251_v10  ;;  %v1217_v11 = vld [vmem:[%s2009_s1 + $0x40] sm:$0xff]   ;;  %v1218_v12 = vld [vmem:[%s2009_s1 + $0x48] sm:$0xff]   ;;  %v1223_v17 = vld [vmem:[%s2009_s1 + $0x70] sm:$0xff]  }
   0x6   :  { %530 = vmatpush1.bf16.msra.mxu0 %v1210_v2  ;;  %1193 = vmatpush1.bf16.msra.mxu1 %v1210_v2  ;;  %v1221_v15 = vld [vmem:[%s2009_s1 + $0x60] sm:$0xff]   ;;  %v1222_v16 = vld [vmem:[%s2009_s1 + $0x68] sm:$0xff]   ;;  %v1224_v18 = vld [vmem:[%s2009_s1 + $0x78] sm:$0xff]  }
   0x7   :  { %531 = vmatprep.subr.bf16.mxu0 %v1321_v0  ;;  %1178 = vmatprep.subr.bf16.mxu1 %v1321_v0  ;;  %v1225_v19 = vld [vmem:[%s2010_s0] ss:$8 sps:$4 sm:$0xff]   ;;  %v1228_v21 = vld [vmem:[%s2010_s0 + $0x14] ss:$8 sps:$4 sm:$0xff]   ;;  %v1230_v23 = vld [vmem:[%s2010_s0 + $0x10] ss:$8 sps:$4 sm:$0xff]  }
   0x8   :  { %v1249_v20 = vld [vmem:[%s2010_s0 + $0x100] ss:$8 sps:$4 sm:$0xff]   ;;  %v1255_v22 = vld [vmem:[%s2010_s0 + $0x114] ss:$8 sps:$4 sm:$0xff]   ;;  %v1257_v24 = vld [vmem:[%s2010_s0 + $0x110] ss:$8 sps:$4 sm:$0xff]  }
   0x9   :  { %v1231_v25 = vld [vmem:[%s2010_s0 + $0x24] ss:$8 sps:$4 sm:$0xff]   ;;  %v1233_v27 = vld [vmem:[%s2010_s0 + $0x20] ss:$8 sps:$4 sm:$0xff]   ;;  %v1234_v29 = vld [vmem:[%s2010_s0 + $0x34] ss:$8 sps:$4 sm:$0xff]  }
   0xa   :  { %532 = vmatpush1.bf16.msra.mxu0 %v1211_v3  ;;  %1194 = vmatpush1.bf16.msra.mxu1 %v1211_v3  ;;  %v1261_v26 = vld [vmem:[%s2010_s0 + $0x124] ss:$8 sps:$4 sm:$0xff]   ;;  %v1263_v28 = vld [vmem:[%s2010_s0 + $0x120] ss:$8 sps:$4 sm:$0xff]   ;;  %v1267_v30 = vld [vmem:[%s2010_s0 + $0x134] ss:$8 sps:$4 sm:$0xff]  }
   0xb   :  { %533 = vmatprep.subr.bf16.mxu0 %v1321_v0  ;;  %1179 = vmatprep.subr.bf16.mxu1 %v1321_v0  ;;  %v1236_v31 = vld [vmem:[%s2010_s0 + $0x30] ss:$8 sps:$4 sm:$0xff]   ;;  %v1237_v33 = vld [vmem:[%s2010_s0 + $0x44] ss:$8 sps:$4 sm:$0xff]   ;;  %v1239_v35 = vld [vmem:[%s2010_s0 + $0x40] ss:$8 sps:$4 sm:$0xff]  }
   0xc   :  { %v1269_v32 = vld [vmem:[%s2010_s0 + $0x130] ss:$8 sps:$4 sm:$0xff]   ;;  %v1273_v34 = vld [vmem:[%s2010_s0 + $0x144] ss:$8 sps:$4 sm:$0xff]   ;;  %v1275_v36 = vld [vmem:[%s2010_s0 + $0x140] ss:$8 sps:$4 sm:$0xff]  }
   0xd   :  { %v1240_v37 = vld [vmem:[%s2010_s0 + $0x54] ss:$8 sps:$4 sm:$0xff]   ;;  %v1242_v39 = vld [vmem:[%s2010_s0 + $0x50] ss:$8 sps:$4 sm:$0xff]   ;;  %v1243_v41 = vld [vmem:[%s2010_s0 + $0x64] ss:$8 sps:$4 sm:$0xff]  }
   0xe   :  { %534 = vmatpush1.bf16.msra.mxu0 %v1212_v4  ;;  %1195 = vmatpush1.bf16.msra.mxu1 %v1212_v4  ;;  %v1279_v38 = vld [vmem:[%s2010_s0 + $0x154] ss:$8 sps:$4 sm:$0xff]   ;;  %v1281_v40 = vld [vmem:[%s2010_s0 + $0x150] ss:$8 sps:$4 sm:$0xff]   ;;  %v1285_v42 = vld [vmem:[%s2010_s0 + $0x164] ss:$8 sps:$4 sm:$0xff]  }
   0xf   :  { %535 = vmatprep.subr.bf16.mxu0 %v1321_v0  ;;  %1180 = vmatprep.subr.bf16.mxu1 %v1321_v0  ;;  %v1245_v43 = vld [vmem:[%s2010_s0 + $0x60] ss:$8 sps:$4 sm:$0xff]   ;;  %v1246_v45 = vld [vmem:[%s2010_s0 + $0x74] ss:$8 sps:$4 sm:$0xff]   ;;  %v1248_v47 = vld [vmem:[%s2010_s0 + $0x70] ss:$8 sps:$4 sm:$0xff]  }
  0x10   :  { %v1287_v44 = vld [vmem:[%s2010_s0 + $0x160] ss:$8 sps:$4 sm:$0xff]   ;;  %v1291_v46 = vld [vmem:[%s2010_s0 + $0x174] ss:$8 sps:$4 sm:$0xff]   ;;  %v1293_v48 = vld [vmem:[%s2010_s0 + $0x170] ss:$8 sps:$4 sm:$0xff]  }
  0x11   :  { %v1252_v49 = vld [vmem:[%s2010_s0 + $0x84] ss:$8 sps:$4 sm:$0xff]   ;;  %v1254_v51 = vld [vmem:[%s2010_s0 + $0x80] ss:$8 sps:$4 sm:$0xff]   ;;  %v1258_v53 = vld [vmem:[%s2010_s0 + $0x94] ss:$8 sps:$4 sm:$0xff]  }
  0x12   :  { %536 = vmatpush1.bf16.msra.mxu0 %v1213_v5  ;;  %1196 = vmatpush1.bf16.msra.mxu1 %v1213_v5  ;;  %v1297_v50 = vld [vmem:[%s2010_s0 + $0x184] ss:$8 sps:$4 sm:$0xff]   ;;  %v1299_v52 = vld [vmem:[%s2010_s0 + $0x180] ss:$8 sps:$4 sm:$0xff]   ;;  %v1300_v54 = vld [vmem:[%s2010_s0 + $0x194] ss:$8 sps:$4 sm:$0xff]  }
  0x13   :  { %537 = vmatprep.subr.bf16.mxu0 %v1321_v0  ;;  %1181 = vmatprep.subr.bf16.mxu1 %v1321_v0  ;;  %v1260_v55 = vld [vmem:[%s2010_s0 + $0x90] ss:$8 sps:$4 sm:$0xff]   ;;  %v1264_v57 = vld [vmem:[%s2010_s0 + $0xa4] ss:$8 sps:$4 sm:$0xff]   ;;  %v1266_v59 = vld [vmem:[%s2010_s0 + $0xa0] ss:$8 sps:$4 sm:$0xff]  }
  0x14   :  { %v1302_v56 = vld [vmem:[%s2010_s0 + $0x190] ss:$8 sps:$4 sm:$0xff]   ;;  %v1303_v58 = vld [vmem:[%s2010_s0 + $0x1a4] ss:$8 sps:$4 sm:$0xff]   ;;  %v1305_v60 = vld [vmem:[%s2010_s0 + $0x1a0] ss:$8 sps:$4 sm:$0xff]  }
  0x15   :  { %v1270_v61 = vld [vmem:[%s2010_s0 + $0xb4] ss:$8 sps:$4 sm:$0xff]   ;;  %v1272_v63 = vld [vmem:[%s2010_s0 + $0xb0] ss:$8 sps:$4 sm:$0xff]   ;;  %v1276_v1 = vld [vmem:[%s2010_s0 + $0xc4] ss:$8 sps:$4 sm:$0xff]  }
  0x16   :  { %538 = vmatpush1.bf16.msra.mxu0 %v1214_v7  ;;  %1197 = vmatpush1.bf16.msra.mxu1 %v1214_v7  ;;  %v1306_v62 = vld [vmem:[%s2010_s0 + $0x1b4] ss:$8 sps:$4 sm:$0xff]   ;;  %v1309_v2 = vld [vmem:[%s2010_s0 + $0x1c4] ss:$8 sps:$4 sm:$0xff]   ;;  %v1278_v3 = vld [vmem:[%s2010_s0 + $0xc0] ss:$8 sps:$4 sm:$0xff]  }
  0x17   :  { %539 = vmatprep.subr.bf16.mxu0 %v1321_v0  ;;  %1182 = vmatprep.subr.bf16.mxu1 %v1321_v0  ;;  %v1311_v4 = vld [vmem:[%s2010_s0 + $0x1c0] ss:$8 sps:$4 sm:$0xff]   ;;  %v1282_v5 = vld [vmem:[%s2010_s0 + $0xd4] ss:$8 sps:$4 sm:$0xff]   ;;  %v1284_v7 = vld [vmem:[%s2010_s0 + $0xd0] ss:$8 sps:$4 sm:$0xff]  }
  0x18   :  { %v1312_v6 = vld [vmem:[%s2010_s0 + $0x1d4] ss:$8 sps:$4 sm:$0xff]   ;;  %v1315_v10 = vld [vmem:[%s2010_s0 + $0x1e4] ss:$8 sps:$4 sm:$0xff]  }
  0x1a   :  { %540 = vmatpush1.bf16.msra.mxu0 %v1215_v8  ;;  %1198 = vmatpush1.bf16.msra.mxu1 %v1215_v8  ;;  %v1314_v8 = vld [vmem:[%s2010_s0 + $0x1d0] ss:$8 sps:$4 sm:$0xff]  }
  0x1b   :  { %541 = vmatprep.subr.bf16.mxu0 %v1321_v0  ;;  %1183 = vmatprep.subr.bf16.mxu1 %v1321_v0 }
  0x1e   :  { %542 = vmatpush1.bf16.msra.mxu0 %v1216_v9  ;;  %1199 = vmatpush1.bf16.msra.mxu1 %v1216_v9  ;;  %v1288_v9 = vld [vmem:[%s2010_s0 + $0xe4] ss:$8 sps:$4 sm:$0xff]  }
  0x1f   :  { %543 = vmatprep.subr.bf16.mxu0 %v1321_v0  ;;  %1184 = vmatprep.subr.bf16.mxu1 %v1321_v0 }
  0x22   :  { %544 = vmatpush1.bf16.msra.mxu0 %v1217_v11  ;;  %1200 = vmatpush1.bf16.msra.mxu1 %v1217_v11  ;;  %v1290_v11 = vld [vmem:[%s2010_s0 + $0xe0] ss:$8 sps:$4 sm:$0xff]  }
  0x23   :  { %545 = vmatprep.subr.bf16.mxu0 %v1321_v0  ;;  %1185 = vmatprep.subr.bf16.mxu1 %v1321_v0 }
  0x26   :  { %546 = vmatpush1.bf16.msra.mxu0 %v1218_v12  ;;  %1201 = vmatpush1.bf16.msra.mxu1 %v1218_v12  ;;  %v1317_v12 = vld [vmem:[%s2010_s0 + $0x1e0] ss:$8 sps:$4 sm:$0xff]  }
  0x27   :  { %547 = vmatprep.subr.bf16.mxu0 %v1321_v0  ;;  %1186 = vmatprep.subr.bf16.mxu1 %v1321_v0 }
  0x2a   :  { %548 = vmatpush1.bf16.msra.mxu0 %v1219_v13  ;;  %1202 = vmatpush1.bf16.msra.mxu1 %v1219_v13  ;;  %v1294_v13 = vld [vmem:[%s2010_s0 + $0xf4] ss:$8 sps:$4 sm:$0xff]  }
  0x2b   :  { %549 = vmatprep.subr.bf16.mxu0 %v1321_v0  ;;  %1187 = vmatprep.subr.bf16.mxu1 %v1321_v0 }
  0x2e   :  { %550 = vmatpush1.bf16.msra.mxu0 %v1220_v14  ;;  %1203 = vmatpush1.bf16.msra.mxu1 %v1220_v14  ;;  %v1318_v14 = vld [vmem:[%s2010_s0 + $0x1f4] ss:$8 sps:$4 sm:$0xff]  }
  0x2f   :  { %551 = vmatprep.subr.bf16.mxu0 %v1321_v0  ;;  %1188 = vmatprep.subr.bf16.mxu1 %v1321_v0 }
  0x32   :  { %552 = vmatpush1.bf16.msra.mxu0 %v1221_v15  ;;  %1204 = vmatpush1.bf16.msra.mxu1 %v1221_v15  ;;  %v1296_v15 = vld [vmem:[%s2010_s0 + $0xf0] ss:$8 sps:$4 sm:$0xff]  }
  0x33   :  { %553 = vmatprep.subr.bf16.mxu0 %v1321_v0  ;;  %1189 = vmatprep.subr.bf16.mxu1 %v1321_v0 }
  0x36   :  { %554 = vmatpush1.bf16.msra.mxu0 %v1222_v16  ;;  %1205 = vmatpush1.bf16.msra.mxu1 %v1222_v16  ;;  %v1320_v16 = vld [vmem:[%s2010_s0 + $0x1f0] ss:$8 sps:$4 sm:$0xff]  }
  0x37   :  { %555 = vmatprep.subr.bf16.mxu0 %v1321_v0  ;;  %1190 = vmatprep.subr.bf16.mxu1 %v1321_v0 }
  0x3a   :  { %556 = vmatpush1.bf16.msra.mxu0 %v1223_v17  ;;  %1206 = vmatpush1.bf16.msra.mxu1 %v1223_v17 }
  0x3b   :  { %557 = vmatprep.subr.bf16.mxu0 %v1321_v0  ;;  %1191 = vmatprep.subr.bf16.mxu1 %v1321_v0  ;;  %v1308_v0 = vld [vmem:[%s2010_s0 + $0x1b0] ss:$8 sps:$4 sm:$0xff]  }
  0x3e   :  { %558 = vmatpush1.bf16.msra.mxu0 %v1224_v18  ;;  %1207 = vmatpush1.bf16.msra.mxu1 %v1224_v18 }
  0x41   :  { %560 = vmatmul.mubr.bf16.vlgmr.msra.gmra.mrb[0].mxu0 %v1225_v19  ;;  %688 = vmatmul.mubr.bf16.vlgmr.msra.gmra.mrb[0].mxu1 %v1249_v20 }
  0x42   :  { %567 = vmatprep.mubr.bf16.mxu0 %v1228_v21  ;;  %695 = vmatprep.mubr.bf16.mxu1 %v1255_v22 }
  0x49   :  { %568 = vmatmul.mubr.bf16.gmra.mrb[4].mxu0 %v1230_v23  ;;  %696 = vmatmul.mubr.bf16.gmra.mrb[4].mxu1 %v1257_v24 }
  0x4a   :  { %575 = vmatprep.mubr.bf16.mxu0 %v1231_v25  ;;  %703 = vmatprep.mubr.bf16.mxu1 %v1261_v26 }
  0x51   :  { %576 = vmatmul.mubr.bf16.gmra.mrb[8].mxu0 %v1233_v27  ;;  %704 = vmatmul.mubr.bf16.gmra.mrb[8].mxu1 %v1263_v28 }
  0x52   :  { %583 = vmatprep.mubr.bf16.mxu0 %v1234_v29  ;;  %711 = vmatprep.mubr.bf16.mxu1 %v1267_v30 }
  0x59   :  { %584 = vmatmul.mubr.bf16.gmra.mrb[12].mxu0 %v1236_v31  ;;  %712 = vmatmul.mubr.bf16.gmra.mrb[12].mxu1 %v1269_v32 }
  0x5a   :  { %591 = vmatprep.mubr.bf16.mxu0 %v1237_v33  ;;  %719 = vmatprep.mubr.bf16.mxu1 %v1273_v34 }
  0x61   :  { %592 = vmatmul.mubr.bf16.gmra.mrb[16].mxu0 %v1239_v35  ;;  %720 = vmatmul.mubr.bf16.gmra.mrb[16].mxu1 %v1275_v36 }
  0x62   :  { %599 = vmatprep.mubr.bf16.mxu0 %v1240_v37  ;;  %727 = vmatprep.mubr.bf16.mxu1 %v1279_v38 }
  0x69   :  { %600 = vmatmul.mubr.bf16.gmra.mrb[20].mxu0 %v1242_v39  ;;  %728 = vmatmul.mubr.bf16.gmra.mrb[20].mxu1 %v1281_v40 }
  0x6a   :  { %607 = vmatprep.mubr.bf16.mxu0 %v1243_v41  ;;  %735 = vmatprep.mubr.bf16.mxu1 %v1285_v42 }
  0x71   :  { %608 = vmatmul.mubr.bf16.gmra.mrb[24].mxu0 %v1245_v43  ;;  %736 = vmatmul.mubr.bf16.gmra.mrb[24].mxu1 %v1287_v44 }
  0x72   :  { %615 = vmatprep.mubr.bf16.mxu0 %v1246_v45  ;;  %743 = vmatprep.mubr.bf16.mxu1 %v1291_v46 }
  0x79   :  { %616 = vmatmul.mubr.bf16.gmra.mrb[28].mxu0 %v1248_v47  ;;  %744 = vmatmul.mubr.bf16.gmra.mrb[28].mxu1 %v1293_v48 }
  0x7a   :  { %623 = vmatprep.mubr.bf16.mxu0 %v1252_v49  ;;  %751 = vmatprep.mubr.bf16.mxu1 %v1297_v50 }
  0x81   :  { %624 = vmatmul.mubr.bf16.gmra.mrb[32].mxu0 %v1254_v51  ;;  %752 = vmatmul.mubr.bf16.gmra.mrb[32].mxu1 %v1299_v52 }
  0x82   :  { %631 = vmatprep.mubr.bf16.mxu0 %v1258_v53  ;;  %759 = vmatprep.mubr.bf16.mxu1 %v1300_v54 }
  0x89   :  { %632 = vmatmul.mubr.bf16.gmra.mrb[36].mxu0 %v1260_v55  ;;  %760 = vmatmul.mubr.bf16.gmra.mrb[36].mxu1 %v1302_v56 }
  0x8a   :  { %639 = vmatprep.mubr.bf16.mxu0 %v1264_v57  ;;  %767 = vmatprep.mubr.bf16.mxu1 %v1303_v58 }
  0x91   :  { %640 = vmatmul.mubr.bf16.gmra.mrb[40].mxu0 %v1266_v59  ;;  %768 = vmatmul.mubr.bf16.gmra.mrb[40].mxu1 %v1305_v60 }
  0x92   :  { %647 = vmatprep.mubr.bf16.mxu0 %v1270_v61  ;;  %775 = vmatprep.mubr.bf16.mxu1 %v1306_v62 }
  0x99   :  { %648 = vmatmul.mubr.bf16.gmra.mrb[44].mxu0 %v1272_v63  ;;  %776 = vmatmul.mubr.bf16.gmra.mrb[44].mxu1 %v1308_v0 }
  0x9a   :  { %655 = vmatprep.mubr.bf16.mxu0 %v1276_v1  ;;  %783 = vmatprep.mubr.bf16.mxu1 %v1309_v2 }
  0xa1   :  { %656 = vmatmul.mubr.bf16.gmra.mrb[48].mxu0 %v1278_v3  ;;  %784 = vmatmul.mubr.bf16.gmra.mrb[48].mxu1 %v1311_v4 }
  0xa2   :  { %663 = vmatprep.mubr.bf16.mxu0 %v1282_v5  ;;  %791 = vmatprep.mubr.bf16.mxu1 %v1312_v6 }
  0xa9   :  { %664 = vmatmul.mubr.bf16.gmra.mrb[52].mxu0 %v1284_v7  ;;  %792 = vmatmul.mubr.bf16.gmra.mrb[52].mxu1 %v1314_v8 }
  0xaa   :  { %671 = vmatprep.mubr.bf16.mxu0 %v1288_v9  ;;  %799 = vmatprep.mubr.bf16.mxu1 %v1315_v10 }
  0xb1   :  { %672 = vmatmul.mubr.bf16.gmra.mrb[56].mxu0 %v1290_v11  ;;  %800 = vmatmul.mubr.bf16.gmra.mrb[56].mxu1 %v1317_v12 }
  0xb2   :  { %679 = vmatprep.mubr.bf16.mxu0 %v1294_v13  ;;  %807 = vmatprep.mubr.bf16.mxu1 %v1318_v14 }
  0xb9   :  { %680 = vmatmul.mubr.bf16.gmra.mrb[60].mxu0 %v1296_v15  ;;  %808 = vmatmul.mubr.bf16.gmra.mrb[60].mxu1 %v1320_v16 }
 0x114   :  { %v561_v17 = vpop.f32.mrb[0].mxu0  ;;  %v1619_v18 = vpop.f32.mrb[0].mxu1 }
 0x115   :  { %816 = vst [vmem:[%s2011_s2] sm:$0xff] %v561_v17  ;;  %v563_v19 = vpop.f32.mrb[1].mxu0  ;;  %848 = vst [vmem:[%s2011_s2 + $0x100] sm:$0xff] %v1619_v18  ;;  %v691_v20 = vpop.f32.mrb[1].mxu1  ;;  %v950_v23 = vmul.f32 %v561_v17, %v561_v17 }
 0x116   :  { %v564_v21 = vpop.f32.mrb[2].mxu0  ;;  %v1628_v22 = vpop.f32.mrb[2].mxu1 }
 0x117   :  { %817 = vst [vmem:[%s2011_s2 + $0x8] sm:$0xff] %v564_v21  ;;  %v880_v24 = vadd.f32 %v564_v21, %v561_v17  ;;  %v951_v25 = vmul.f32 %v564_v21, %v564_v21  ;;  %v566_v26 = vpop.f32.mrb[3].mxu0  ;;  %849 = vst [vmem:[%s2011_s2 + $0x108] sm:$0xff] %v1628_v22  ;;  %v694_v27 = vpop.f32.mrb[3].mxu1 }
 0x119   :  { %v1014_v28 = vadd.f32 %v951_v25, %v950_v23 }
 0x11c   :  { %v569_v29 = vpop.f32.mrb[4].mxu0  ;;  %v1637_v30 = vpop.f32.mrb[4].mxu1 }
 0x11d   :  { %818 = vst [vmem:[%s2011_s2 + $0x10] sm:$0xff] %v569_v29  ;;  %v881_v31 = vadd.f32 %v880_v24, %v569_v29  ;;  %v952_v32 = vmul.f32 %v569_v29, %v569_v29  ;;  %v571_v33 = vpop.f32.mrb[5].mxu0  ;;  %850 = vst [vmem:[%s2011_s2 + $0x110] sm:$0xff] %v1637_v30  ;;  %v699_v34 = vpop.f32.mrb[5].mxu1 }
 0x11e   :  { %v572_v35 = vpop.f32.mrb[6].mxu0  ;;  %v1646_v36 = vpop.f32.mrb[6].mxu1 }
 0x11f   :  { %v1015_v37 = vadd.f32 %v1014_v28, %v952_v32  ;;  %819 = vst [vmem:[%s2011_s2 + $0x18] sm:$0xff] %v572_v35  ;;  %v882_v38 = vadd.f32 %v881_v31, %v572_v35  ;;  %v953_v39 = vmul.f32 %v572_v35, %v572_v35  ;;  %v574_v40 = vpop.f32.mrb[7].mxu0  ;;  %851 = vst [vmem:[%s2011_s2 + $0x118] sm:$0xff] %v1646_v36  ;;  %v702_v41 = vpop.f32.mrb[7].mxu1 }
 0x121   :  { %v1016_v42 = vadd.f32 %v1015_v37, %v953_v39 }
 0x124   :  { %v577_v43 = vpop.f32.mrb[8].mxu0  ;;  %v1655_v44 = vpop.f32.mrb[8].mxu1 }
 0x125   :  { %820 = vst [vmem:[%s2011_s2 + $0x20] sm:$0xff] %v577_v43  ;;  %v883_v45 = vadd.f32 %v882_v38, %v577_v43  ;;  %v954_v46 = vmul.f32 %v577_v43, %v577_v43  ;;  %v579_v47 = vpop.f32.mrb[9].mxu0  ;;  %852 = vst [vmem:[%s2011_s2 + $0x120] sm:$0xff] %v1655_v44  ;;  %v707_v48 = vpop.f32.mrb[9].mxu1 }
 0x126   :  { %v580_v49 = vpop.f32.mrb[10].mxu0  ;;  %v1664_v50 = vpop.f32.mrb[10].mxu1 }
 0x127   :  { %v1017_v51 = vadd.f32 %v1016_v42, %v954_v46  ;;  %821 = vst [vmem:[%s2011_s2 + $0x28] sm:$0xff] %v580_v49  ;;  %v884_v52 = vadd.f32 %v883_v45, %v580_v49  ;;  %v955_v53 = vmul.f32 %v580_v49, %v580_v49  ;;  %v582_v54 = vpop.f32.mrb[11].mxu0  ;;  %853 = vst [vmem:[%s2011_s2 + $0x128] sm:$0xff] %v1664_v50  ;;  %v710_v55 = vpop.f32.mrb[11].mxu1 }
 0x129   :  { %v1018_v56 = vadd.f32 %v1017_v51, %v955_v53 }
 0x12c   :  { %v585_v57 = vpop.f32.mrb[12].mxu0  ;;  %v1673_v58 = vpop.f32.mrb[12].mxu1 }
 0x12d   :  { %822 = vst [vmem:[%s2011_s2 + $0x30] sm:$0xff] %v585_v57  ;;  %v885_v59 = vadd.f32 %v884_v52, %v585_v57  ;;  %v956_v60 = vmul.f32 %v585_v57, %v585_v57  ;;  %v587_v61 = vpop.f32.mrb[13].mxu0  ;;  %854 = vst [vmem:[%s2011_s2 + $0x130] sm:$0xff] %v1673_v58  ;;  %v715_v62 = vpop.f32.mrb[13].mxu1 }
 0x12e   :  { %v588_v63 = vpop.f32.mrb[14].mxu0  ;;  %v1682_v0 = vpop.f32.mrb[14].mxu1 }
 0x12f   :  { %v1019_v1 = vadd.f32 %v1018_v56, %v956_v60  ;;  %823 = vst [vmem:[%s2011_s2 + $0x38] sm:$0xff] %v588_v63  ;;  %v886_v2 = vadd.f32 %v885_v59, %v588_v63  ;;  %v957_v3 = vmul.f32 %v588_v63, %v588_v63  ;;  %v590_v4 = vpop.f32.mrb[15].mxu0  ;;  %855 = vst [vmem:[%s2011_s2 + $0x138] sm:$0xff] %v1682_v0  ;;  %v718_v5 = vpop.f32.mrb[15].mxu1 }
 0x131   :  { %v1020_v6 = vadd.f32 %v1019_v1, %v957_v3 }
 0x134   :  { %v593_v7 = vpop.f32.mrb[16].mxu0  ;;  %v1691_v8 = vpop.f32.mrb[16].mxu1 }
 0x135   :  { %824 = vst [vmem:[%s2011_s2 + $0x40] sm:$0xff] %v593_v7  ;;  %v887_v9 = vadd.f32 %v886_v2, %v593_v7  ;;  %v958_v10 = vmul.f32 %v593_v7, %v593_v7  ;;  %v595_v11 = vpop.f32.mrb[17].mxu0  ;;  %856 = vst [vmem:[%s2011_s2 + $0x140] sm:$0xff] %v1691_v8  ;;  %v723_v12 = vpop.f32.mrb[17].mxu1 }
 0x136   :  { %v596_v13 = vpop.f32.mrb[18].mxu0  ;;  %v1700_v14 = vpop.f32.mrb[18].mxu1 }
 0x137   :  { %v1021_v15 = vadd.f32 %v1020_v6, %v958_v10  ;;  %825 = vst [vmem:[%s2011_s2 + $0x48] sm:$0xff] %v596_v13  ;;  %v888_v16 = vadd.f32 %v887_v9, %v596_v13  ;;  %v959_v17 = vmul.f32 %v596_v13, %v596_v13  ;;  %v598_v19 = vpop.f32.mrb[19].mxu0  ;;  %857 = vst [vmem:[%s2011_s2 + $0x148] sm:$0xff] %v1700_v14  ;;  %v726_v20 = vpop.f32.mrb[19].mxu1 }
 0x139   :  { %v1022_v21 = vadd.f32 %v1021_v15, %v959_v17 }
 0x13c   :  { %v601_v23 = vpop.f32.mrb[20].mxu0  ;;  %v1709_v24 = vpop.f32.mrb[20].mxu1 }
 0x13d   :  { %826 = vst [vmem:[%s2011_s2 + $0x50] sm:$0xff] %v601_v23  ;;  %v889_v25 = vadd.f32 %v888_v16, %v601_v23  ;;  %v960_v26 = vmul.f32 %v601_v23, %v601_v23  ;;  %v603_v27 = vpop.f32.mrb[21].mxu0  ;;  %858 = vst [vmem:[%s2011_s2 + $0x150] sm:$0xff] %v1709_v24  ;;  %v731_v28 = vpop.f32.mrb[21].mxu1 }
 0x13e   :  { %v604_v29 = vpop.f32.mrb[22].mxu0  ;;  %v1718_v31 = vpop.f32.mrb[22].mxu1 }
 0x13f   :  { %v1023_v32 = vadd.f32 %v1022_v21, %v960_v26  ;;  %827 = vst [vmem:[%s2011_s2 + $0x58] sm:$0xff] %v604_v29  ;;  %v890_v33 = vadd.f32 %v889_v25, %v604_v29  ;;  %v961_v34 = vmul.f32 %v604_v29, %v604_v29  ;;  %v606_v35 = vpop.f32.mrb[23].mxu0  ;;  %859 = vst [vmem:[%s2011_s2 + $0x158] sm:$0xff] %v1718_v31  ;;  %v734_v37 = vpop.f32.mrb[23].mxu1 }
 0x141   :  { %v1024_v38 = vadd.f32 %v1023_v32, %v961_v34 }
 0x144   :  { %v609_v39 = vpop.f32.mrb[24].mxu0  ;;  %v1727_v40 = vpop.f32.mrb[24].mxu1 }
 0x145   :  { %828 = vst [vmem:[%s2011_s2 + $0x60] sm:$0xff] %v609_v39  ;;  %v891_v41 = vadd.f32 %v890_v33, %v609_v39  ;;  %v962_v42 = vmul.f32 %v609_v39, %v609_v39  ;;  %v611_v43 = vpop.f32.mrb[25].mxu0  ;;  %860 = vst [vmem:[%s2011_s2 + $0x160] sm:$0xff] %v1727_v40  ;;  %v739_v45 = vpop.f32.mrb[25].mxu1 }
 0x146   :  { %v612_v46 = vpop.f32.mrb[26].mxu0  ;;  %v1736_v47 = vpop.f32.mrb[26].mxu1 }
 0x147   :  { %v1025_v48 = vadd.f32 %v1024_v38, %v962_v42  ;;  %829 = vst [vmem:[%s2011_s2 + $0x68] sm:$0xff] %v612_v46  ;;  %v892_v49 = vadd.f32 %v891_v41, %v612_v46  ;;  %v963_v51 = vmul.f32 %v612_v46, %v612_v46  ;;  %v614_v52 = vpop.f32.mrb[27].mxu0  ;;  %861 = vst [vmem:[%s2011_s2 + $0x168] sm:$0xff] %v1736_v47  ;;  %v742_v53 = vpop.f32.mrb[27].mxu1 }
 0x149   :  { %v1026_v54 = vadd.f32 %v1025_v48, %v963_v51 }
 0x14c   :  { %v617_v55 = vpop.f32.mrb[28].mxu0  ;;  %v1745_v56 = vpop.f32.mrb[28].mxu1 }
 0x14d   :  { %830 = vst [vmem:[%s2011_s2 + $0x70] sm:$0xff] %v617_v55  ;;  %v893_v57 = vadd.f32 %v892_v49, %v617_v55  ;;  %v964_v59 = vmul.f32 %v617_v55, %v617_v55  ;;  %v619_v60 = vpop.f32.mrb[29].mxu0  ;;  %862 = vst [vmem:[%s2011_s2 + $0x170] sm:$0xff] %v1745_v56  ;;  %v747_v61 = vpop.f32.mrb[29].mxu1 }
 0x14e   :  { %v620_v62 = vpop.f32.mrb[30].mxu0  ;;  %v1754_v63 = vpop.f32.mrb[30].mxu1 }
 0x14f   :  { %v1027_v1 = vadd.f32 %v1026_v54, %v964_v59  ;;  %831 = vst [vmem:[%s2011_s2 + $0x78] sm:$0xff] %v620_v62  ;;  %v894_v2 = vadd.f32 %v893_v57, %v620_v62  ;;  %v965_v3 = vmul.f32 %v620_v62, %v620_v62  ;;  %v622_v4 = vpop.f32.mrb[31].mxu0  ;;  %863 = vst [vmem:[%s2011_s2 + $0x178] sm:$0xff] %v1754_v63  ;;  %v750_v5 = vpop.f32.mrb[31].mxu1 }
 0x151   :  { %v1028_v6 = vadd.f32 %v1027_v1, %v965_v3 }
 0x154   :  { %v625_v7 = vpop.f32.mrb[32].mxu0  ;;  %v1763_v9 = vpop.f32.mrb[32].mxu1 }
 0x155   :  { %832 = vst [vmem:[%s2011_s2 + $0x80] sm:$0xff] %v625_v7  ;;  %v895_v10 = vadd.f32 %v894_v2, %v625_v7  ;;  %v966_v11 = vmul.f32 %v625_v7, %v625_v7  ;;  %v627_v12 = vpop.f32.mrb[33].mxu0  ;;  %864 = vst [vmem:[%s2011_s2 + $0x180] sm:$0xff] %v1763_v9  ;;  %v755_v13 = vpop.f32.mrb[33].mxu1 }
 0x156   :  { %v628_v15 = vpop.f32.mrb[34].mxu0  ;;  %v1772_v16 = vpop.f32.mrb[34].mxu1 }
 0x157   :  { %v1029_v17 = vadd.f32 %v1028_v6, %v966_v11  ;;  %833 = vst [vmem:[%s2011_s2 + $0x88] sm:$0xff] %v628_v15  ;;  %v896_v19 = vadd.f32 %v895_v10, %v628_v15  ;;  %v967_v20 = vmul.f32 %v628_v15, %v628_v15  ;;  %v630_v21 = vpop.f32.mrb[35].mxu0  ;;  %865 = vst [vmem:[%s2011_s2 + $0x188] sm:$0xff] %v1772_v16  ;;  %v758_v23 = vpop.f32.mrb[35].mxu1 }
 0x159   :  { %v1030_v25 = vadd.f32 %v1029_v17, %v967_v20 }
 0x15c   :  { %v633_v26 = vpop.f32.mrb[36].mxu0  ;;  %v1781_v27 = vpop.f32.mrb[36].mxu1 }
 0x15d   :  { %834 = vst [vmem:[%s2011_s2 + $0x90] sm:$0xff] %v633_v26  ;;  %v897_v28 = vadd.f32 %v896_v19, %v633_v26  ;;  %v968_v29 = vmul.f32 %v633_v26, %v633_v26  ;;  %v635_v32 = vpop.f32.mrb[37].mxu0  ;;  %866 = vst [vmem:[%s2011_s2 + $0x190] sm:$0xff] %v1781_v27  ;;  %v763_v33 = vpop.f32.mrb[37].mxu1 }
 0x15e   :  { %v636_v34 = vpop.f32.mrb[38].mxu0  ;;  %v1790_v35 = vpop.f32.mrb[38].mxu1 }
 0x15f   :  { %v1031_v37 = vadd.f32 %v1030_v25, %v968_v29  ;;  %835 = vst [vmem:[%s2011_s2 + $0x98] sm:$0xff] %v636_v34  ;;  %v898_v38 = vadd.f32 %v897_v28, %v636_v34  ;;  %v969_v39 = vmul.f32 %v636_v34, %v636_v34  ;;  %v638_v41 = vpop.f32.mrb[39].mxu0  ;;  %867 = vst [vmem:[%s2011_s2 + $0x198] sm:$0xff] %v1790_v35  ;;  %v766_v42 = vpop.f32.mrb[39].mxu1 }
 0x161   :  { %v1032_v43 = vadd.f32 %v1031_v37, %v969_v39 }
 0x164   :  { %v641_v45 = vpop.f32.mrb[40].mxu0  ;;  %v1799_v46 = vpop.f32.mrb[40].mxu1 }
 0x165   :  { %836 = vst [vmem:[%s2011_s2 + $0xa0] sm:$0xff] %v641_v45  ;;  %v899_v48 = vadd.f32 %v898_v38, %v641_v45  ;;  %v970_v49 = vmul.f32 %v641_v45, %v641_v45  ;;  %v643_v51 = vpop.f32.mrb[41].mxu0  ;;  %868 = vst [vmem:[%s2011_s2 + $0x1a0] sm:$0xff] %v1799_v46  ;;  %v771_v52 = vpop.f32.mrb[41].mxu1 }
 0x166   :  { %v644_v53 = vpop.f32.mrb[42].mxu0  ;;  %v1808_v54 = vpop.f32.mrb[42].mxu1 }
 0x167   :  { %v1033_v55 = vadd.f32 %v1032_v43, %v970_v49  ;;  %837 = vst [vmem:[%s2011_s2 + $0xa8] sm:$0xff] %v644_v53  ;;  %v900_v57 = vadd.f32 %v899_v48, %v644_v53  ;;  %v971_v59 = vmul.f32 %v644_v53, %v644_v53  ;;  %v646_v60 = vpop.f32.mrb[43].mxu0  ;;  %869 = vst [vmem:[%s2011_s2 + $0x1a8] sm:$0xff] %v1808_v54  ;;  %v774_v61 = vpop.f32.mrb[43].mxu1 }
 0x169   :  { %v1034_v62 = vadd.f32 %v1033_v55, %v971_v59 }
 0x16c   :  { %v649_v1 = vpop.f32.mrb[44].mxu0  ;;  %v1817_v2 = vpop.f32.mrb[44].mxu1 }
 0x16d   :  { %838 = vst [vmem:[%s2011_s2 + $0xb0] sm:$0xff] %v649_v1  ;;  %v901_v3 = vadd.f32 %v900_v57, %v649_v1  ;;  %v972_v4 = vmul.f32 %v649_v1, %v649_v1  ;;  %v651_v5 = vpop.f32.mrb[45].mxu0  ;;  %870 = vst [vmem:[%s2011_s2 + $0x1b0] sm:$0xff] %v1817_v2  ;;  %v779_v6 = vpop.f32.mrb[45].mxu1 }
 0x16e   :  { %v652_v7 = vpop.f32.mrb[46].mxu0  ;;  %v1826_v10 = vpop.f32.mrb[46].mxu1 }
 0x16f   :  { %v1035_v11 = vadd.f32 %v1034_v62, %v972_v4  ;;  %839 = vst [vmem:[%s2011_s2 + $0xb8] sm:$0xff] %v652_v7  ;;  %v902_v12 = vadd.f32 %v901_v3, %v652_v7  ;;  %v973_v13 = vmul.f32 %v652_v7, %v652_v7  ;;  %v654_v15 = vpop.f32.mrb[47].mxu0  ;;  %871 = vst [vmem:[%s2011_s2 + $0x1b8] sm:$0xff] %v1826_v10  ;;  %v782_v17 = vpop.f32.mrb[47].mxu1 }
 0x171   :  { %v1036_v19 = vadd.f32 %v1035_v11, %v973_v13 }
 0x174   :  { %v657_v20 = vpop.f32.mrb[48].mxu0  ;;  %v1835_v21 = vpop.f32.mrb[48].mxu1 }
 0x175   :  { %840 = vst [vmem:[%s2011_s2 + $0xc0] sm:$0xff] %v657_v20  ;;  %v903_v23 = vadd.f32 %v902_v12, %v657_v20  ;;  %v974_v25 = vmul.f32 %v657_v20, %v657_v20  ;;  %v659_v26 = vpop.f32.mrb[49].mxu0  ;;  %872 = vst [vmem:[%s2011_s2 + $0x1c0] sm:$0xff] %v1835_v21  ;;  %v787_v28 = vpop.f32.mrb[49].mxu1 }
 0x176   :  { %v660_v29 = vpop.f32.mrb[50].mxu0  ;;  %v1844_v32 = vpop.f32.mrb[50].mxu1 }
 0x177   :  { %v1037_v33 = vadd.f32 %v1036_v19, %v974_v25  ;;  %841 = vst [vmem:[%s2011_s2 + $0xc8] sm:$0xff] %v660_v29  ;;  %v904_v34 = vadd.f32 %v903_v23, %v660_v29  ;;  %v975_v37 = vmul.f32 %v660_v29, %v660_v29  ;;  %v662_v38 = vpop.f32.mrb[51].mxu0  ;;  %873 = vst [vmem:[%s2011_s2 + $0x1c8] sm:$0xff] %v1844_v32  ;;  %v790_v39 = vpop.f32.mrb[51].mxu1 }
 0x179   :  { %v1038_v41 = vadd.f32 %v1037_v33, %v975_v37 }
 0x17c   :  { %v665_v42 = vpop.f32.mrb[52].mxu0  ;;  %v1853_v43 = vpop.f32.mrb[52].mxu1 }
 0x17d   :  { %842 = vst [vmem:[%s2011_s2 + $0xd0] sm:$0xff] %v665_v42  ;;  %v905_v45 = vadd.f32 %v904_v34, %v665_v42  ;;  %v976_v48 = vmul.f32 %v665_v42, %v665_v42  ;;  %v667_v49 = vpop.f32.mrb[53].mxu0  ;;  %874 = vst [vmem:[%s2011_s2 + $0x1d0] sm:$0xff] %v1853_v43  ;;  %v795_v51 = vpop.f32.mrb[53].mxu1 }
 0x17e   :  { %v668_v52 = vpop.f32.mrb[54].mxu0  ;;  %v1862_v53 = vpop.f32.mrb[54].mxu1  ;;  %v982_v49 = vmul.f32 %v1619_v18, %v1619_v18 }
 0x17f   :  { %v1039_v55 = vadd.f32 %v1038_v41, %v976_v48  ;;  %843 = vst [vmem:[%s2011_s2 + $0xd8] sm:$0xff] %v668_v52  ;;  %v906_v57 = vadd.f32 %v905_v45, %v668_v52  ;;  %v977_v59 = vmul.f32 %v668_v52, %v668_v52  ;;  %v670_v60 = vpop.f32.mrb[55].mxu0  ;;  %875 = vst [vmem:[%s2011_s2 + $0x1d8] sm:$0xff] %v1862_v53  ;;  %v798_v61 = vpop.f32.mrb[55].mxu1 }
 0x180   :  { %v984_v60 = vmul.f32 %v1637_v30, %v1637_v30 }
 0x181   :  { %v1040_v62 = vadd.f32 %v1039_v55, %v977_v59  ;;  %v983_v55 = vmul.f32 %v1628_v22, %v1628_v22 }
 0x184   :  { %v673_v1 = vpop.f32.mrb[56].mxu0  ;;  %v1871_v3 = vpop.f32.mrb[56].mxu1 }
 0x185   :  { %844 = vst [vmem:[%s2011_s2 + $0xe0] sm:$0xff] %v673_v1  ;;  %v907_v4 = vadd.f32 %v906_v57, %v673_v1  ;;  %v978_v5 = vmul.f32 %v673_v1, %v673_v1  ;;  %v675_v6 = vpop.f32.mrb[57].mxu0  ;;  %876 = vst [vmem:[%s2011_s2 + $0x1e0] sm:$0xff] %v1871_v3  ;;  %v803_v7 = vpop.f32.mrb[57].mxu1  ;;  %v985_v1 = vmul.f32 %v1646_v36, %v1646_v36 }
 0x186   :  { %v676_v11 = vpop.f32.mrb[58].mxu0  ;;  %v1880_v12 = vpop.f32.mrb[58].mxu1 }
 0x187   :  { %v1041_v13 = vadd.f32 %v1040_v62, %v978_v5  ;;  %845 = vst [vmem:[%s2011_s2 + $0xe8] sm:$0xff] %v676_v11  ;;  %v908_v15 = vadd.f32 %v907_v4, %v676_v11  ;;  %v979_v17 = vmul.f32 %v676_v11, %v676_v11  ;;  %v678_v19 = vpop.f32.mrb[59].mxu0  ;;  %877 = vst [vmem:[%s2011_s2 + $0x1e8] sm:$0xff] %v1880_v12  ;;  %v806_v20 = vpop.f32.mrb[59].mxu1 }
 0x189   :  { %v1042_v23 = vadd.f32 %v1041_v13, %v979_v17 }
 0x18c   :  { %v681_v25 = vpop.f32.mrb[60].mxu0  ;;  %v1889_v26 = vpop.f32.mrb[60].mxu1 }
 0x18d   :  { %846 = vst [vmem:[%s2011_s2 + $0xf0] sm:$0xff] %v681_v25  ;;  %v909_v28 = vadd.f32 %v908_v15, %v681_v25  ;;  %v980_v29 = vmul.f32 %v681_v25, %v681_v25  ;;  %v683_v33 = vpop.f32.mrb[61].mxu0  ;;  %878 = vst [vmem:[%s2011_s2 + $0x1f0] sm:$0xff] %v1889_v26  ;;  %v811_v34 = vpop.f32.mrb[61].mxu1 }
 0x18e   :  { %v684_v37 = vpop.f32.mrb[62].mxu0  ;;  %v1898_v38 = vpop.f32.mrb[62].mxu1 }
 0x18f   :  { %v1043_v39 = vadd.f32 %v1042_v23, %v980_v29  ;;  %847 = vst [vmem:[%s2011_s2 + $0xf8] sm:$0xff] %v684_v37  ;;  %v910_v41 = vadd.f32 %v909_v28, %v684_v37  ;;  %v981_v42 = vmul.f32 %v684_v37, %v684_v37  ;;  %v686_v45 = vpop.f32.mrb[63].mxu0  ;;  %879 = vst [vmem:[%s2011_s2 + $0x1f8] sm:$0xff] %v1898_v38  ;;  %v814_v48 = vpop.f32.mrb[63].mxu1 }
 0x191   :  { %v911_v51 = vadd.f32 %v910_v41, %v1619_v18  ;;  %v1044_v52 = vadd.f32 %v1043_v39, %v981_v42  ;;  %v986_v18 = vmul.f32 %v1655_v44, %v1655_v44 }
 0x193   :  { %v912_v57 = vadd.f32 %v911_v51, %v1628_v22  ;;  %v1045_v59 = vadd.f32 %v1044_v52, %v982_v49  ;;  %v987_v22 = vmul.f32 %v1664_v50, %v1664_v50 }
 0x195   :  { %v913_v61 = vadd.f32 %v912_v57, %v1637_v30  ;;  %v1046_v62 = vadd.f32 %v1045_v59, %v983_v55  ;;  %v988_v30 = vmul.f32 %v1673_v58, %v1673_v58  ;;  %v998_v57 = vmul.f32 %v1763_v9, %v1763_v9 }
 0x197   :  { %v914_v4 = vadd.f32 %v913_v61, %v1646_v36  ;;  %v1047_v5 = vadd.f32 %v1046_v62, %v984_v60  ;;  %v989_v36 = vmul.f32 %v1682_v0, %v1682_v0  ;;  %v999_v61 = vmul.f32 %v1772_v16, %v1772_v16 }
 0x199   :  { %v915_v6 = vadd.f32 %v914_v4, %v1655_v44  ;;  %v1048_v7 = vadd.f32 %v1047_v5, %v985_v1  ;;  %v990_v44 = vmul.f32 %v1691_v8, %v1691_v8  ;;  %v1000_v1 = vmul.f32 %v1781_v27, %v1781_v27 }
 0x19a   :  { %v1001_v5 = vmul.f32 %v1790_v35, %v1790_v35 }
 0x19b   :  { %v916_v11 = vadd.f32 %v915_v6, %v1664_v50  ;;  %v1049_v13 = vadd.f32 %v1048_v7, %v986_v18  ;;  %v991_v50 = vmul.f32 %v1700_v14, %v1700_v14  ;;  %v1002_v6 = vmul.f32 %v1799_v46, %v1799_v46 }
 0x19d   :  { %v917_v15 = vadd.f32 %v916_v11, %v1673_v58  ;;  %v1050_v17 = vadd.f32 %v1049_v13, %v987_v22  ;;  %v992_v58 = vmul.f32 %v1709_v24, %v1709_v24  ;;  %v1003_v22 = vmul.f32 %v1808_v54, %v1808_v54 }
 0x19e   :  { %v1004_v13 = vmul.f32 %v1817_v2, %v1817_v2 }
 0x19f   :  { %v918_v19 = vadd.f32 %v917_v15, %v1682_v0  ;;  %v1051_v20 = vadd.f32 %v1050_v17, %v988_v30  ;;  %v993_v0 = vmul.f32 %v1718_v31, %v1718_v31  ;;  %v1005_v15 = vmul.f32 %v1826_v10, %v1826_v10 }
 0x1a1   :  { %v1052_v23 = vadd.f32 %v1051_v20, %v989_v36  ;;  %v919_v25 = vadd.f32 %v918_v19, %v1691_v8  ;;  %v994_v8 = vmul.f32 %v1727_v40, %v1727_v40  ;;  %v1006_v36 = vmul.f32 %v1835_v21, %v1835_v21 }
 0x1a2   :  { %v1007_v20 = vmul.f32 %v1844_v32, %v1844_v32 }
 0x1a3   :  { %v920_v28 = vadd.f32 %v919_v25, %v1700_v14  ;;  %v1053_v29 = vadd.f32 %v1052_v23, %v990_v44  ;;  %v995_v14 = vmul.f32 %v1736_v47, %v1736_v47  ;;  %v1008_v23 = vmul.f32 %v1853_v43, %v1853_v43 }
 0x1a5   :  { %v921_v33 = vadd.f32 %v920_v28, %v1709_v24  ;;  %v1054_v34 = vadd.f32 %v1053_v29, %v991_v50  ;;  %v996_v24 = vmul.f32 %v1745_v56, %v1745_v56  ;;  %v1009_v50 = vmul.f32 %v1862_v53, %v1862_v53 }
 0x1a6   :  { %v1010_v29 = vmul.f32 %v1871_v3, %v1871_v3 }
 0x1a7   :  { %v922_v37 = vadd.f32 %v921_v33, %v1718_v31  ;;  %v1055_v39 = vadd.f32 %v1054_v34, %v992_v58  ;;  %v997_v31 = vmul.f32 %v1754_v63, %v1754_v63  ;;  %v1011_v33 = vmul.f32 %v1880_v12, %v1880_v12 }
 0x1a9   :  { %v923_v41 = vadd.f32 %v922_v37, %v1727_v40  ;;  %v1056_v42 = vadd.f32 %v1055_v39, %v993_v0  ;;  %v1013_v39 = vmul.f32 %v1898_v38, %v1898_v38 }
 0x1ab   :  { %v924_v45 = vadd.f32 %v923_v41, %v1736_v47  ;;  %v1057_v48 = vadd.f32 %v1056_v42, %v994_v8 }
 0x1ad   :  { %v925_v49 = vadd.f32 %v924_v45, %v1745_v56  ;;  %v1058_v51 = vadd.f32 %v1057_v48, %v995_v14 }
 0x1af   :  { %v926_v52 = vadd.f32 %v925_v49, %v1754_v63  ;;  %v1059_v55 = vadd.f32 %v1058_v51, %v996_v24 }
 0x1b1   :  { %v927_v40 = vadd.f32 %v926_v52, %v1763_v9  ;;  %v1060_v59 = vadd.f32 %v1059_v55, %v997_v31 }
 0x1b3   :  { %v1061_v47 = vadd.f32 %v1060_v59, %v998_v57  ;;  %v928_v60 = vadd.f32 %v927_v40, %v1772_v16 }
 0x1b5   :  { %v1062_v56 = vadd.f32 %v1061_v47, %v999_v61  ;;  %v929_v62 = vadd.f32 %v928_v60, %v1781_v27 }
 0x1b7   :  { %v1063_v63 = vadd.f32 %v1062_v56, %v1000_v1  ;;  %v930_v4 = vadd.f32 %v929_v62, %v1790_v35 }
 0x1b9   :  { %v1064_v9 = vadd.f32 %v1063_v63, %v1001_v5  ;;  %v931_v18 = vadd.f32 %v930_v4, %v1799_v46 }
 0x1bb   :  { %v1065_v7 = vadd.f32 %v1064_v9, %v1002_v6  ;;  %v932_v16 = vadd.f32 %v931_v18, %v1808_v54 }
 0x1bd   :  { %v1066_v11 = vadd.f32 %v1065_v7, %v1003_v22  ;;  %v933_v27 = vadd.f32 %v932_v16, %v1817_v2 }
 0x1bf   :  { %v1067_v30 = vadd.f32 %v1066_v11, %v1004_v13  ;;  %v934_v35 = vadd.f32 %v933_v27, %v1826_v10 }
 0x1c1   :  { %v1068_v17 = vadd.f32 %v1067_v30, %v1005_v15  ;;  %v935_v46 = vadd.f32 %v934_v35, %v1835_v21 }
 0x1c3   :  { %v1069_v19 = vadd.f32 %v1068_v17, %v1006_v36  ;;  %v936_v54 = vadd.f32 %v935_v46, %v1844_v32 }
 0x1c5   :  { %v1070_v44 = vadd.f32 %v1069_v19, %v1007_v20  ;;  %v937_v2 = vadd.f32 %v936_v54, %v1853_v43  ;;  %v1012_v43 = vmul.f32 %v1889_v26, %v1889_v26 }
 0x1c7   :  { %v1071_v25 = vadd.f32 %v1070_v44, %v1008_v23  ;;  %v938_v10 = vadd.f32 %v937_v2, %v1862_v53 }
 0x1c9   :  { %v1072_v28 = vadd.f32 %v1071_v25, %v1009_v50  ;;  %v939_v21 = vadd.f32 %v938_v10, %v1871_v3 }
 0x1cb   :  { %v1073_v58 = vadd.f32 %v1072_v28, %v1010_v29  ;;  %v940_v32 = vadd.f32 %v939_v21, %v1880_v12 }
 0x1cd   :  { %v1074_v34 = vadd.f32 %v1073_v58, %v1011_v33  ;;  %v941_v0 = vadd.f32 %v940_v32, %v1889_v26 }
 0x1cf   :  { %v1075_v37 = vadd.f32 %v1074_v34, %v1012_v43  ;;  %v942_v53 = vadd.f32 %v941_v0, %v1898_v38 }
 0x1d1   :  { %v943_v8 = vrot.slane %v942_v53, 4  ;;  %v1076_v3 = vadd.f32 %v1075_v37, %v1013_v39 }
 0x1d3   :  { %v944_v41 = vadd.f32 %v943_v8, %v942_v53  ;;  %v1077_v42 = vrot.slane %v1076_v3, 4 }
 0x1d5   :  { %v945_v14 = vrot.slane %v944_v41, 2  ;;  %v1078_v45 = vadd.f32 %v1077_v42, %v1076_v3 }
 0x1d7   :  { %v946_v48 = vadd.f32 %v945_v14, %v944_v41  ;;  %v1079_v12 = vrot.slane %v1078_v45, 2 }
 0x1d9   :  { %v947_v24 = vrot.slane %v946_v48, 1  ;;  %v1080_v49 = vadd.f32 %v1079_v12, %v1078_v45 }
 0x1db   :  { %v948_v51 = vadd.f32 %v947_v24, %v946_v48  ;;  %v1081_v31 = vrot.slane %v1080_v49, 1 }
 0x1dd   :  { %949 = vst [vmem:[%s2012_s3] sm:$0x1] %v948_v51  ;;  %v1082_v26 = vadd.f32 %v1081_v31, %v1080_v49 }
 0x1df   :  { %1083 = vst [vmem:[%s2013_s4] sm:$0x1] %v1082_v26 }

// kernel: nlayer_discriminator.10
= control target key start
LH: loop header
LB: loop body
LE: loop exit
PB: predicated region body
PF: predicated region fallthrough
CT: control target
= control target key end

     0   :  { %s1503_s0 = inlined_call_operand.vmem [shape: f32[512,128], index: 0, kind: input, shape index: {}]   ;;  %s1504_s1 = inlined_call_operand.vmem [shape: f32[1,128], index: 1, kind: input, shape index: {}]   ;;  %s1505_s2 = inlined_call_operand.vmem [shape: f32[1,128], index: 2, kind: input, shape index: {}]   ;;  %s1506_s3 = inlined_call_operand.vmem [shape: bf16[512,128], index: 3, kind: output, shape index: {}]  }
   0x1   :  { %v14_v0 = vld [vmem:[%s1503_s0] sm:$0xff]  ;;  %v15_v1 = vld [vmem:[%s1503_s0 + $0x8] sm:$0xff]  ;;  %v16_v6 = vld [vmem:[%s1503_s0 + $0x10] sm:$0xff] }
   0x2   :  { %v1086_v2 = vld [vmem:[%s1504_s1] ss:$0 sm:$0xff]  ;;  %v17_v7 = vld [vmem:[%s1503_s0 + $0x18] sm:$0xff]  ;;  %v19_v11 = vld [vmem:[%s1503_s0 + $0x28] sm:$0xff] }
   0x3   :  { %v85_v3 = vmul.f32 %v1086_v2, %v14_v0  ;;  %v86_v4 = vmul.f32 %v1086_v2, %v15_v1  ;;  %v1093_v5 = vld [vmem:[%s1505_s2] ss:$0 sm:$0xff]  ;;  %v87_v8 = vmul.f32 %v1086_v2, %v16_v6  ;;  %v88_v9 = vmul.f32 %v1086_v2, %v17_v7  ;;  %v20_v12 = vld [vmem:[%s1503_s0 + $0x30] sm:$0xff]  ;;  %v21_v17 = vld [vmem:[%s1503_s0 + $0x38] sm:$0xff] }
   0x4   :  { %v18_v10 = vld [vmem:[%s1503_s0 + $0x20] sm:$0xff]  ;;  %v90_v16 = vmul.f32 %v1086_v2, %v19_v11  ;;  %v91_v20 = vmul.f32 %v1086_v2, %v20_v12  ;;  %v92_v21 = vmul.f32 %v1086_v2, %v21_v17  ;;  %v23_v35 = vld [vmem:[%s1503_s0 + $0x48] sm:$0xff]  ;;  %v24_v36 = vld [vmem:[%s1503_s0 + $0x50] sm:$0xff] }
   0x5   :  { %v156_v13 = vadd.f32 %v1093_v5, %v85_v3  ;;  %v157_v14 = vadd.f32 %v1093_v5, %v86_v4  ;;  %v89_v15 = vmul.f32 %v1086_v2, %v18_v10  ;;  %v158_v18 = vadd.f32 %v1093_v5, %v87_v8  ;;  %v22_v34 = vld [vmem:[%s1503_s0 + $0x40] sm:$0xff]  ;;  %v25_v42 = vld [vmem:[%s1503_s0 + $0x58] sm:$0xff]  ;;  %v27_v48 = vld [vmem:[%s1503_s0 + $0x68] sm:$0xff] }
   0x6   :  { %v159_v19 = vadd.f32 %v1093_v5, %v88_v9  ;;  %v161_v29 = vadd.f32 %v1093_v5, %v90_v16  ;;  %v162_v33 = vadd.f32 %v1093_v5, %v91_v20  ;;  %v163_v40 = vadd.f32 %v1093_v5, %v92_v21  ;;  %v26_v47 = vld [vmem:[%s1503_s0 + $0x60] sm:$0xff]  ;;  %v28_v60 = vld [vmem:[%s1503_s0 + $0x70] sm:$0xff]  ;;  %v29_v7 = vld [vmem:[%s1503_s0 + $0x78] sm:$0xff] }
   0x7   :  { %vm220_vm0 = vcmp.ge.f32.partialorder %v156_v13, 0.0  ;;  %vm221_vm1 = vcmp.ge.f32.partialorder %v157_v14, 0.0  ;;  %v284_v22 = vmul.f32 0.2, %v156_v13  ;;  %v285_v23 = vmul.f32 0.2, %v157_v14 }
   0x8   :  { %vm222_vm2 = vcmp.ge.f32.partialorder %v158_v18, 0.0  ;;  %vm223_vm3 = vcmp.ge.f32.partialorder %v159_v19, 0.0  ;;  %v286_v24 = vmul.f32 0.2, %v158_v18  ;;  %v287_v25 = vmul.f32 0.2, %v159_v19 }
   0x9   :  { %v348_v26 = vsel %vm220_vm0, %v156_v13, %v284_v22  ;;  %v349_v27 = vsel %vm221_vm1, %v157_v14, %v285_v23  ;;  %v160_v28 = vadd.f32 %v1093_v5, %v89_v15  ;;  %vm225_vm5 = vcmp.ge.f32.partialorder %v161_v29, 0.0  ;;  %v30_v12 = vld [vmem:[%s1503_s0 + $0x80] sm:$0xff]  ;;  %v31_v13 = vld [vmem:[%s1503_s0 + $0x88] sm:$0xff]  ;;  %v32_v20 = vld [vmem:[%s1503_s0 + $0x90] sm:$0xff] }
   0xa   :  { %v869_v30 = vpack.c.bf16 %v349_v27, %v348_v26  ;;  %v350_v31 = vsel %vm222_vm2, %v158_v18, %v286_v24  ;;  %v351_v32 = vsel %vm223_vm3, %v159_v19, %v287_v25  ;;  %v289_v39 = vmul.f32 0.2, %v161_v29  ;;  %v33_v25 = vld [vmem:[%s1503_s0 + $0x98] sm:$0xff] }
   0xb   :  { %v874_v37 = vpack.c.bf16 %v351_v32, %v350_v31  ;;  %vm224_vm4 = vcmp.ge.f32.partialorder %v160_v28, 0.0  ;;  %v288_v38 = vmul.f32 0.2, %v160_v28  ;;  %vm226_vm6 = vcmp.ge.f32.partialorder %v162_v33, 0.0 }
   0xc   :  { %870 = vst [vmem:[%s1506_s3] sm:$0xff] %v869_v30   ;;  %v290_v41 = vmul.f32 0.2, %v162_v33  ;;  %v93_v44 = vmul.f32 %v1086_v2, %v22_v34  ;;  %v94_v45 = vmul.f32 %v1086_v2, %v23_v35  ;;  %v95_v46 = vmul.f32 %v1086_v2, %v24_v36 }
   0xd   :  { %1026 = vst [vmem:[%s1506_s3 + $0x8] sm:$0xff] %v874_v37   ;;  %v352_v43 = vsel %vm224_vm4, %v160_v28, %v288_v38  ;;  %v353_v49 = vsel %vm225_vm5, %v161_v29, %v289_v39  ;;  %vm227_vm7 = vcmp.ge.f32.partialorder %v163_v40, 0.0  ;;  %v291_v50 = vmul.f32 0.2, %v163_v40  ;;  %v35_v37 = vld [vmem:[%s1503_s0 + $0xa8] sm:$0xff] }
   0xe   :  { %v354_v51 = vsel %vm226_vm6, %v162_v33, %v290_v41  ;;  %v879_v52 = vpack.c.bf16 %v353_v49, %v352_v43  ;;  %v164_v53 = vadd.f32 %v1093_v5, %v93_v44  ;;  %v165_v54 = vadd.f32 %v1093_v5, %v94_v45  ;;  %v34_v33 = vld [vmem:[%s1503_s0 + $0xa0] sm:$0xff]  ;;  %v36_v44 = vld [vmem:[%s1503_s0 + $0xb0] sm:$0xff]  ;;  %v37_v49 = vld [vmem:[%s1503_s0 + $0xb8] sm:$0xff] }
   0xf   :  { %v96_v55 = vmul.f32 %v1086_v2, %v25_v42  ;;  %v355_v56 = vsel %vm227_vm7, %v163_v40, %v291_v50  ;;  %v166_v57 = vadd.f32 %v1093_v5, %v95_v46  ;;  %v97_v58 = vmul.f32 %v1086_v2, %v26_v47  ;;  %v38_v50 = vld [vmem:[%s1503_s0 + $0xc0] sm:$0xff] }
  0x10   :  { %v98_v59 = vmul.f32 %v1086_v2, %v27_v48  ;;  %1027 = vst [vmem:[%s1506_s3 + $0x10] sm:$0xff] %v879_v52   ;;  %v884_v61 = vpack.c.bf16 %v355_v56, %v354_v51  ;;  %vm228_vm8 = vcmp.ge.f32.partialorder %v164_v53, 0.0  ;;  %vm229_vm9 = vcmp.ge.f32.partialorder %v165_v54, 0.0  ;;  %v39_v51 = vld [vmem:[%s1503_s0 + $0xc8] sm:$0xff] }
  0x11   :  { %v292_v62 = vmul.f32 0.2, %v164_v53  ;;  %v293_v63 = vmul.f32 0.2, %v165_v54  ;;  %v167_v0 = vadd.f32 %v1093_v5, %v96_v55  ;;  %vm230_vm10 = vcmp.ge.f32.partialorder %v166_v57, 0.0 }
  0x12   :  { %v294_v1 = vmul.f32 0.2, %v166_v57  ;;  %1028 = vst [vmem:[%s1506_s3 + $0x18] sm:$0xff] %v884_v61   ;;  %v168_v4 = vadd.f32 %v1093_v5, %v97_v58  ;;  %v169_v6 = vadd.f32 %v1093_v5, %v98_v59  ;;  %v99_v8 = vmul.f32 %v1086_v2, %v28_v60 }
  0x13   :  { %v356_v3 = vsel %vm228_vm8, %v164_v53, %v292_v62  ;;  %v357_v9 = vsel %vm229_vm9, %v165_v54, %v293_v63  ;;  %vm231_vm11 = vcmp.ge.f32.partialorder %v167_v0, 0.0  ;;  %v295_v10 = vmul.f32 0.2, %v167_v0  ;;  %v40_v62 = vld [vmem:[%s1503_s0 + $0xd0] sm:$0xff] }
  0x14   :  { %v358_v11 = vsel %vm230_vm10, %v166_v57, %v294_v1  ;;  %v889_v14 = vpack.c.bf16 %v357_v9, %v356_v3  ;;  %vm232_vm12 = vcmp.ge.f32.partialorder %v168_v4, 0.0  ;;  %vm233_vm13 = vcmp.ge.f32.partialorder %v169_v6, 0.0 }
  0x15   :  { %v296_v15 = vmul.f32 0.2, %v168_v4  ;;  %v359_v16 = vsel %vm231_vm11, %v167_v0, %v295_v10  ;;  %v297_v17 = vmul.f32 0.2, %v169_v6  ;;  %v100_v18 = vmul.f32 %v1086_v2, %v29_v7  ;;  %v41_v10 = vld [vmem:[%s1503_s0 + $0xd8] sm:$0xff] }
  0x16   :  { %v170_v19 = vadd.f32 %v1093_v5, %v99_v8  ;;  %1029 = vst [vmem:[%s1506_s3 + $0x20] sm:$0xff] %v889_v14   ;;  %v894_v21 = vpack.c.bf16 %v359_v16, %v358_v11  ;;  %v101_v23 = vmul.f32 %v1086_v2, %v30_v12  ;;  %v102_v24 = vmul.f32 %v1086_v2, %v31_v13  ;;  %v42_v14 = vld [vmem:[%s1503_s0 + $0xe0] sm:$0xff] }
  0x17   :  { %v360_v22 = vsel %vm232_vm12, %v168_v4, %v296_v15  ;;  %v361_v26 = vsel %vm233_vm13, %v169_v6, %v297_v17  ;;  %v171_v27 = vadd.f32 %v1093_v5, %v100_v18  ;;  %v103_v32 = vmul.f32 %v1086_v2, %v32_v20  ;;  %v43_v15 = vld [vmem:[%s1503_s0 + $0xe8] sm:$0xff] }
  0x18   :  { %vm234_vm14 = vcmp.ge.f32.partialorder %v170_v19, 0.0  ;;  %v298_v28 = vmul.f32 0.2, %v170_v19  ;;  %1030 = vst [vmem:[%s1506_s3 + $0x28] sm:$0xff] %v894_v21   ;;  %v899_v29 = vpack.c.bf16 %v361_v26, %v360_v22  ;;  %v172_v30 = vadd.f32 %v1093_v5, %v101_v23  ;;  %v44_v26 = vld [vmem:[%s1503_s0 + $0xf0] sm:$0xff] }
  0x19   :  { %v173_v31 = vadd.f32 %v1093_v5, %v102_v24  ;;  %vm235_vm15 = vcmp.ge.f32.partialorder %v171_v27, 0.0  ;;  %v299_v34 = vmul.f32 0.2, %v171_v27  ;;  %v104_v36 = vmul.f32 %v1086_v2, %v33_v25 }
  0x1a   :  { %v362_v35 = vsel %vm234_vm14, %v170_v19, %v298_v28  ;;  %1031 = vst [vmem:[%s1506_s3 + $0x30] sm:$0xff] %v899_v29   ;;  %vm236_vm0 = vcmp.ge.f32.partialorder %v172_v30, 0.0  ;;  %v300_v38 = vmul.f32 0.2, %v172_v30  ;;  %v174_v41 = vadd.f32 %v1093_v5, %v103_v32 }
  0x1b   :  { %vm237_vm1 = vcmp.ge.f32.partialorder %v173_v31, 0.0  ;;  %v301_v39 = vmul.f32 0.2, %v173_v31  ;;  %v363_v40 = vsel %vm235_vm15, %v171_v27, %v299_v34  ;;  %v175_v42 = vadd.f32 %v1093_v5, %v104_v36 }
  0x1c   :  { %v105_v43 = vmul.f32 %v1086_v2, %v34_v33  ;;  %v904_v45 = vpack.c.bf16 %v363_v40, %v362_v35  ;;  %v364_v46 = vsel %vm236_vm0, %v172_v30, %v300_v38  ;;  %v106_v48 = vmul.f32 %v1086_v2, %v35_v37  ;;  %v46_v38 = vld [vmem:[%s1503_s0 + $0x100] sm:$0xff] }
  0x1d   :  { %v365_v47 = vsel %vm237_vm1, %v173_v31, %v301_v39  ;;  %vm238_vm2 = vcmp.ge.f32.partialorder %v174_v41, 0.0  ;;  %vm239_vm3 = vcmp.ge.f32.partialorder %v175_v42, 0.0  ;;  %v302_v53 = vmul.f32 0.2, %v174_v41  ;;  %v45_v31 = vld [vmem:[%s1503_s0 + $0xf8] sm:$0xff] }
  0x1e   :  { %v909_v52 = vpack.c.bf16 %v365_v47, %v364_v46  ;;  %1032 = vst [vmem:[%s1506_s3 + $0x38] sm:$0xff] %v904_v45   ;;  %v303_v54 = vmul.f32 0.2, %v175_v42  ;;  %v176_v55 = vadd.f32 %v1093_v5, %v105_v43  ;;  %v177_v56 = vadd.f32 %v1093_v5, %v106_v48 }
  0x1f   :  { %v107_v57 = vmul.f32 %v1086_v2, %v36_v44  ;;  %v366_v58 = vsel %vm238_vm2, %v174_v41, %v302_v53  ;;  %v108_v59 = vmul.f32 %v1086_v2, %v37_v49  ;;  %v109_v60 = vmul.f32 %v1086_v2, %v38_v50  ;;  %v48_v50 = vld [vmem:[%s1503_s0 + $0x110] sm:$0xff] }
  0x20   :  { %1033 = vst [vmem:[%s1506_s3 + $0x40] sm:$0xff] %v909_v52   ;;  %v110_v61 = vmul.f32 %v1086_v2, %v39_v51  ;;  %v367_v63 = vsel %vm239_vm3, %v175_v42, %v303_v54  ;;  %vm240_vm4 = vcmp.ge.f32.partialorder %v176_v55, 0.0  ;;  %vm241_vm5 = vcmp.ge.f32.partialorder %v177_v56, 0.0  ;;  %v47_v42 = vld [vmem:[%s1503_s0 + $0x108] sm:$0xff]  ;;  %v49_v51 = vld [vmem:[%s1503_s0 + $0x118] sm:$0xff] }
  0x21   :  { %v304_v0 = vmul.f32 0.2, %v176_v55  ;;  %v914_v1 = vpack.c.bf16 %v367_v63, %v366_v58  ;;  %v305_v3 = vmul.f32 0.2, %v177_v56  ;;  %v178_v4 = vadd.f32 %v1093_v5, %v107_v57  ;;  %v51_v63 = vld [vmem:[%s1503_s0 + $0x128] sm:$0xff] }
  0x22   :  { %v179_v6 = vadd.f32 %v1093_v5, %v108_v59  ;;  %v180_v8 = vadd.f32 %v1093_v5, %v109_v60  ;;  %v181_v9 = vadd.f32 %v1093_v5, %v110_v61  ;;  %v111_v11 = vmul.f32 %v1086_v2, %v40_v62 }
  0x23   :  { %v368_v7 = vsel %vm240_vm4, %v176_v55, %v304_v0  ;;  %1034 = vst [vmem:[%s1506_s3 + $0x48] sm:$0xff] %v914_v1   ;;  %v369_v12 = vsel %vm241_vm5, %v177_v56, %v305_v3  ;;  %vm242_vm6 = vcmp.ge.f32.partialorder %v178_v4, 0.0  ;;  %v306_v13 = vmul.f32 0.2, %v178_v4  ;;  %v50_v55 = vld [vmem:[%s1503_s0 + $0x120] sm:$0xff] }
  0x24   :  { %vm243_vm7 = vcmp.ge.f32.partialorder %v179_v6, 0.0  ;;  %v919_v16 = vpack.c.bf16 %v369_v12, %v368_v7  ;;  %v307_v17 = vmul.f32 0.2, %v179_v6  ;;  %vm244_vm8 = vcmp.ge.f32.partialorder %v180_v8, 0.0 }
  0x25   :  { %vm245_vm9 = vcmp.ge.f32.partialorder %v181_v9, 0.0  ;;  %v370_v18 = vsel %vm242_vm6, %v178_v4, %v306_v13  ;;  %v308_v19 = vmul.f32 0.2, %v180_v8  ;;  %v309_v20 = vmul.f32 0.2, %v181_v9  ;;  %v52_v4 = vld [vmem:[%s1503_s0 + $0x130] sm:$0xff] }
  0x26   :  { %v112_v21 = vmul.f32 %v1086_v2, %v41_v10  ;;  %1035 = vst [vmem:[%s1506_s3 + $0x50] sm:$0xff] %v919_v16   ;;  %v371_v22 = vsel %vm243_vm7, %v179_v6, %v307_v17  ;;  %v182_v23 = vadd.f32 %v1093_v5, %v111_v11  ;;  %v113_v24 = vmul.f32 %v1086_v2, %v42_v14  ;;  %v53_v13 = vld [vmem:[%s1503_s0 + $0x138] sm:$0xff] }
  0x27   :  { %v114_v25 = vmul.f32 %v1086_v2, %v43_v15  ;;  %v924_v27 = vpack.c.bf16 %v371_v22, %v370_v18  ;;  %v372_v28 = vsel %vm244_vm8, %v180_v8, %v308_v19  ;;  %v373_v29 = vsel %vm245_vm9, %v181_v9, %v309_v20  ;;  %v54_v20 = vld [vmem:[%s1503_s0 + $0x140] sm:$0xff] }
  0x28   :  { %v183_v30 = vadd.f32 %v1093_v5, %v112_v21  ;;  %v929_v32 = vpack.c.bf16 %v373_v29, %v372_v28  ;;  %vm246_vm10 = vcmp.ge.f32.partialorder %v182_v23, 0.0  ;;  %v310_v33 = vmul.f32 0.2, %v182_v23 }
  0x29   :  { %v184_v34 = vadd.f32 %v1093_v5, %v113_v24  ;;  %1036 = vst [vmem:[%s1506_s3 + $0x58] sm:$0xff] %v924_v27   ;;  %v185_v36 = vadd.f32 %v1093_v5, %v114_v25  ;;  %v115_v37 = vmul.f32 %v1086_v2, %v44_v26  ;;  %v116_v41 = vmul.f32 %v1086_v2, %v45_v31  ;;  %v55_v24 = vld [vmem:[%s1503_s0 + $0x148] sm:$0xff] }
  0x2a   :  { %vm247_vm11 = vcmp.ge.f32.partialorder %v183_v30, 0.0  ;;  %v311_v35 = vmul.f32 0.2, %v183_v30  ;;  %1037 = vst [vmem:[%s1506_s3 + $0x60] sm:$0xff] %v929_v32   ;;  %v374_v39 = vsel %vm246_vm10, %v182_v23, %v310_v33  ;;  %v117_v49 = vmul.f32 %v1086_v2, %v46_v38  ;;  %v56_v32 = vld [vmem:[%s1503_s0 + $0x150] sm:$0xff]  ;;  %v57_v33 = vld [vmem:[%s1503_s0 + $0x158] sm:$0xff] }
  0x2b   :  { %vm248_vm12 = vcmp.ge.f32.partialorder %v184_v34, 0.0  ;;  %v312_v40 = vmul.f32 0.2, %v184_v34  ;;  %vm249_vm13 = vcmp.ge.f32.partialorder %v185_v36, 0.0  ;;  %v313_v44 = vmul.f32 0.2, %v185_v36 }
  0x2c   :  { %v375_v43 = vsel %vm247_vm11, %v183_v30, %v311_v35  ;;  %v186_v45 = vadd.f32 %v1093_v5, %v115_v37  ;;  %v187_v48 = vadd.f32 %v1093_v5, %v116_v41  ;;  %v118_v54 = vmul.f32 %v1086_v2, %v47_v42  ;;  %v58_v37 = vld [vmem:[%s1503_s0 + $0x160] sm:$0xff] }
  0x2d   :  { %v934_v46 = vpack.c.bf16 %v375_v43, %v374_v39  ;;  %v376_v47 = vsel %vm248_vm12, %v184_v34, %v312_v40  ;;  %v377_v52 = vsel %vm249_vm13, %v185_v36, %v313_v44  ;;  %v188_v58 = vadd.f32 %v1093_v5, %v117_v49  ;;  %v60_v49 = vld [vmem:[%s1503_s0 + $0x170] sm:$0xff] }
  0x2e   :  { %vm250_vm14 = vcmp.ge.f32.partialorder %v186_v45, 0.0  ;;  %v314_v53 = vmul.f32 0.2, %v186_v45  ;;  %v939_v56 = vpack.c.bf16 %v377_v52, %v376_v47  ;;  %vm251_vm15 = vcmp.ge.f32.partialorder %v187_v48, 0.0 }
  0x2f   :  { %1038 = vst [vmem:[%s1506_s3 + $0x68] sm:$0xff] %v934_v46   ;;  %v315_v57 = vmul.f32 0.2, %v187_v48  ;;  %v189_v60 = vadd.f32 %v1093_v5, %v118_v54  ;;  %v119_v61 = vmul.f32 %v1086_v2, %v48_v50  ;;  %v120_v62 = vmul.f32 %v1086_v2, %v49_v51 }
  0x30   :  { %v378_v59 = vsel %vm250_vm14, %v186_v45, %v314_v53  ;;  %1039 = vst [vmem:[%s1506_s3 + $0x70] sm:$0xff] %v939_v56   ;;  %vm252_vm0 = vcmp.ge.f32.partialorder %v188_v58, 0.0  ;;  %v316_v1 = vmul.f32 0.2, %v188_v58  ;;  %v121_v3 = vmul.f32 %v1086_v2, %v50_v55  ;;  %v59_v45 = vld [vmem:[%s1503_s0 + $0x168] sm:$0xff] }
  0x31   :  { %v379_v0 = vsel %vm251_vm15, %v187_v48, %v315_v57  ;;  %vm253_vm1 = vcmp.ge.f32.partialorder %v189_v60, 0.0  ;;  %v317_v7 = vmul.f32 0.2, %v189_v60  ;;  %v190_v8 = vadd.f32 %v1093_v5, %v119_v61  ;;  %v61_v57 = vld [vmem:[%s1503_s0 + $0x178] sm:$0xff] }
  0x32   :  { %v944_v6 = vpack.c.bf16 %v379_v0, %v378_v59  ;;  %v380_v9 = vsel %vm252_vm0, %v188_v58, %v316_v1  ;;  %v191_v10 = vadd.f32 %v1093_v5, %v120_v62  ;;  %v122_v11 = vmul.f32 %v1086_v2, %v51_v63  ;;  %v62_v0 = vld [vmem:[%s1503_s0 + $0x180] sm:$0xff] }
  0x33   :  { %v192_v12 = vadd.f32 %v1093_v5, %v121_v3  ;;  %v381_v14 = vsel %vm253_vm1, %v189_v60, %v317_v7  ;;  %vm254_vm2 = vcmp.ge.f32.partialorder %v190_v8, 0.0  ;;  %v318_v15 = vmul.f32 0.2, %v190_v8 }
  0x34   :  { %1040 = vst [vmem:[%s1506_s3 + $0x78] sm:$0xff] %v944_v6   ;;  %v123_v16 = vmul.f32 %v1086_v2, %v52_v4  ;;  %v949_v17 = vpack.c.bf16 %v381_v14, %v380_v9  ;;  %vm255_vm3 = vcmp.ge.f32.partialorder %v191_v10, 0.0  ;;  %v319_v18 = vmul.f32 0.2, %v191_v10  ;;  %v63_v6 = vld [vmem:[%s1503_s0 + $0x188] sm:$0xff]  ;;  %v64_v14 = vld [vmem:[%s1503_s0 + $0x190] sm:$0xff] }
  0x35   :  { %v193_v19 = vadd.f32 %v1093_v5, %v122_v11  ;;  %v382_v21 = vsel %vm254_vm2, %v190_v8, %v318_v15  ;;  %vm256_vm4 = vcmp.ge.f32.partialorder %v192_v12, 0.0  ;;  %v320_v22 = vmul.f32 0.2, %v192_v12  ;;  %v65_v15 = vld [vmem:[%s1503_s0 + $0x198] sm:$0xff] }
  0x36   :  { %v124_v23 = vmul.f32 %v1086_v2, %v53_v13  ;;  %1041 = vst [vmem:[%s1506_s3 + $0x80] sm:$0xff] %v949_v17   ;;  %v383_v25 = vsel %vm255_vm3, %v191_v10, %v319_v18  ;;  %v194_v27 = vadd.f32 %v1093_v5, %v123_v16  ;;  %v125_v31 = vmul.f32 %v1086_v2, %v54_v20 }
  0x37   :  { %vm257_vm5 = vcmp.ge.f32.partialorder %v193_v19, 0.0  ;;  %v321_v26 = vmul.f32 0.2, %v193_v19  ;;  %v954_v28 = vpack.c.bf16 %v383_v25, %v382_v21  ;;  %v384_v29 = vsel %vm256_vm4, %v192_v12, %v320_v22 }
  0x38   :  { %v195_v30 = vadd.f32 %v1093_v5, %v124_v23  ;;  %vm258_vm6 = vcmp.ge.f32.partialorder %v194_v27, 0.0  ;;  %v322_v35 = vmul.f32 0.2, %v194_v27  ;;  %v126_v36 = vmul.f32 %v1086_v2, %v55_v24 }
  0x39   :  { %v385_v34 = vsel %vm257_vm5, %v193_v19, %v321_v26  ;;  %1042 = vst [vmem:[%s1506_s3 + $0x88] sm:$0xff] %v954_v28   ;;  %v196_v40 = vadd.f32 %v1093_v5, %v125_v31  ;;  %v127_v43 = vmul.f32 %v1086_v2, %v56_v32  ;;  %v128_v44 = vmul.f32 %v1086_v2, %v57_v33  ;;  %v66_v19 = vld [vmem:[%s1503_s0 + $0x1a0] sm:$0xff]  ;;  %v68_v31 = vld [vmem:[%s1503_s0 + $0x1b0] sm:$0xff] }
  0x3a   :  { %v959_v38 = vpack.c.bf16 %v385_v34, %v384_v29  ;;  %vm259_vm7 = vcmp.ge.f32.partialorder %v195_v30, 0.0  ;;  %v323_v39 = vmul.f32 0.2, %v195_v30  ;;  %v386_v41 = vsel %vm258_vm6, %v194_v27, %v322_v35  ;;  %v67_v27 = vld [vmem:[%s1503_s0 + $0x1a8] sm:$0xff] }
  0x3b   :  { %v197_v42 = vadd.f32 %v1093_v5, %v126_v36  ;;  %vm260_vm8 = vcmp.ge.f32.partialorder %v196_v40, 0.0  ;;  %v324_v47 = vmul.f32 0.2, %v196_v40  ;;  %v129_v48 = vmul.f32 %v1086_v2, %v58_v37 }
  0x3c   :  { %1043 = vst [vmem:[%s1506_s3 + $0x90] sm:$0xff] %v959_v38   ;;  %v387_v46 = vsel %vm259_vm7, %v195_v30, %v323_v39  ;;  %v198_v52 = vadd.f32 %v1093_v5, %v127_v43  ;;  %v199_v54 = vadd.f32 %v1093_v5, %v128_v44  ;;  %v130_v55 = vmul.f32 %v1086_v2, %v59_v45  ;;  %v69_v39 = vld [vmem:[%s1503_s0 + $0x1b8] sm:$0xff] }
  0x3d   :  { %v964_v50 = vpack.c.bf16 %v387_v46, %v386_v41  ;;  %vm261_vm9 = vcmp.ge.f32.partialorder %v197_v42, 0.0  ;;  %v325_v51 = vmul.f32 0.2, %v197_v42  ;;  %v388_v53 = vsel %vm260_vm8, %v196_v40, %v324_v47  ;;  %v70_v46 = vld [vmem:[%s1503_s0 + $0x1c0] sm:$0xff] }
  0x3e   :  { %v200_v56 = vadd.f32 %v1093_v5, %v129_v48  ;;  %vm262_vm10 = vcmp.ge.f32.partialorder %v198_v52, 0.0  ;;  %v326_v59 = vmul.f32 0.2, %v198_v52  ;;  %v131_v60 = vmul.f32 %v1086_v2, %v60_v49 }
  0x3f   :  { %1044 = vst [vmem:[%s1506_s3 + $0x98] sm:$0xff] %v964_v50   ;;  %v389_v58 = vsel %vm261_vm9, %v197_v42, %v325_v51  ;;  %vm263_vm11 = vcmp.ge.f32.partialorder %v199_v54, 0.0  ;;  %v327_v62 = vmul.f32 0.2, %v199_v54  ;;  %v201_v63 = vadd.f32 %v1093_v5, %v130_v55  ;;  %v71_v50 = vld [vmem:[%s1503_s0 + $0x1c8] sm:$0xff] }
  0x40   :  { %v969_v61 = vpack.c.bf16 %v389_v58, %v388_v53  ;;  %v390_v1 = vsel %vm262_vm10, %v198_v52, %v326_v59  ;;  %vm264_vm12 = vcmp.ge.f32.partialorder %v200_v56, 0.0  ;;  %v328_v3 = vmul.f32 0.2, %v200_v56  ;;  %v72_v58 = vld [vmem:[%s1503_s0 + $0x1d0] sm:$0xff]  ;;  %v73_v59 = vld [vmem:[%s1503_s0 + $0x1d8] sm:$0xff] }
  0x41   :  { %v132_v4 = vmul.f32 %v1086_v2, %v61_v57  ;;  %v391_v7 = vsel %vm263_vm11, %v199_v54, %v327_v62  ;;  %vm265_vm13 = vcmp.ge.f32.partialorder %v201_v63, 0.0  ;;  %v329_v8 = vmul.f32 0.2, %v201_v63 }
  0x42   :  { %1045 = vst [vmem:[%s1506_s3 + $0xa0] sm:$0xff] %v969_v61   ;;  %v202_v9 = vadd.f32 %v1093_v5, %v131_v60  ;;  %v974_v10 = vpack.c.bf16 %v391_v7, %v390_v1  ;;  %v392_v11 = vsel %vm264_vm12, %v200_v56, %v328_v3  ;;  %v133_v13 = vmul.f32 %v1086_v2, %v62_v0 }
  0x43   :  { %v203_v12 = vadd.f32 %v1093_v5, %v132_v4  ;;  %v393_v16 = vsel %vm265_vm13, %v201_v63, %v329_v8  ;;  %v134_v18 = vmul.f32 %v1086_v2, %v63_v6  ;;  %v135_v25 = vmul.f32 %v1086_v2, %v64_v14  ;;  %v74_v63 = vld [vmem:[%s1503_s0 + $0x1e0] sm:$0xff] }
  0x44   :  { %vm266_vm14 = vcmp.ge.f32.partialorder %v202_v9, 0.0  ;;  %v330_v17 = vmul.f32 0.2, %v202_v9  ;;  %1046 = vst [vmem:[%s1506_s3 + $0xa8] sm:$0xff] %v974_v10   ;;  %v979_v20 = vpack.c.bf16 %v393_v16, %v392_v11  ;;  %v204_v22 = vadd.f32 %v1093_v5, %v133_v13  ;;  %v76_v13 = vld [vmem:[%s1503_s0 + $0x1f0] sm:$0xff] }
  0x45   :  { %vm267_vm15 = vcmp.ge.f32.partialorder %v203_v12, 0.0  ;;  %v331_v21 = vmul.f32 0.2, %v203_v12  ;;  %v205_v24 = vadd.f32 %v1093_v5, %v134_v18  ;;  %v136_v26 = vmul.f32 %v1086_v2, %v65_v15 }
  0x46   :  { %v394_v23 = vsel %vm266_vm14, %v202_v9, %v330_v17  ;;  %1047 = vst [vmem:[%s1506_s3 + $0xb0] sm:$0xff] %v979_v20   ;;  %vm268_vm0 = vcmp.ge.f32.partialorder %v204_v22, 0.0  ;;  %v332_v29 = vmul.f32 0.2, %v204_v22  ;;  %v137_v30 = vmul.f32 %v1086_v2, %v66_v19  ;;  %v75_v9 = vld [vmem:[%s1503_s0 + $0x1e8] sm:$0xff] }
  0x47   :  { %v395_v28 = vsel %vm267_vm15, %v203_v12, %v331_v21  ;;  %vm269_vm1 = vcmp.ge.f32.partialorder %v205_v24, 0.0  ;;  %v333_v33 = vmul.f32 0.2, %v205_v24  ;;  %v206_v34 = vadd.f32 %v1093_v5, %v135_v25  ;;  %v77_v21 = vld [vmem:[%s1503_s0 + $0x1f8] sm:$0xff] }
  0x48   :  { %v984_v32 = vpack.c.bf16 %v395_v28, %v394_v23  ;;  %v396_v35 = vsel %vm268_vm0, %v204_v22, %v332_v29  ;;  %v207_v36 = vadd.f32 %v1093_v5, %v136_v26  ;;  %v138_v37 = vmul.f32 %v1086_v2, %v67_v27 }
  0x49   :  { %v208_v38 = vadd.f32 %v1093_v5, %v137_v30  ;;  %v397_v40 = vsel %vm269_vm1, %v205_v24, %v333_v33  ;;  %vm270_vm2 = vcmp.ge.f32.partialorder %v206_v34, 0.0  ;;  %v334_v41 = vmul.f32 0.2, %v206_v34 }
  0x4a   :  { %1048 = vst [vmem:[%s1506_s3 + $0xb8] sm:$0xff] %v984_v32   ;;  %v139_v42 = vmul.f32 %v1086_v2, %v68_v31  ;;  %v989_v43 = vpack.c.bf16 %v397_v40, %v396_v35  ;;  %vm271_vm3 = vcmp.ge.f32.partialorder %v207_v36, 0.0  ;;  %v335_v44 = vmul.f32 0.2, %v207_v36 }
  0x4b   :  { %v209_v45 = vadd.f32 %v1093_v5, %v138_v37  ;;  %v398_v47 = vsel %vm270_vm2, %v206_v34, %v334_v41  ;;  %vm272_vm4 = vcmp.ge.f32.partialorder %v208_v38, 0.0  ;;  %v336_v48 = vmul.f32 0.2, %v208_v38 }
  0x4c   :  { %v140_v49 = vmul.f32 %v1086_v2, %v69_v39  ;;  %1049 = vst [vmem:[%s1506_s3 + $0xc0] sm:$0xff] %v989_v43   ;;  %v399_v51 = vsel %vm271_vm3, %v207_v36, %v335_v44  ;;  %v210_v53 = vadd.f32 %v1093_v5, %v139_v42  ;;  %v141_v57 = vmul.f32 %v1086_v2, %v70_v46 }
  0x4d   :  { %vm273_vm5 = vcmp.ge.f32.partialorder %v209_v45, 0.0  ;;  %v337_v52 = vmul.f32 0.2, %v209_v45  ;;  %v994_v54 = vpack.c.bf16 %v399_v51, %v398_v47  ;;  %v400_v55 = vsel %vm272_vm4, %v208_v38, %v336_v48 }
  0x4e   :  { %v211_v56 = vadd.f32 %v1093_v5, %v140_v49  ;;  %vm274_vm6 = vcmp.ge.f32.partialorder %v210_v53, 0.0  ;;  %v338_v61 = vmul.f32 0.2, %v210_v53  ;;  %v142_v62 = vmul.f32 %v1086_v2, %v71_v50 }
  0x4f   :  { %v401_v60 = vsel %vm273_vm5, %v209_v45, %v337_v52  ;;  %1050 = vst [vmem:[%s1506_s3 + $0xc8] sm:$0xff] %v994_v54   ;;  %v212_v3 = vadd.f32 %v1093_v5, %v141_v57  ;;  %v143_v7 = vmul.f32 %v1086_v2, %v72_v58  ;;  %v144_v8 = vmul.f32 %v1086_v2, %v73_v59 }
  0x50   :  { %v999_v0 = vpack.c.bf16 %v401_v60, %v400_v55  ;;  %vm275_vm7 = vcmp.ge.f32.partialorder %v211_v56, 0.0  ;;  %v339_v1 = vmul.f32 0.2, %v211_v56  ;;  %v402_v4 = vsel %vm274_vm6, %v210_v53, %v338_v61 }
  0x51   :  { %v213_v6 = vadd.f32 %v1093_v5, %v142_v62  ;;  %vm276_vm8 = vcmp.ge.f32.partialorder %v212_v3, 0.0  ;;  %v340_v11 = vmul.f32 0.2, %v212_v3  ;;  %v145_v12 = vmul.f32 %v1086_v2, %v74_v63 }
  0x52   :  { %1051 = vst [vmem:[%s1506_s3 + $0xd0] sm:$0xff] %v999_v0   ;;  %v403_v10 = vsel %vm275_vm7, %v211_v56, %v339_v1  ;;  %v214_v16 = vadd.f32 %v1093_v5, %v143_v7  ;;  %v215_v18 = vadd.f32 %v1093_v5, %v144_v8  ;;  %v146_v19 = vmul.f32 %v1086_v2, %v75_v9 }
  0x53   :  { %v1004_v14 = vpack.c.bf16 %v403_v10, %v402_v4  ;;  %vm277_vm9 = vcmp.ge.f32.partialorder %v213_v6, 0.0  ;;  %v341_v15 = vmul.f32 0.2, %v213_v6  ;;  %v404_v17 = vsel %vm276_vm8, %v212_v3, %v340_v11 }
  0x54   :  { %v216_v20 = vadd.f32 %v1093_v5, %v145_v12  ;;  %vm278_vm10 = vcmp.ge.f32.partialorder %v214_v16, 0.0  ;;  %v342_v23 = vmul.f32 0.2, %v214_v16  ;;  %v147_v24 = vmul.f32 %v1086_v2, %v76_v13 }
  0x55   :  { %1052 = vst [vmem:[%s1506_s3 + $0xd8] sm:$0xff] %v1004_v14   ;;  %v405_v22 = vsel %vm277_vm9, %v213_v6, %v341_v15  ;;  %vm279_vm11 = vcmp.ge.f32.partialorder %v215_v18, 0.0  ;;  %v343_v26 = vmul.f32 0.2, %v215_v18  ;;  %v217_v27 = vadd.f32 %v1093_v5, %v146_v19 }
  0x56   :  { %v1009_v25 = vpack.c.bf16 %v405_v22, %v404_v17  ;;  %v406_v28 = vsel %vm278_vm10, %v214_v16, %v342_v23  ;;  %vm280_vm12 = vcmp.ge.f32.partialorder %v216_v20, 0.0  ;;  %v344_v29 = vmul.f32 0.2, %v216_v20 }
  0x57   :  { %v148_v30 = vmul.f32 %v1086_v2, %v77_v21  ;;  %v407_v31 = vsel %vm279_vm11, %v215_v18, %v343_v26  ;;  %vm281_vm13 = vcmp.ge.f32.partialorder %v217_v27, 0.0  ;;  %v345_v32 = vmul.f32 0.2, %v217_v27 }
  0x58   :  { %1053 = vst [vmem:[%s1506_s3 + $0xe0] sm:$0xff] %v1009_v25   ;;  %v218_v33 = vadd.f32 %v1093_v5, %v147_v24  ;;  %v1014_v34 = vpack.c.bf16 %v407_v31, %v406_v28  ;;  %v408_v35 = vsel %vm280_vm12, %v216_v20, %v344_v29 }
  0x59   :  { %v219_v36 = vadd.f32 %v1093_v5, %v148_v30  ;;  %v409_v37 = vsel %vm281_vm13, %v217_v27, %v345_v32 }
  0x5a   :  { %vm282_vm14 = vcmp.ge.f32.partialorder %v218_v33, 0.0  ;;  %v346_v38 = vmul.f32 0.2, %v218_v33  ;;  %1054 = vst [vmem:[%s1506_s3 + $0xe8] sm:$0xff] %v1014_v34   ;;  %v1019_v2 = vpack.c.bf16 %v409_v37, %v408_v35 }
  0x5b   :  { %vm283_vm15 = vcmp.ge.f32.partialorder %v219_v36, 0.0  ;;  %v347_v39 = vmul.f32 0.2, %v219_v36 }
  0x5c   :  { %v410_v40 = vsel %vm282_vm14, %v218_v33, %v346_v38  ;;  %1055 = vst [vmem:[%s1506_s3 + $0xf0] sm:$0xff] %v1019_v2  }
  0x5d   :  { %v411_v41 = vsel %vm283_vm15, %v219_v36, %v347_v39 }
  0x5e   :  { %v1024_v42 = vpack.c.bf16 %v411_v41, %v410_v40 }
  0x60   :  { %1056 = vst [vmem:[%s1506_s3 + $0xf8] sm:$0xff] %v1024_v42  }

// kernel: nlayer_discriminator.11
= control target key start
LH: loop header
LB: loop body
LE: loop exit
PB: predicated region body
PF: predicated region fallthrough
CT: control target
= control target key end

     0   :  { %s1288_s1 = inlined_call_operand.vmem [shape: bf16[512,128], index: 1, kind: input, shape index: {}]   ;;  %s1289_s0 = inlined_call_operand.vmem [shape: bf16[128,512], index: 0, kind: input, shape index: {}]   ;;  %s1290_s2 = inlined_call_operand.vmem [shape: f32[128,128], index: 2, kind: output, shape index: {0}]   ;;  %s1291_s3 = inlined_call_operand.vmem [shape: f32[1,1,128], index: 3, kind: output, shape index: {1}]   ;;  %s1292_s4 = inlined_call_operand.vmem [shape: f32[1,1,128], index: 4, kind: output, shape index: {2}]  }
   0x1   :  { %v937_v0 = vld [vmem:[%s1288_s1 + $0x40] sm:$0xff]   ;;  %v941_v4 = vld [vmem:[%s1288_s1 + $0x48] sm:$0xff]   ;;  %v945_v8 = vld [vmem:[%s1288_s1 + $0x50] sm:$0xff]  }
   0x2   :  { %v938_v1 = vld [vmem:[%s1288_s1 + $0xc0] sm:$0xff]   ;;  %809 = vmatprep.subr.bf16.mxu0 %v937_v0  ;;  %v942_v5 = vld [vmem:[%s1288_s1 + $0xc8] sm:$0xff]   ;;  %v946_v9 = vld [vmem:[%s1288_s1 + $0xd0] sm:$0xff]  }
   0x3   :  { %v939_v2 = vld [vmem:[%s1288_s1] sm:$0xff]   ;;  %873 = vmatprep.subr.bf16.mxu1 %v938_v1  ;;  %v943_v6 = vld [vmem:[%s1288_s1 + $0x8] sm:$0xff]   ;;  %v947_v10 = vld [vmem:[%s1288_s1 + $0x10] sm:$0xff]  }
   0x4   :  { %v940_v3 = vld [vmem:[%s1288_s1 + $0x80] sm:$0xff]   ;;  %810 = vmatpush3.bf16.msra.mxu0 %v939_v2  ;;  %v944_v7 = vld [vmem:[%s1288_s1 + $0x88] sm:$0xff]   ;;  %v948_v11 = vld [vmem:[%s1288_s1 + $0x90] sm:$0xff]  }
   0x5   :  { %874 = vmatpush3.bf16.msra.mxu1 %v940_v3  ;;  %811 = vmatprep.subr.bf16.mxu0 %v941_v4  ;;  %v949_v12 = vld [vmem:[%s1288_s1 + $0x58] sm:$0xff]   ;;  %v953_v16 = vld [vmem:[%s1288_s1 + $0x60] sm:$0xff]   ;;  %v957_v20 = vld [vmem:[%s1288_s1 + $0x68] sm:$0xff]  }
   0x6   :  { %875 = vmatprep.subr.bf16.mxu1 %v942_v5  ;;  %v950_v13 = vld [vmem:[%s1288_s1 + $0xd8] sm:$0xff]   ;;  %v954_v17 = vld [vmem:[%s1288_s1 + $0xe0] sm:$0xff]   ;;  %v958_v21 = vld [vmem:[%s1288_s1 + $0xe8] sm:$0xff]  }
   0x7   :  { %v951_v14 = vld [vmem:[%s1288_s1 + $0x18] sm:$0xff]   ;;  %v955_v18 = vld [vmem:[%s1288_s1 + $0x20] sm:$0xff]   ;;  %v959_v22 = vld [vmem:[%s1288_s1 + $0x28] sm:$0xff]  }
   0x8   :  { %812 = vmatpush3.bf16.msra.mxu0 %v943_v6  ;;  %v952_v15 = vld [vmem:[%s1288_s1 + $0x98] sm:$0xff]   ;;  %v956_v19 = vld [vmem:[%s1288_s1 + $0xa0] sm:$0xff]   ;;  %v960_v23 = vld [vmem:[%s1288_s1 + $0xa8] sm:$0xff]  }
   0x9   :  { %876 = vmatpush3.bf16.msra.mxu1 %v944_v7  ;;  %813 = vmatprep.subr.bf16.mxu0 %v945_v8  ;;  %v961_v24 = vld [vmem:[%s1288_s1 + $0x70] sm:$0xff]   ;;  %v965_v28 = vld [vmem:[%s1288_s1 + $0x78] sm:$0xff]  }
   0xa   :  { %877 = vmatprep.subr.bf16.mxu1 %v946_v9  ;;  %v962_v25 = vld [vmem:[%s1288_s1 + $0xf0] sm:$0xff]   ;;  %v966_v29 = vld [vmem:[%s1288_s1 + $0xf8] sm:$0xff]  }
   0xb   :  { %v963_v26 = vld [vmem:[%s1288_s1 + $0x30] sm:$0xff]   ;;  %v967_v30 = vld [vmem:[%s1288_s1 + $0x38] sm:$0xff]  }
   0xc   :  { %814 = vmatpush3.bf16.msra.mxu0 %v947_v10  ;;  %v964_v27 = vld [vmem:[%s1288_s1 + $0xb0] sm:$0xff]   ;;  %v968_v31 = vld [vmem:[%s1288_s1 + $0xb8] sm:$0xff]  }
   0xd   :  { %878 = vmatpush3.bf16.msra.mxu1 %v948_v11  ;;  %815 = vmatprep.subr.bf16.mxu0 %v949_v12  ;;  %v969_v32 = vld [vmem:[%s1289_s0] ss:$16 sps:$4 sm:$0xff]   ;;  %v971_v33 = vld [vmem:[%s1289_s0 + $0x4] ss:$16 sps:$4 sm:$0xff]   ;;  %v972_v34 = vld [vmem:[%s1289_s0 + $0x8] ss:$16 sps:$4 sm:$0xff]  }
   0xe   :  { %879 = vmatprep.subr.bf16.mxu1 %v950_v13  ;;  %v974_v35 = vld [vmem:[%s1289_s0 + $0xc] ss:$16 sps:$4 sm:$0xff]   ;;  %495 = vmatprep.mubr.bf16.mxu0 %v971_v33  ;;  %v975_v36 = vld [vmem:[%s1289_s0 + $0x24] ss:$16 sps:$4 sm:$0xff]   ;;  %v979_v38 = vld [vmem:[%s1289_s0 + $0x20] ss:$16 sps:$4 sm:$0xff]  }
   0xf   :  { %592 = vmatprep.mubr.bf16.mxu1 %v974_v35  ;;  %v977_v37 = vld [vmem:[%s1289_s0 + $0x2c] ss:$16 sps:$4 sm:$0xff]   ;;  %v980_v39 = vld [vmem:[%s1289_s0 + $0x28] ss:$16 sps:$4 sm:$0xff]   ;;  %v981_v40 = vld [vmem:[%s1289_s0 + $0x44] ss:$16 sps:$4 sm:$0xff]  }
  0x10   :  { %816 = vmatpush3.bf16.msra.mxu0 %v951_v14  ;;  %v983_v41 = vld [vmem:[%s1289_s0 + $0x4c] ss:$16 sps:$4 sm:$0xff]   ;;  %v985_v42 = vld [vmem:[%s1289_s0 + $0x40] ss:$16 sps:$4 sm:$0xff]   ;;  %v986_v43 = vld [vmem:[%s1289_s0 + $0x48] ss:$16 sps:$4 sm:$0xff]  }
  0x11   :  { %880 = vmatpush3.bf16.msra.mxu1 %v952_v15  ;;  %817 = vmatprep.subr.bf16.mxu0 %v953_v16  ;;  %v987_v44 = vld [vmem:[%s1289_s0 + $0x64] ss:$16 sps:$4 sm:$0xff]   ;;  %v989_v45 = vld [vmem:[%s1289_s0 + $0x6c] ss:$16 sps:$4 sm:$0xff]   ;;  %v991_v46 = vld [vmem:[%s1289_s0 + $0x60] ss:$16 sps:$4 sm:$0xff]  }
  0x12   :  { %881 = vmatprep.subr.bf16.mxu1 %v954_v17  ;;  %v992_v47 = vld [vmem:[%s1289_s0 + $0x68] ss:$16 sps:$4 sm:$0xff]   ;;  %v993_v48 = vld [vmem:[%s1289_s0 + $0x84] ss:$16 sps:$4 sm:$0xff]   ;;  %v995_v49 = vld [vmem:[%s1289_s0 + $0x8c] ss:$16 sps:$4 sm:$0xff]  }
  0x13   :  { %v997_v50 = vld [vmem:[%s1289_s0 + $0x80] ss:$16 sps:$4 sm:$0xff]   ;;  %v998_v51 = vld [vmem:[%s1289_s0 + $0x88] ss:$16 sps:$4 sm:$0xff]   ;;  %v999_v52 = vld [vmem:[%s1289_s0 + $0xa4] ss:$16 sps:$4 sm:$0xff]  }
  0x14   :  { %818 = vmatpush3.bf16.msra.mxu0 %v955_v18  ;;  %v1001_v53 = vld [vmem:[%s1289_s0 + $0xac] ss:$16 sps:$4 sm:$0xff]   ;;  %v1003_v54 = vld [vmem:[%s1289_s0 + $0xa0] ss:$16 sps:$4 sm:$0xff]   ;;  %v1004_v55 = vld [vmem:[%s1289_s0 + $0xa8] ss:$16 sps:$4 sm:$0xff]  }
  0x15   :  { %882 = vmatpush3.bf16.msra.mxu1 %v956_v19  ;;  %819 = vmatprep.subr.bf16.mxu0 %v957_v20  ;;  %v1005_v56 = vld [vmem:[%s1289_s0 + $0xc4] ss:$16 sps:$4 sm:$0xff]   ;;  %v1007_v57 = vld [vmem:[%s1289_s0 + $0xcc] ss:$16 sps:$4 sm:$0xff]   ;;  %v1009_v58 = vld [vmem:[%s1289_s0 + $0xc0] ss:$16 sps:$4 sm:$0xff]  }
  0x16   :  { %883 = vmatprep.subr.bf16.mxu1 %v958_v21  ;;  %v1010_v59 = vld [vmem:[%s1289_s0 + $0xc8] ss:$16 sps:$4 sm:$0xff]   ;;  %v1011_v60 = vld [vmem:[%s1289_s0 + $0xe4] ss:$16 sps:$4 sm:$0xff]   ;;  %v1013_v61 = vld [vmem:[%s1289_s0 + $0xec] ss:$16 sps:$4 sm:$0xff]  }
  0x17   :  { %v1015_v62 = vld [vmem:[%s1289_s0 + $0xe0] ss:$16 sps:$4 sm:$0xff]   ;;  %v1016_v63 = vld [vmem:[%s1289_s0 + $0xe8] ss:$16 sps:$4 sm:$0xff]  }
  0x18   :  { %820 = vmatpush3.bf16.msra.mxu0 %v959_v22 }
  0x19   :  { %884 = vmatpush3.bf16.msra.mxu1 %v960_v23  ;;  %821 = vmatprep.subr.bf16.mxu0 %v961_v24 }
  0x1a   :  { %885 = vmatprep.subr.bf16.mxu1 %v962_v25 }
  0x1c   :  { %822 = vmatpush3.bf16.msra.mxu0 %v963_v26 }
  0x1d   :  { %886 = vmatpush3.bf16.msra.mxu1 %v964_v27  ;;  %823 = vmatprep.subr.bf16.mxu0 %v965_v28 }
  0x1e   :  { %887 = vmatprep.subr.bf16.mxu1 %v966_v29 }
  0x20   :  { %824 = vmatpush3.bf16.msra.mxu0 %v967_v30 }
  0x21   :  { %888 = vmatpush3.bf16.msra.mxu1 %v968_v31 }
  0x23   :  { %496 = vmatmul.mubr.bf16.vlgmr.msra.gmra.mrb[0].mxu0 %v969_v32 }
  0x24   :  { %593 = vmatmul.mubr.bf16.vlgmr.msra.gmra.mrb[0].mxu1 %v972_v34  ;;  %503 = vmatprep.mubr.bf16.mxu0 %v975_v36 }
  0x25   :  { %600 = vmatprep.mubr.bf16.mxu1 %v977_v37 }
  0x2b   :  { %504 = vmatmul.mubr.bf16.gmra.mrb[4].mxu0 %v979_v38 }
  0x2c   :  { %601 = vmatmul.mubr.bf16.gmra.mrb[4].mxu1 %v980_v39  ;;  %511 = vmatprep.mubr.bf16.mxu0 %v981_v40 }
  0x2d   :  { %608 = vmatprep.mubr.bf16.mxu1 %v983_v41 }
  0x33   :  { %512 = vmatmul.mubr.bf16.gmra.mrb[8].mxu0 %v985_v42 }
  0x34   :  { %609 = vmatmul.mubr.bf16.gmra.mrb[8].mxu1 %v986_v43  ;;  %519 = vmatprep.mubr.bf16.mxu0 %v987_v44 }
  0x35   :  { %616 = vmatprep.mubr.bf16.mxu1 %v989_v45 }
  0x3b   :  { %520 = vmatmul.mubr.bf16.gmra.mrb[12].mxu0 %v991_v46 }
  0x3c   :  { %617 = vmatmul.mubr.bf16.gmra.mrb[12].mxu1 %v992_v47  ;;  %527 = vmatprep.mubr.bf16.mxu0 %v993_v48 }
  0x3d   :  { %624 = vmatprep.mubr.bf16.mxu1 %v995_v49 }
  0x43   :  { %528 = vmatmul.mubr.bf16.gmra.mrb[16].mxu0 %v997_v50 }
  0x44   :  { %625 = vmatmul.mubr.bf16.gmra.mrb[16].mxu1 %v998_v51  ;;  %535 = vmatprep.mubr.bf16.mxu0 %v999_v52 }
  0x45   :  { %632 = vmatprep.mubr.bf16.mxu1 %v1001_v53 }
  0x4b   :  { %536 = vmatmul.mubr.bf16.gmra.mrb[20].mxu0 %v1003_v54 }
  0x4c   :  { %633 = vmatmul.mubr.bf16.gmra.mrb[20].mxu1 %v1004_v55  ;;  %543 = vmatprep.mubr.bf16.mxu0 %v1005_v56 }
  0x4d   :  { %640 = vmatprep.mubr.bf16.mxu1 %v1007_v57 }
  0x53   :  { %544 = vmatmul.mubr.bf16.gmra.mrb[24].mxu0 %v1009_v58 }
  0x54   :  { %641 = vmatmul.mubr.bf16.gmra.mrb[24].mxu1 %v1010_v59  ;;  %551 = vmatprep.mubr.bf16.mxu0 %v1011_v60 }
  0x55   :  { %648 = vmatprep.mubr.bf16.mxu1 %v1013_v61 }
  0x5b   :  { %552 = vmatmul.mubr.bf16.gmra.mrb[28].mxu0 %v1015_v62 }
  0x5c   :  { %649 = vmatmul.mubr.bf16.gmra.mrb[28].mxu1 %v1016_v63 }
  0xf6   :  { %v825_v0 = vpop.f32.mrb[0].mxu0 }
  0xf7   :  { %v889_v1 = vpop.f32.mrb[0].mxu1  ;;  %v826_v2 = vpop.f32.mrb[1].mxu0 }
  0xf8   :  { %v827_v3 = vadd.f32 %v826_v2, %v825_v0  ;;  %v890_v4 = vpop.f32.mrb[1].mxu1  ;;  %v828_v5 = vpop.f32.mrb[2].mxu0 }
  0xf9   :  { %v891_v6 = vadd.f32 %v890_v4, %v889_v1  ;;  %v892_v7 = vpop.f32.mrb[2].mxu1  ;;  %v829_v8 = vpop.f32.mrb[3].mxu0 }
  0xfa   :  { %v830_v9 = vadd.f32 %v829_v8, %v828_v5  ;;  %v893_v10 = vpop.f32.mrb[3].mxu1 }
  0xfb   :  { %v595_v11 = vadd.f32 %v891_v6, %v827_v3  ;;  %v894_v12 = vadd.f32 %v893_v10, %v892_v7 }
  0xfd   :  { %657 = vst [vmem:[%s1290_s2] sm:$0xff] %v595_v11  ;;  %v598_v13 = vadd.f32 %v894_v12, %v830_v9  ;;  %v695_v15 = vmul.f32 %v595_v11, %v595_v11 }
  0xfe   :  { %v831_v14 = vpop.f32.mrb[4].mxu0 }
  0xff   :  { %658 = vst [vmem:[%s1290_s2 + $0x8] sm:$0xff] %v598_v13  ;;  %v673_v16 = vadd.f32 %v598_v13, %v595_v11  ;;  %v696_v17 = vmul.f32 %v598_v13, %v598_v13  ;;  %v895_v18 = vpop.f32.mrb[4].mxu1  ;;  %v832_v19 = vpop.f32.mrb[5].mxu0 }
 0x100   :  { %v833_v20 = vadd.f32 %v832_v19, %v831_v14  ;;  %v896_v21 = vpop.f32.mrb[5].mxu1  ;;  %v834_v22 = vpop.f32.mrb[6].mxu0 }
 0x101   :  { %v711_v23 = vadd.f32 %v696_v17, %v695_v15  ;;  %v897_v24 = vadd.f32 %v896_v21, %v895_v18  ;;  %v898_v25 = vpop.f32.mrb[6].mxu1  ;;  %v835_v26 = vpop.f32.mrb[7].mxu0 }
 0x102   :  { %v836_v27 = vadd.f32 %v835_v26, %v834_v22  ;;  %v899_v28 = vpop.f32.mrb[7].mxu1 }
 0x103   :  { %v603_v29 = vadd.f32 %v897_v24, %v833_v20  ;;  %v900_v30 = vadd.f32 %v899_v28, %v898_v25 }
 0x105   :  { %659 = vst [vmem:[%s1290_s2 + $0x10] sm:$0xff] %v603_v29  ;;  %v674_v31 = vadd.f32 %v673_v16, %v603_v29  ;;  %v697_v32 = vmul.f32 %v603_v29, %v603_v29  ;;  %v606_v33 = vadd.f32 %v900_v30, %v836_v27 }
 0x106   :  { %v837_v34 = vpop.f32.mrb[8].mxu0 }
 0x107   :  { %v712_v35 = vadd.f32 %v711_v23, %v697_v32  ;;  %660 = vst [vmem:[%s1290_s2 + $0x18] sm:$0xff] %v606_v33  ;;  %v675_v36 = vadd.f32 %v674_v31, %v606_v33  ;;  %v698_v37 = vmul.f32 %v606_v33, %v606_v33  ;;  %v901_v38 = vpop.f32.mrb[8].mxu1  ;;  %v838_v39 = vpop.f32.mrb[9].mxu0 }
 0x108   :  { %v839_v40 = vadd.f32 %v838_v39, %v837_v34  ;;  %v902_v41 = vpop.f32.mrb[9].mxu1  ;;  %v840_v42 = vpop.f32.mrb[10].mxu0 }
 0x109   :  { %v713_v43 = vadd.f32 %v712_v35, %v698_v37  ;;  %v903_v44 = vadd.f32 %v902_v41, %v901_v38  ;;  %v904_v45 = vpop.f32.mrb[10].mxu1  ;;  %v841_v46 = vpop.f32.mrb[11].mxu0 }
 0x10a   :  { %v842_v47 = vadd.f32 %v841_v46, %v840_v42  ;;  %v905_v48 = vpop.f32.mrb[11].mxu1 }
 0x10b   :  { %v611_v49 = vadd.f32 %v903_v44, %v839_v40  ;;  %v906_v50 = vadd.f32 %v905_v48, %v904_v45 }
 0x10d   :  { %661 = vst [vmem:[%s1290_s2 + $0x20] sm:$0xff] %v611_v49  ;;  %v676_v51 = vadd.f32 %v675_v36, %v611_v49  ;;  %v699_v52 = vmul.f32 %v611_v49, %v611_v49  ;;  %v614_v53 = vadd.f32 %v906_v50, %v842_v47 }
 0x10e   :  { %v843_v54 = vpop.f32.mrb[12].mxu0 }
 0x10f   :  { %v714_v55 = vadd.f32 %v713_v43, %v699_v52  ;;  %662 = vst [vmem:[%s1290_s2 + $0x28] sm:$0xff] %v614_v53  ;;  %v677_v56 = vadd.f32 %v676_v51, %v614_v53  ;;  %v700_v57 = vmul.f32 %v614_v53, %v614_v53  ;;  %v907_v58 = vpop.f32.mrb[12].mxu1  ;;  %v844_v59 = vpop.f32.mrb[13].mxu0 }
 0x110   :  { %v845_v60 = vadd.f32 %v844_v59, %v843_v54  ;;  %v908_v61 = vpop.f32.mrb[13].mxu1  ;;  %v846_v62 = vpop.f32.mrb[14].mxu0 }
 0x111   :  { %v715_v63 = vadd.f32 %v714_v55, %v700_v57  ;;  %v909_v0 = vadd.f32 %v908_v61, %v907_v58  ;;  %v910_v1 = vpop.f32.mrb[14].mxu1  ;;  %v847_v2 = vpop.f32.mrb[15].mxu0 }
 0x112   :  { %v848_v3 = vadd.f32 %v847_v2, %v846_v62  ;;  %v911_v4 = vpop.f32.mrb[15].mxu1 }
 0x113   :  { %v619_v5 = vadd.f32 %v909_v0, %v845_v60  ;;  %v912_v6 = vadd.f32 %v911_v4, %v910_v1 }
 0x115   :  { %663 = vst [vmem:[%s1290_s2 + $0x30] sm:$0xff] %v619_v5  ;;  %v678_v7 = vadd.f32 %v677_v56, %v619_v5  ;;  %v701_v8 = vmul.f32 %v619_v5, %v619_v5  ;;  %v622_v9 = vadd.f32 %v912_v6, %v848_v3 }
 0x116   :  { %v849_v10 = vpop.f32.mrb[16].mxu0 }
 0x117   :  { %v716_v11 = vadd.f32 %v715_v63, %v701_v8  ;;  %664 = vst [vmem:[%s1290_s2 + $0x38] sm:$0xff] %v622_v9  ;;  %v679_v12 = vadd.f32 %v678_v7, %v622_v9  ;;  %v702_v13 = vmul.f32 %v622_v9, %v622_v9  ;;  %v913_v14 = vpop.f32.mrb[16].mxu1  ;;  %v850_v15 = vpop.f32.mrb[17].mxu0 }
 0x118   :  { %v851_v16 = vadd.f32 %v850_v15, %v849_v10  ;;  %v914_v17 = vpop.f32.mrb[17].mxu1  ;;  %v852_v18 = vpop.f32.mrb[18].mxu0 }
 0x119   :  { %v717_v19 = vadd.f32 %v716_v11, %v702_v13  ;;  %v915_v20 = vadd.f32 %v914_v17, %v913_v14  ;;  %v916_v21 = vpop.f32.mrb[18].mxu1  ;;  %v853_v22 = vpop.f32.mrb[19].mxu0 }
 0x11a   :  { %v854_v23 = vadd.f32 %v853_v22, %v852_v18  ;;  %v917_v24 = vpop.f32.mrb[19].mxu1 }
 0x11b   :  { %v627_v25 = vadd.f32 %v915_v20, %v851_v16  ;;  %v918_v26 = vadd.f32 %v917_v24, %v916_v21 }
 0x11d   :  { %665 = vst [vmem:[%s1290_s2 + $0x40] sm:$0xff] %v627_v25  ;;  %v680_v27 = vadd.f32 %v679_v12, %v627_v25  ;;  %v703_v28 = vmul.f32 %v627_v25, %v627_v25  ;;  %v630_v29 = vadd.f32 %v918_v26, %v854_v23 }
 0x11e   :  { %v855_v30 = vpop.f32.mrb[20].mxu0 }
 0x11f   :  { %v718_v31 = vadd.f32 %v717_v19, %v703_v28  ;;  %666 = vst [vmem:[%s1290_s2 + $0x48] sm:$0xff] %v630_v29  ;;  %v681_v32 = vadd.f32 %v680_v27, %v630_v29  ;;  %v704_v33 = vmul.f32 %v630_v29, %v630_v29  ;;  %v919_v34 = vpop.f32.mrb[20].mxu1  ;;  %v856_v35 = vpop.f32.mrb[21].mxu0 }
 0x120   :  { %v857_v36 = vadd.f32 %v856_v35, %v855_v30  ;;  %v920_v37 = vpop.f32.mrb[21].mxu1  ;;  %v858_v38 = vpop.f32.mrb[22].mxu0 }
 0x121   :  { %v719_v39 = vadd.f32 %v718_v31, %v704_v33  ;;  %v921_v40 = vadd.f32 %v920_v37, %v919_v34  ;;  %v922_v41 = vpop.f32.mrb[22].mxu1  ;;  %v859_v42 = vpop.f32.mrb[23].mxu0 }
 0x122   :  { %v860_v43 = vadd.f32 %v859_v42, %v858_v38  ;;  %v923_v44 = vpop.f32.mrb[23].mxu1 }
 0x123   :  { %v635_v45 = vadd.f32 %v921_v40, %v857_v36  ;;  %v924_v46 = vadd.f32 %v923_v44, %v922_v41 }
 0x125   :  { %667 = vst [vmem:[%s1290_s2 + $0x50] sm:$0xff] %v635_v45  ;;  %v682_v47 = vadd.f32 %v681_v32, %v635_v45  ;;  %v705_v48 = vmul.f32 %v635_v45, %v635_v45  ;;  %v638_v49 = vadd.f32 %v924_v46, %v860_v43 }
 0x126   :  { %v861_v50 = vpop.f32.mrb[24].mxu0 }
 0x127   :  { %v720_v51 = vadd.f32 %v719_v39, %v705_v48  ;;  %668 = vst [vmem:[%s1290_s2 + $0x58] sm:$0xff] %v638_v49  ;;  %v683_v52 = vadd.f32 %v682_v47, %v638_v49  ;;  %v706_v53 = vmul.f32 %v638_v49, %v638_v49  ;;  %v925_v54 = vpop.f32.mrb[24].mxu1  ;;  %v862_v55 = vpop.f32.mrb[25].mxu0 }
 0x128   :  { %v863_v56 = vadd.f32 %v862_v55, %v861_v50  ;;  %v926_v57 = vpop.f32.mrb[25].mxu1  ;;  %v864_v58 = vpop.f32.mrb[26].mxu0 }
 0x129   :  { %v721_v59 = vadd.f32 %v720_v51, %v706_v53  ;;  %v927_v60 = vadd.f32 %v926_v57, %v925_v54  ;;  %v928_v61 = vpop.f32.mrb[26].mxu1  ;;  %v865_v62 = vpop.f32.mrb[27].mxu0 }
 0x12a   :  { %v866_v63 = vadd.f32 %v865_v62, %v864_v58  ;;  %v929_v0 = vpop.f32.mrb[27].mxu1 }
 0x12b   :  { %v643_v1 = vadd.f32 %v927_v60, %v863_v56  ;;  %v930_v2 = vadd.f32 %v929_v0, %v928_v61 }
 0x12d   :  { %669 = vst [vmem:[%s1290_s2 + $0x60] sm:$0xff] %v643_v1  ;;  %v684_v3 = vadd.f32 %v683_v52, %v643_v1  ;;  %v707_v4 = vmul.f32 %v643_v1, %v643_v1  ;;  %v646_v5 = vadd.f32 %v930_v2, %v866_v63 }
 0x12e   :  { %v867_v6 = vpop.f32.mrb[28].mxu0 }
 0x12f   :  { %v722_v7 = vadd.f32 %v721_v59, %v707_v4  ;;  %670 = vst [vmem:[%s1290_s2 + $0x68] sm:$0xff] %v646_v5  ;;  %v685_v8 = vadd.f32 %v684_v3, %v646_v5  ;;  %v708_v9 = vmul.f32 %v646_v5, %v646_v5  ;;  %v931_v10 = vpop.f32.mrb[28].mxu1  ;;  %v868_v11 = vpop.f32.mrb[29].mxu0 }
 0x130   :  { %v869_v12 = vadd.f32 %v868_v11, %v867_v6  ;;  %v932_v13 = vpop.f32.mrb[29].mxu1  ;;  %v870_v14 = vpop.f32.mrb[30].mxu0 }
 0x131   :  { %v723_v15 = vadd.f32 %v722_v7, %v708_v9  ;;  %v933_v16 = vadd.f32 %v932_v13, %v931_v10  ;;  %v934_v17 = vpop.f32.mrb[30].mxu1  ;;  %v871_v18 = vpop.f32.mrb[31].mxu0 }
 0x132   :  { %v872_v19 = vadd.f32 %v871_v18, %v870_v14  ;;  %v935_v20 = vpop.f32.mrb[31].mxu1 }
 0x133   :  { %v651_v21 = vadd.f32 %v933_v16, %v869_v12  ;;  %v936_v22 = vadd.f32 %v935_v20, %v934_v17 }
 0x135   :  { %671 = vst [vmem:[%s1290_s2 + $0x70] sm:$0xff] %v651_v21  ;;  %v686_v23 = vadd.f32 %v685_v8, %v651_v21  ;;  %v709_v24 = vmul.f32 %v651_v21, %v651_v21  ;;  %v654_v25 = vadd.f32 %v936_v22, %v872_v19 }
 0x137   :  { %v724_v26 = vadd.f32 %v723_v15, %v709_v24  ;;  %672 = vst [vmem:[%s1290_s2 + $0x78] sm:$0xff] %v654_v25  ;;  %v687_v27 = vadd.f32 %v686_v23, %v654_v25  ;;  %v710_v28 = vmul.f32 %v654_v25, %v654_v25 }
 0x139   :  { %v688_v29 = vrot.slane %v687_v27, 4  ;;  %v725_v30 = vadd.f32 %v724_v26, %v710_v28 }
 0x13b   :  { %v689_v31 = vadd.f32 %v688_v29, %v687_v27  ;;  %v726_v32 = vrot.slane %v725_v30, 4 }
 0x13d   :  { %v690_v33 = vrot.slane %v689_v31, 2  ;;  %v727_v34 = vadd.f32 %v726_v32, %v725_v30 }
 0x13f   :  { %v691_v35 = vadd.f32 %v690_v33, %v689_v31  ;;  %v728_v36 = vrot.slane %v727_v34, 2 }
 0x141   :  { %v692_v37 = vrot.slane %v691_v35, 1  ;;  %v729_v38 = vadd.f32 %v728_v36, %v727_v34 }
 0x143   :  { %v693_v39 = vadd.f32 %v692_v37, %v691_v35  ;;  %v730_v40 = vrot.slane %v729_v38, 1 }
 0x145   :  { %694 = vst [vmem:[%s1291_s3] sm:$0x1] %v693_v39  ;;  %v731_v41 = vadd.f32 %v730_v40, %v729_v38 }
 0x147   :  { %732 = vst [vmem:[%s1292_s4] sm:$0x1] %v731_v41 }

// kernel: nlayer_discriminator.12
= control target key start
LH: loop header
LB: loop body
LE: loop exit
PB: predicated region body
PF: predicated region fallthrough
CT: control target
= control target key end

     0   :  { %s423_s0 = inlined_call_operand.vmem [shape: f32[128,128], index: 0, kind: input, shape index: {}]   ;;  %s424_s1 = inlined_call_operand.vmem [shape: f32[1,128], index: 1, kind: input, shape index: {}]   ;;  %s425_s2 = inlined_call_operand.vmem [shape: f32[1,128], index: 2, kind: input, shape index: {}]   ;;  %s426_s3 = inlined_call_operand.vmem [shape: bf16[128,128], index: 3, kind: output, shape index: {}]  }
   0x1   :  { %v14_v0 = vld [vmem:[%s423_s0] sm:$0xff]  ;;  %v15_v1 = vld [vmem:[%s423_s0 + $0x8] sm:$0xff]  ;;  %v16_v6 = vld [vmem:[%s423_s0 + $0x10] sm:$0xff] }
   0x2   :  { %v318_v2 = vld [vmem:[%s424_s1] ss:$0 sm:$0xff]  ;;  %v17_v7 = vld [vmem:[%s423_s0 + $0x18] sm:$0xff]  ;;  %v19_v11 = vld [vmem:[%s423_s0 + $0x28] sm:$0xff] }
   0x3   :  { %v37_v3 = vmul.f32 %v318_v2, %v14_v0  ;;  %v38_v4 = vmul.f32 %v318_v2, %v15_v1  ;;  %v325_v5 = vld [vmem:[%s425_s2] ss:$0 sm:$0xff]  ;;  %v39_v8 = vmul.f32 %v318_v2, %v16_v6  ;;  %v40_v9 = vmul.f32 %v318_v2, %v17_v7  ;;  %v20_v12 = vld [vmem:[%s423_s0 + $0x30] sm:$0xff]  ;;  %v21_v17 = vld [vmem:[%s423_s0 + $0x38] sm:$0xff] }
   0x4   :  { %v18_v10 = vld [vmem:[%s423_s0 + $0x20] sm:$0xff]  ;;  %v42_v16 = vmul.f32 %v318_v2, %v19_v11  ;;  %v43_v20 = vmul.f32 %v318_v2, %v20_v12  ;;  %v44_v21 = vmul.f32 %v318_v2, %v21_v17  ;;  %v23_v35 = vld [vmem:[%s423_s0 + $0x48] sm:$0xff]  ;;  %v24_v36 = vld [vmem:[%s423_s0 + $0x50] sm:$0xff] }
   0x5   :  { %v60_v13 = vadd.f32 %v325_v5, %v37_v3  ;;  %v61_v14 = vadd.f32 %v325_v5, %v38_v4  ;;  %v41_v15 = vmul.f32 %v318_v2, %v18_v10  ;;  %v62_v18 = vadd.f32 %v325_v5, %v39_v8  ;;  %v22_v34 = vld [vmem:[%s423_s0 + $0x40] sm:$0xff]  ;;  %v25_v42 = vld [vmem:[%s423_s0 + $0x58] sm:$0xff]  ;;  %v27_v48 = vld [vmem:[%s423_s0 + $0x68] sm:$0xff] }
   0x6   :  { %v63_v19 = vadd.f32 %v325_v5, %v40_v9  ;;  %v65_v29 = vadd.f32 %v325_v5, %v42_v16  ;;  %v66_v33 = vadd.f32 %v325_v5, %v43_v20  ;;  %v67_v40 = vadd.f32 %v325_v5, %v44_v21  ;;  %v26_v47 = vld [vmem:[%s423_s0 + $0x60] sm:$0xff]  ;;  %v28_v60 = vld [vmem:[%s423_s0 + $0x70] sm:$0xff]  ;;  %v29_v7 = vld [vmem:[%s423_s0 + $0x78] sm:$0xff] }
   0x7   :  { %vm76_vm0 = vcmp.ge.f32.partialorder %v60_v13, 0.0  ;;  %vm77_vm1 = vcmp.ge.f32.partialorder %v61_v14, 0.0  ;;  %v92_v22 = vmul.f32 0.2, %v60_v13  ;;  %v93_v23 = vmul.f32 0.2, %v61_v14 }
   0x8   :  { %vm78_vm2 = vcmp.ge.f32.partialorder %v62_v18, 0.0  ;;  %vm79_vm3 = vcmp.ge.f32.partialorder %v63_v19, 0.0  ;;  %v94_v24 = vmul.f32 0.2, %v62_v18  ;;  %v95_v25 = vmul.f32 0.2, %v63_v19 }
   0x9   :  { %v108_v26 = vsel %vm76_vm0, %v60_v13, %v92_v22  ;;  %v109_v27 = vsel %vm77_vm1, %v61_v14, %v93_v23  ;;  %v64_v28 = vadd.f32 %v325_v5, %v41_v15  ;;  %vm81_vm5 = vcmp.ge.f32.partialorder %v65_v29, 0.0 }
   0xa   :  { %v245_v30 = vpack.c.bf16 %v109_v27, %v108_v26  ;;  %v110_v31 = vsel %vm78_vm2, %v62_v18, %v94_v24  ;;  %v111_v32 = vsel %vm79_vm3, %v63_v19, %v95_v25  ;;  %v97_v39 = vmul.f32 0.2, %v65_v29 }
   0xb   :  { %v250_v37 = vpack.c.bf16 %v111_v32, %v110_v31  ;;  %vm80_vm4 = vcmp.ge.f32.partialorder %v64_v28, 0.0  ;;  %v96_v38 = vmul.f32 0.2, %v64_v28  ;;  %vm82_vm6 = vcmp.ge.f32.partialorder %v66_v33, 0.0 }
   0xc   :  { %246 = vst [vmem:[%s426_s3] sm:$0xff] %v245_v30   ;;  %v98_v41 = vmul.f32 0.2, %v66_v33  ;;  %v45_v44 = vmul.f32 %v318_v2, %v22_v34  ;;  %v46_v45 = vmul.f32 %v318_v2, %v23_v35  ;;  %v47_v46 = vmul.f32 %v318_v2, %v24_v36 }
   0xd   :  { %282 = vst [vmem:[%s426_s3 + $0x8] sm:$0xff] %v250_v37   ;;  %v112_v43 = vsel %vm80_vm4, %v64_v28, %v96_v38  ;;  %v113_v49 = vsel %vm81_vm5, %v65_v29, %v97_v39  ;;  %vm83_vm7 = vcmp.ge.f32.partialorder %v67_v40, 0.0  ;;  %v99_v50 = vmul.f32 0.2, %v67_v40 }
   0xe   :  { %v114_v51 = vsel %vm82_vm6, %v66_v33, %v98_v41  ;;  %v255_v52 = vpack.c.bf16 %v113_v49, %v112_v43  ;;  %v68_v53 = vadd.f32 %v325_v5, %v45_v44  ;;  %v69_v54 = vadd.f32 %v325_v5, %v46_v45 }
   0xf   :  { %v48_v55 = vmul.f32 %v318_v2, %v25_v42  ;;  %v115_v56 = vsel %vm83_vm7, %v67_v40, %v99_v50  ;;  %v70_v57 = vadd.f32 %v325_v5, %v47_v46  ;;  %v49_v58 = vmul.f32 %v318_v2, %v26_v47 }
  0x10   :  { %v50_v59 = vmul.f32 %v318_v2, %v27_v48  ;;  %283 = vst [vmem:[%s426_s3 + $0x10] sm:$0xff] %v255_v52   ;;  %v260_v61 = vpack.c.bf16 %v115_v56, %v114_v51  ;;  %vm84_vm8 = vcmp.ge.f32.partialorder %v68_v53, 0.0  ;;  %vm85_vm9 = vcmp.ge.f32.partialorder %v69_v54, 0.0 }
  0x11   :  { %v100_v62 = vmul.f32 0.2, %v68_v53  ;;  %v101_v63 = vmul.f32 0.2, %v69_v54  ;;  %v71_v0 = vadd.f32 %v325_v5, %v48_v55  ;;  %vm86_vm10 = vcmp.ge.f32.partialorder %v70_v57, 0.0 }
  0x12   :  { %v102_v1 = vmul.f32 0.2, %v70_v57  ;;  %284 = vst [vmem:[%s426_s3 + $0x18] sm:$0xff] %v260_v61   ;;  %v72_v4 = vadd.f32 %v325_v5, %v49_v58  ;;  %v73_v6 = vadd.f32 %v325_v5, %v50_v59  ;;  %v51_v8 = vmul.f32 %v318_v2, %v28_v60 }
  0x13   :  { %v116_v3 = vsel %vm84_vm8, %v68_v53, %v100_v62  ;;  %v117_v9 = vsel %vm85_vm9, %v69_v54, %v101_v63  ;;  %vm87_vm11 = vcmp.ge.f32.partialorder %v71_v0, 0.0  ;;  %v103_v10 = vmul.f32 0.2, %v71_v0 }
  0x14   :  { %v118_v11 = vsel %vm86_vm10, %v70_v57, %v102_v1  ;;  %v265_v12 = vpack.c.bf16 %v117_v9, %v116_v3  ;;  %vm88_vm12 = vcmp.ge.f32.partialorder %v72_v4, 0.0  ;;  %vm89_vm13 = vcmp.ge.f32.partialorder %v73_v6, 0.0 }
  0x15   :  { %v104_v13 = vmul.f32 0.2, %v72_v4  ;;  %v119_v14 = vsel %vm87_vm11, %v71_v0, %v103_v10  ;;  %v105_v15 = vmul.f32 0.2, %v73_v6  ;;  %v52_v16 = vmul.f32 %v318_v2, %v29_v7 }
  0x16   :  { %v74_v17 = vadd.f32 %v325_v5, %v51_v8  ;;  %285 = vst [vmem:[%s426_s3 + $0x20] sm:$0xff] %v265_v12   ;;  %v270_v18 = vpack.c.bf16 %v119_v14, %v118_v11 }
  0x17   :  { %v120_v19 = vsel %vm88_vm12, %v72_v4, %v104_v13  ;;  %v121_v20 = vsel %vm89_vm13, %v73_v6, %v105_v15  ;;  %v75_v21 = vadd.f32 %v325_v5, %v52_v16 }
  0x18   :  { %vm90_vm14 = vcmp.ge.f32.partialorder %v74_v17, 0.0  ;;  %v106_v22 = vmul.f32 0.2, %v74_v17  ;;  %286 = vst [vmem:[%s426_s3 + $0x28] sm:$0xff] %v270_v18   ;;  %v275_v23 = vpack.c.bf16 %v121_v20, %v120_v19 }
  0x19   :  { %vm91_vm15 = vcmp.ge.f32.partialorder %v75_v21, 0.0  ;;  %v107_v2 = vmul.f32 0.2, %v75_v21 }
  0x1a   :  { %v122_v24 = vsel %vm90_vm14, %v74_v17, %v106_v22  ;;  %287 = vst [vmem:[%s426_s3 + $0x30] sm:$0xff] %v275_v23  }
  0x1b   :  { %v123_v25 = vsel %vm91_vm15, %v75_v21, %v107_v2 }
  0x1c   :  { %v280_v26 = vpack.c.bf16 %v123_v25, %v122_v24 }
  0x1e   :  { %288 = vst [vmem:[%s426_s3 + $0x38] sm:$0xff] %v280_v26  }

// kernel: nlayer_discriminator.14
= control target key start
LH: loop header
LB: loop body
LE: loop exit
PB: predicated region body
PF: predicated region fallthrough
CT: control target
= control target key end

     0   :  { %s355_s0 = inlined_call_operand.vmem [shape: f32[104,128], index: 0, kind: input, shape index: {}]   ;;  %s356_s1 = inlined_call_operand.vmem [shape: f32[1,128], index: 1, kind: input, shape index: {}]   ;;  %s357_s2 = inlined_call_operand.vmem [shape: f32[1,128], index: 2, kind: input, shape index: {}]   ;;  %s358_s3 = inlined_call_operand.vmem [shape: bf16[104,128], index: 3, kind: output, shape index: {}]  }
   0x1   :  { %v14_v0 = vld [vmem:[%s355_s0] sm:$0xff]  ;;  %v15_v1 = vld [vmem:[%s355_s0 + $0x8] sm:$0xff]  ;;  %v16_v6 = vld [vmem:[%s355_s0 + $0x10] sm:$0xff] }
   0x2   :  { %v268_v2 = vld [vmem:[%s356_s1] ss:$0 sm:$0xff]  ;;  %v17_v7 = vld [vmem:[%s355_s0 + $0x18] sm:$0xff]  ;;  %v19_v11 = vld [vmem:[%s355_s0 + $0x28] sm:$0xff] }
   0x3   :  { %v34_v3 = vmul.f32 %v268_v2, %v14_v0  ;;  %v35_v4 = vmul.f32 %v268_v2, %v15_v1  ;;  %v275_v5 = vld [vmem:[%s357_s2] ss:$0 sm:$0xff]  ;;  %v36_v8 = vmul.f32 %v268_v2, %v16_v6  ;;  %v37_v9 = vmul.f32 %v268_v2, %v17_v7  ;;  %v20_v12 = vld [vmem:[%s355_s0 + $0x30] sm:$0xff]  ;;  %v21_v17 = vld [vmem:[%s355_s0 + $0x38] sm:$0xff] }
   0x4   :  { %v18_v10 = vld [vmem:[%s355_s0 + $0x20] sm:$0xff]  ;;  %v39_v16 = vmul.f32 %v268_v2, %v19_v11  ;;  %v40_v20 = vmul.f32 %v268_v2, %v20_v12  ;;  %v41_v21 = vmul.f32 %v268_v2, %v21_v17  ;;  %v23_v35 = vld [vmem:[%s355_s0 + $0x48] sm:$0xff]  ;;  %v24_v36 = vld [vmem:[%s355_s0 + $0x50] sm:$0xff] }
   0x5   :  { %v54_v13 = vadd.f32 %v275_v5, %v34_v3  ;;  %v55_v14 = vadd.f32 %v275_v5, %v35_v4  ;;  %v38_v15 = vmul.f32 %v268_v2, %v18_v10  ;;  %v56_v18 = vadd.f32 %v275_v5, %v36_v8  ;;  %v22_v34 = vld [vmem:[%s355_s0 + $0x40] sm:$0xff]  ;;  %v25_v42 = vld [vmem:[%s355_s0 + $0x58] sm:$0xff] }
   0x6   :  { %v57_v19 = vadd.f32 %v275_v5, %v37_v9  ;;  %v59_v29 = vadd.f32 %v275_v5, %v39_v16  ;;  %v60_v33 = vadd.f32 %v275_v5, %v40_v20  ;;  %v61_v40 = vadd.f32 %v275_v5, %v41_v21  ;;  %v26_v47 = vld [vmem:[%s355_s0 + $0x60] sm:$0xff] }
   0x7   :  { %vm67_vm0 = vcmp.ge.f32.partialorder %v54_v13, 0.0  ;;  %vm68_vm1 = vcmp.ge.f32.partialorder %v55_v14, 0.0  ;;  %v80_v22 = vmul.f32 0.2, %v54_v13  ;;  %v81_v23 = vmul.f32 0.2, %v55_v14 }
   0x8   :  { %vm69_vm2 = vcmp.ge.f32.partialorder %v56_v18, 0.0  ;;  %vm70_vm3 = vcmp.ge.f32.partialorder %v57_v19, 0.0  ;;  %v82_v24 = vmul.f32 0.2, %v56_v18  ;;  %v83_v25 = vmul.f32 0.2, %v57_v19 }
   0x9   :  { %v93_v26 = vsel %vm67_vm0, %v54_v13, %v80_v22  ;;  %v94_v27 = vsel %vm68_vm1, %v55_v14, %v81_v23  ;;  %v58_v28 = vadd.f32 %v275_v5, %v38_v15  ;;  %vm72_vm5 = vcmp.ge.f32.partialorder %v59_v29, 0.0 }
   0xa   :  { %v207_v30 = vpack.c.bf16 %v94_v27, %v93_v26  ;;  %v95_v31 = vsel %vm69_vm2, %v56_v18, %v82_v24  ;;  %v96_v32 = vsel %vm70_vm3, %v57_v19, %v83_v25  ;;  %v85_v39 = vmul.f32 0.2, %v59_v29 }
   0xb   :  { %v212_v37 = vpack.c.bf16 %v96_v32, %v95_v31  ;;  %vm71_vm4 = vcmp.ge.f32.partialorder %v58_v28, 0.0  ;;  %v84_v38 = vmul.f32 0.2, %v58_v28  ;;  %vm73_vm6 = vcmp.ge.f32.partialorder %v60_v33, 0.0 }
   0xc   :  { %208 = vst [vmem:[%s358_s3] sm:$0xff] %v207_v30   ;;  %v86_v41 = vmul.f32 0.2, %v60_v33  ;;  %v42_v44 = vmul.f32 %v268_v2, %v22_v34  ;;  %v43_v45 = vmul.f32 %v268_v2, %v23_v35  ;;  %v44_v46 = vmul.f32 %v268_v2, %v24_v36 }
   0xd   :  { %234 = vst [vmem:[%s358_s3 + $0x8] sm:$0xff] %v212_v37   ;;  %v97_v43 = vsel %vm71_vm4, %v58_v28, %v84_v38  ;;  %v98_v48 = vsel %vm72_vm5, %v59_v29, %v85_v39  ;;  %vm74_vm7 = vcmp.ge.f32.partialorder %v61_v40, 0.0  ;;  %v87_v49 = vmul.f32 0.2, %v61_v40 }
   0xe   :  { %v99_v50 = vsel %vm73_vm6, %v60_v33, %v86_v41  ;;  %v217_v51 = vpack.c.bf16 %v98_v48, %v97_v43  ;;  %v62_v52 = vadd.f32 %v275_v5, %v42_v44  ;;  %v63_v53 = vadd.f32 %v275_v5, %v43_v45 }
   0xf   :  { %v45_v54 = vmul.f32 %v268_v2, %v25_v42  ;;  %v100_v55 = vsel %vm74_vm7, %v61_v40, %v87_v49  ;;  %v64_v56 = vadd.f32 %v275_v5, %v44_v46  ;;  %v46_v57 = vmul.f32 %v268_v2, %v26_v47 }
  0x10   :  { %235 = vst [vmem:[%s358_s3 + $0x10] sm:$0xff] %v217_v51   ;;  %v222_v58 = vpack.c.bf16 %v100_v55, %v99_v50  ;;  %vm75_vm8 = vcmp.ge.f32.partialorder %v62_v52, 0.0  ;;  %vm76_vm9 = vcmp.ge.f32.partialorder %v63_v53, 0.0  ;;  %v88_v59 = vmul.f32 0.2, %v62_v52 }
  0x11   :  { %v89_v60 = vmul.f32 0.2, %v63_v53  ;;  %v65_v61 = vadd.f32 %v275_v5, %v45_v54  ;;  %vm77_vm10 = vcmp.ge.f32.partialorder %v64_v56, 0.0  ;;  %v90_v62 = vmul.f32 0.2, %v64_v56 }
  0x12   :  { %236 = vst [vmem:[%s358_s3 + $0x18] sm:$0xff] %v222_v58   ;;  %v101_v63 = vsel %vm75_vm8, %v62_v52, %v88_v59  ;;  %v66_v0 = vadd.f32 %v275_v5, %v46_v57 }
  0x13   :  { %v102_v1 = vsel %vm76_vm9, %v63_v53, %v89_v60  ;;  %vm78_vm11 = vcmp.ge.f32.partialorder %v65_v61, 0.0  ;;  %v91_v2 = vmul.f32 0.2, %v65_v61  ;;  %v103_v3 = vsel %vm77_vm10, %v64_v56, %v90_v62 }
  0x14   :  { %v227_v4 = vpack.c.bf16 %v102_v1, %v101_v63  ;;  %vm79_vm12 = vcmp.ge.f32.partialorder %v66_v0, 0.0  ;;  %v92_v6 = vmul.f32 0.2, %v66_v0 }
  0x15   :  { %v104_v7 = vsel %vm78_vm11, %v65_v61, %v91_v2 }
  0x16   :  { %237 = vst [vmem:[%s358_s3 + $0x20] sm:$0xff] %v227_v4   ;;  %v232_v8 = vpack.c.bf16 %v104_v7, %v103_v3  ;;  %v105_v9 = vsel %vm79_vm12, %v66_v0, %v92_v6 }
  0x17   :  { %v203_v10 = vpack.c.bf16 %v105_v9, %v105_v9 }
  0x18   :  { %238 = vst [vmem:[%s358_s3 + $0x28] sm:$0xff] %v232_v8  }
  0x19   :  { %171 = vst [vmem:[%s358_s3 + $0x30] sm:$0xf] %v203_v10 }

// kernel: nlayer_discriminator.13
= control target key start
LH: loop header
LB: loop body
LE: loop exit
PB: predicated region body
PF: predicated region fallthrough
CT: control target
= control target key end

     0   :  { %s2156_s1 = inlined_call_operand.vmem [shape: bf16[1024,128], index: 1, kind: input, shape index: {}]   ;;  %s2157_s0 = inlined_call_operand.vmem [shape: bf16[104,1024], index: 0, kind: input, shape index: {}]   ;;  %s2158_s2 = inlined_call_operand.vmem [shape: f32[104,128], index: 2, kind: output, shape index: {0}]   ;;  %s2159_s3 = inlined_call_operand.vmem [shape: f32[1,1,128], index: 3, kind: output, shape index: {1}]   ;;  %s2160_s4 = inlined_call_operand.vmem [shape: f32[1,1,128], index: 4, kind: output, shape index: {2}]  }
   0x1   :  { %v1627_v0 = vld [vmem:[%s2156_s1 + $0x40] sm:$0xff]   ;;  %v1631_v4 = vld [vmem:[%s2156_s1 + $0x48] sm:$0xff]   ;;  %v1635_v8 = vld [vmem:[%s2156_s1 + $0x50] sm:$0xff]  }
   0x2   :  { %v1628_v1 = vld [vmem:[%s2156_s1 + $0xc0] sm:$0xff]   ;;  %1395 = vmatprep.subr.bf16.mxu0 %v1627_v0  ;;  %v1632_v5 = vld [vmem:[%s2156_s1 + $0xc8] sm:$0xff]   ;;  %v1636_v9 = vld [vmem:[%s2156_s1 + $0xd0] sm:$0xff]  }
   0x3   :  { %v1629_v2 = vld [vmem:[%s2156_s1] sm:$0xff]   ;;  %1453 = vmatprep.subr.bf16.mxu1 %v1628_v1  ;;  %v1633_v6 = vld [vmem:[%s2156_s1 + $0x8] sm:$0xff]   ;;  %v1637_v10 = vld [vmem:[%s2156_s1 + $0x10] sm:$0xff]  }
   0x4   :  { %v1630_v3 = vld [vmem:[%s2156_s1 + $0x80] sm:$0xff]   ;;  %1396 = vmatpush3.bf16.msra.mxu0 %v1629_v2  ;;  %v1634_v7 = vld [vmem:[%s2156_s1 + $0x88] sm:$0xff]   ;;  %v1638_v11 = vld [vmem:[%s2156_s1 + $0x90] sm:$0xff]  }
   0x5   :  { %1454 = vmatpush3.bf16.msra.mxu1 %v1630_v3  ;;  %1397 = vmatprep.subr.bf16.mxu0 %v1631_v4  ;;  %v1639_v12 = vld [vmem:[%s2156_s1 + $0x58] sm:$0xff]   ;;  %v1643_v16 = vld [vmem:[%s2156_s1 + $0x60] sm:$0xff]   ;;  %v1647_v20 = vld [vmem:[%s2156_s1 + $0x68] sm:$0xff]  }
   0x6   :  { %1455 = vmatprep.subr.bf16.mxu1 %v1632_v5  ;;  %v1640_v13 = vld [vmem:[%s2156_s1 + $0xd8] sm:$0xff]   ;;  %v1644_v17 = vld [vmem:[%s2156_s1 + $0xe0] sm:$0xff]   ;;  %v1648_v21 = vld [vmem:[%s2156_s1 + $0xe8] sm:$0xff]  }
   0x7   :  { %v1641_v14 = vld [vmem:[%s2156_s1 + $0x18] sm:$0xff]   ;;  %v1645_v18 = vld [vmem:[%s2156_s1 + $0x20] sm:$0xff]   ;;  %v1649_v22 = vld [vmem:[%s2156_s1 + $0x28] sm:$0xff]  }
   0x8   :  { %1398 = vmatpush3.bf16.msra.mxu0 %v1633_v6  ;;  %v1642_v15 = vld [vmem:[%s2156_s1 + $0x98] sm:$0xff]   ;;  %v1646_v19 = vld [vmem:[%s2156_s1 + $0xa0] sm:$0xff]   ;;  %v1650_v23 = vld [vmem:[%s2156_s1 + $0xa8] sm:$0xff]  }
   0x9   :  { %1456 = vmatpush3.bf16.msra.mxu1 %v1634_v7  ;;  %1399 = vmatprep.subr.bf16.mxu0 %v1635_v8  ;;  %v1651_v24 = vld [vmem:[%s2156_s1 + $0x70] sm:$0xff]   ;;  %v1655_v28 = vld [vmem:[%s2156_s1 + $0x78] sm:$0xff]   ;;  %v15_v32 = vld [vmem:[%s2157_s0] sm:$0xff] }
   0xa   :  { %1457 = vmatprep.subr.bf16.mxu1 %v1636_v9  ;;  %v1652_v25 = vld [vmem:[%s2156_s1 + $0xf0] sm:$0xff]   ;;  %v1656_v29 = vld [vmem:[%s2156_s1 + $0xf8] sm:$0xff]   ;;  %v19_v33 = vld [vmem:[%s2157_s0 + $0x20] sm:$0xff] }
   0xb   :  { %v1653_v26 = vld [vmem:[%s2156_s1 + $0x30] sm:$0xff]   ;;  %v1657_v30 = vld [vmem:[%s2156_s1 + $0x38] sm:$0xff]   ;;  %v16_v34 = vld [vmem:[%s2157_s0 + $0x8] sm:$0xff]  ;;  %v1275_v35 = vcombine.low %v15_v32, %v19_v33  ;;  %v1276_v36 = vcombine.high %v15_v32, %v19_v33 }
   0xc   :  { %1400 = vmatpush3.bf16.msra.mxu0 %v1637_v10  ;;  %v1654_v27 = vld [vmem:[%s2156_s1 + $0xb0] sm:$0xff]   ;;  %v1658_v31 = vld [vmem:[%s2156_s1 + $0xb8] sm:$0xff]   ;;  %v20_v37 = vld [vmem:[%s2157_s0 + $0x28] sm:$0xff] }
   0xd   :  { %1458 = vmatpush3.bf16.msra.mxu1 %v1638_v11  ;;  %1401 = vmatprep.subr.bf16.mxu0 %v1639_v12  ;;  %v1277_v38 = vcombine.low %v16_v34, %v20_v37  ;;  %v1278_v39 = vcombine.high %v16_v34, %v20_v37  ;;  %v1659_v40 = vld [vmem:[%s2156_s1 + $0x140] sm:$0xff]   ;;  %v24_v47 = vld [vmem:[%s2157_s0 + $0x48] sm:$0xff]  ;;  %v1667_v56 = vld [vmem:[%s2156_s1 + $0x150] sm:$0xff]  }
   0xe   :  { %1459 = vmatprep.subr.bf16.mxu1 %v1640_v13  ;;  %879 = vmatprep.mubr.bf16.mxu0 %v1276_v36  ;;  %v1660_v41 = vld [vmem:[%s2156_s1 + $0x100] sm:$0xff]   ;;  %v28_v48 = vld [vmem:[%s2157_s0 + $0x68] sm:$0xff]  ;;  %v1668_v63 = vld [vmem:[%s2156_s1 + $0x110] sm:$0xff]  }
   0xf   :  { %967 = vmatprep.mubr.bf16.mxu1 %v1278_v39  ;;  %v1661_v42 = vld [vmem:[%s2156_s1 + $0x1c0] sm:$0xff]   ;;  %v1286_v49 = vcombine.high %v24_v47, %v28_v48  ;;  %v1663_v50 = vld [vmem:[%s2156_s1 + $0x148] sm:$0xff]   ;;  %v1285_v53 = vcombine.low %v24_v47, %v28_v48  ;;  %v1669_v0 = vld [vmem:[%s2156_s1 + $0x1d0] sm:$0xff]  }
  0x10   :  { %1402 = vmatpush3.bf16.msra.mxu0 %v1641_v14  ;;  %v1662_v43 = vld [vmem:[%s2156_s1 + $0x180] sm:$0xff]   ;;  %v1664_v52 = vld [vmem:[%s2156_s1 + $0x108] sm:$0xff]   ;;  %v1670_v1 = vld [vmem:[%s2156_s1 + $0x190] sm:$0xff]  }
  0x11   :  { %1460 = vmatpush3.bf16.msra.mxu1 %v1642_v15  ;;  %1403 = vmatprep.subr.bf16.mxu0 %v1643_v16  ;;  %v23_v44 = vld [vmem:[%s2157_s0 + $0x40] sm:$0xff]  ;;  %v1665_v54 = vld [vmem:[%s2156_s1 + $0x1c8] sm:$0xff]   ;;  %v1671_v3 = vld [vmem:[%s2156_s1 + $0x158] sm:$0xff]  }
  0x12   :  { %1461 = vmatprep.subr.bf16.mxu1 %v1644_v17  ;;  %v27_v45 = vld [vmem:[%s2157_s0 + $0x60] sm:$0xff]  ;;  %v1666_v55 = vld [vmem:[%s2156_s1 + $0x188] sm:$0xff]   ;;  %v1672_v5 = vld [vmem:[%s2156_s1 + $0x118] sm:$0xff]  }
  0x13   :  { %v1284_v46 = vcombine.high %v23_v44, %v27_v45  ;;  %v1283_v51 = vcombine.low %v23_v44, %v27_v45  ;;  %v31_v57 = vld [vmem:[%s2157_s0 + $0x80] sm:$0xff]  ;;  %v32_v59 = vld [vmem:[%s2157_s0 + $0x88] sm:$0xff]  ;;  %v1673_v12 = vld [vmem:[%s2156_s1 + $0x1d8] sm:$0xff]  }
  0x14   :  { %1404 = vmatpush3.bf16.msra.mxu0 %v1645_v18  ;;  %v35_v58 = vld [vmem:[%s2157_s0 + $0xa0] sm:$0xff]  ;;  %v36_v60 = vld [vmem:[%s2157_s0 + $0xa8] sm:$0xff]  ;;  %v1674_v13 = vld [vmem:[%s2156_s1 + $0x198] sm:$0xff]  }
  0x15   :  { %1462 = vmatpush3.bf16.msra.mxu1 %v1646_v19  ;;  %1405 = vmatprep.subr.bf16.mxu0 %v1647_v20  ;;  %v1292_v61 = vcombine.high %v31_v57, %v35_v58  ;;  %v1294_v62 = vcombine.high %v32_v59, %v36_v60  ;;  %v1291_v2 = vcombine.low %v31_v57, %v35_v58  ;;  %v39_v6 = vld [vmem:[%s2157_s0 + $0xc0] sm:$0xff]  ;;  %v40_v8 = vld [vmem:[%s2157_s0 + $0xc8] sm:$0xff]  ;;  %v1691_v44 = vld [vmem:[%s2156_s1 + $0x178] sm:$0xff]  }
  0x16   :  { %1463 = vmatprep.subr.bf16.mxu1 %v1648_v21  ;;  %v1293_v4 = vcombine.low %v32_v59, %v36_v60  ;;  %v43_v7 = vld [vmem:[%s2157_s0 + $0xe0] sm:$0xff]  ;;  %v44_v10 = vld [vmem:[%s2157_s0 + $0xe8] sm:$0xff]  ;;  %v1692_v45 = vld [vmem:[%s2156_s1 + $0x138] sm:$0xff]  }
  0x17   :  { %v1300_v9 = vcombine.high %v39_v6, %v43_v7  ;;  %v1302_v11 = vcombine.high %v40_v8, %v44_v10  ;;  %v1675_v14 = vld [vmem:[%s2156_s1 + $0x160] sm:$0xff]   ;;  %v1299_v16 = vcombine.low %v39_v6, %v43_v7  ;;  %v1301_v20 = vcombine.low %v40_v8, %v44_v10  ;;  %v56_v32 = vld [vmem:[%s2157_s0 + $0x148] sm:$0xff]  ;;  %v1694_v48 = vld [vmem:[%s2156_s1 + $0x1b8] sm:$0xff]  }
  0x18   :  { %1406 = vmatpush3.bf16.msra.mxu0 %v1649_v22  ;;  %v1676_v15 = vld [vmem:[%s2156_s1 + $0x120] sm:$0xff]   ;;  %v48_v22 = vld [vmem:[%s2157_s0 + $0x108] sm:$0xff]  ;;  %v25_v60 = vld [vmem:[%s2157_s0 + $0x50] sm:$0xff] }
  0x19   :  { %1464 = vmatpush3.bf16.msra.mxu1 %v1650_v23  ;;  %1407 = vmatprep.subr.bf16.mxu0 %v1651_v24  ;;  %v1677_v17 = vld [vmem:[%s2156_s1 + $0x1e0] sm:$0xff]   ;;  %v52_v23 = vld [vmem:[%s2157_s0 + $0x128] sm:$0xff]  ;;  %v34_v6 = vld [vmem:[%s2157_s0 + $0x98] sm:$0xff] }
  0x1a   :  { %1465 = vmatprep.subr.bf16.mxu1 %v1652_v25  ;;  %v47_v18 = vld [vmem:[%s2157_s0 + $0x100] sm:$0xff]  ;;  %v1310_v24 = vcombine.high %v48_v22, %v52_v23  ;;  %v60_v33 = vld [vmem:[%s2157_s0 + $0x168] sm:$0xff]  ;;  %v1309_v36 = vcombine.low %v48_v22, %v52_v23  ;;  %v38_v7 = vld [vmem:[%s2157_s0 + $0xb8] sm:$0xff] }
  0x1b   :  { %v51_v19 = vld [vmem:[%s2157_s0 + $0x120] sm:$0xff]  ;;  %v1318_v39 = vcombine.high %v56_v32, %v60_v33  ;;  %v50_v22 = vld [vmem:[%s2157_s0 + $0x118] sm:$0xff] }
  0x1c   :  { %1408 = vmatpush3.bf16.msra.mxu0 %v1653_v26  ;;  %v1308_v21 = vcombine.high %v47_v18, %v51_v19  ;;  %v1678_v25 = vld [vmem:[%s2156_s1 + $0x1a0] sm:$0xff]   ;;  %v1679_v26 = vld [vmem:[%s2156_s1 + $0x168] sm:$0xff]   ;;  %v1307_v34 = vcombine.low %v47_v18, %v51_v19  ;;  %v54_v23 = vld [vmem:[%s2157_s0 + $0x138] sm:$0xff] }
  0x1d   :  { %1466 = vmatpush3.bf16.msra.mxu1 %v1654_v27  ;;  %1409 = vmatprep.subr.bf16.mxu0 %v1655_v28  ;;  %v1680_v27 = vld [vmem:[%s2156_s1 + $0x128] sm:$0xff]  }
  0x1e   :  { %1467 = vmatprep.subr.bf16.mxu1 %v1656_v29  ;;  %v1681_v28 = vld [vmem:[%s2156_s1 + $0x1e8] sm:$0xff]  }
  0x1f   :  { %v1682_v29 = vld [vmem:[%s2156_s1 + $0x1a8] sm:$0xff]  }
  0x20   :  { %1410 = vmatpush3.bf16.msra.mxu0 %v1657_v30  ;;  %v55_v30 = vld [vmem:[%s2157_s0 + $0x140] sm:$0xff] }
  0x21   :  { %1468 = vmatpush3.bf16.msra.mxu1 %v1658_v31  ;;  %1511 = vmatprep.subr.bf16.mxu0 %v1659_v40  ;;  %v59_v31 = vld [vmem:[%s2157_s0 + $0x160] sm:$0xff]  ;;  %v1685_v40 = vld [vmem:[%s2156_s1 + $0x1f0] sm:$0xff]  }
  0x22   :  { %1569 = vmatprep.subr.bf16.mxu1 %v1661_v42  ;;  %v1316_v37 = vcombine.high %v55_v30, %v59_v31  ;;  %v63_v42 = vld [vmem:[%s2157_s0 + $0x180] sm:$0xff]  ;;  %v1315_v47 = vcombine.low %v55_v30, %v59_v31  ;;  %v58_v30 = vld [vmem:[%s2157_s0 + $0x158] sm:$0xff] }
  0x23   :  { %880 = vmatmul.mubr.bf16.vlgmr.msra.gmra.mrb[0].mxu0 %v1275_v35  ;;  %v1683_v35 = vld [vmem:[%s2156_s1 + $0x170] sm:$0xff]   ;;  %v62_v31 = vld [vmem:[%s2157_s0 + $0x178] sm:$0xff] }
  0x24   :  { %968 = vmatmul.mubr.bf16.vlgmr.msra.gmra.mrb[0].mxu1 %v1277_v38  ;;  %1512 = vmatpush3.bf16.msra.mxu0 %v1660_v41  ;;  %v1684_v38 = vld [vmem:[%s2156_s1 + $0x130] sm:$0xff]  }
  0x25   :  { %1570 = vmatpush3.bf16.msra.mxu1 %v1662_v43  ;;  %887 = vmatprep.mubr.bf16.mxu0 %v1284_v46  ;;  %v1686_v41 = vld [vmem:[%s2156_s1 + $0x1b0] sm:$0xff]   ;;  %v64_v43 = vld [vmem:[%s2157_s0 + $0x188] sm:$0xff]  ;;  %v1693_v46 = vld [vmem:[%s2156_s1 + $0x1f8] sm:$0xff]  }
  0x26   :  { %975 = vmatprep.mubr.bf16.mxu1 %v1286_v49  ;;  %1513 = vmatprep.subr.bf16.mxu0 %v1663_v50  ;;  %v1317_v49 = vcombine.low %v56_v32, %v60_v33  ;;  %v1324_v50 = vcombine.high %v63_v42, %v63_v42  ;;  %v1325_v57 = vcombine.low %v64_v43, %v64_v43 }
  0x27   :  { %1571 = vmatprep.subr.bf16.mxu1 %v1665_v54  ;;  %v18_v54 = vld [vmem:[%s2157_s0 + $0x18] sm:$0xff]  ;;  %v1313_v33 = vcombine.low %v50_v22, %v54_v23 }
  0x28   :  { %1514 = vmatpush3.bf16.msra.mxu0 %v1664_v52  ;;  %v17_v52 = vld [vmem:[%s2157_s0 + $0x10] sm:$0xff] }
  0x29   :  { %1572 = vmatpush3.bf16.msra.mxu1 %v1666_v55  ;;  %1515 = vmatprep.subr.bf16.mxu0 %v1667_v56  ;;  %v22_v55 = vld [vmem:[%s2157_s0 + $0x38] sm:$0xff]  ;;  %v1323_v56 = vcombine.low %v63_v42, %v63_v42 }
  0x2a   :  { %1573 = vmatprep.subr.bf16.mxu1 %v1669_v0  ;;  %v1282_v59 = vcombine.high %v18_v54, %v22_v55 }
  0x2b   :  { %888 = vmatmul.mubr.bf16.gmra.mrb[4].mxu0 %v1283_v51  ;;  %v1326_v51 = vcombine.high %v64_v43, %v64_v43 }
  0x2c   :  { %976 = vmatmul.mubr.bf16.gmra.mrb[4].mxu1 %v1285_v53  ;;  %895 = vmatprep.mubr.bf16.mxu0 %v1292_v61  ;;  %v21_v53 = vld [vmem:[%s2157_s0 + $0x30] sm:$0xff] }
  0x2d   :  { %983 = vmatprep.mubr.bf16.mxu1 %v1294_v62  ;;  %1516 = vmatpush3.bf16.msra.mxu0 %v1668_v63  ;;  %v1280_v58 = vcombine.high %v17_v52, %v21_v53  ;;  %v29_v61 = vld [vmem:[%s2157_s0 + $0x70] sm:$0xff]  ;;  %v26_v62 = vld [vmem:[%s2157_s0 + $0x58] sm:$0xff]  ;;  %v1279_v0 = vcombine.low %v17_v52, %v21_v53 }
  0x2e   :  { %1574 = vmatpush3.bf16.msra.mxu1 %v1670_v1  ;;  %1517 = vmatprep.subr.bf16.mxu0 %v1671_v3  ;;  %v30_v63 = vld [vmem:[%s2157_s0 + $0x78] sm:$0xff]  ;;  %v1281_v1 = vcombine.low %v18_v54, %v22_v55  ;;  %v1287_v8 = vcombine.low %v25_v60, %v29_v61 }
  0x2f   :  { %1575 = vmatprep.subr.bf16.mxu1 %v1673_v12  ;;  %v1290_v3 = vcombine.high %v26_v62, %v30_v63  ;;  %v41_v12 = vld [vmem:[%s2157_s0 + $0xd0] sm:$0xff] }
  0x31   :  { %1518 = vmatpush3.bf16.msra.mxu0 %v1672_v5  ;;  %v37_v5 = vld [vmem:[%s2157_s0 + $0xb0] sm:$0xff] }
  0x32   :  { %1576 = vmatpush3.bf16.msra.mxu1 %v1674_v13  ;;  %1519 = vmatprep.subr.bf16.mxu0 %v1675_v14  ;;  %v45_v13 = vld [vmem:[%s2157_s0 + $0xf0] sm:$0xff]  ;;  %v42_v14 = vld [vmem:[%s2157_s0 + $0xd8] sm:$0xff] }
  0x33   :  { %896 = vmatmul.mubr.bf16.gmra.mrb[8].mxu0 %v1291_v2  ;;  %1577 = vmatprep.subr.bf16.mxu1 %v1677_v17  ;;  %v1288_v2 = vcombine.high %v25_v60, %v29_v61  ;;  %v1297_v17 = vcombine.low %v34_v6, %v38_v7  ;;  %v1304_v18 = vcombine.high %v41_v12, %v45_v13 }
  0x34   :  { %984 = vmatmul.mubr.bf16.gmra.mrb[8].mxu1 %v1293_v4  ;;  %903 = vmatprep.mubr.bf16.mxu0 %v1300_v9  ;;  %v33_v4 = vld [vmem:[%s2157_s0 + $0x90] sm:$0xff]  ;;  %v1289_v9 = vcombine.low %v26_v62, %v30_v63 }
  0x35   :  { %991 = vmatprep.mubr.bf16.mxu1 %v1302_v11  ;;  %1520 = vmatpush3.bf16.msra.mxu0 %v1676_v15  ;;  %v1296_v10 = vcombine.high %v33_v4, %v37_v5  ;;  %v1298_v11 = vcombine.high %v34_v6, %v38_v7  ;;  %v46_v15 = vld [vmem:[%s2157_s0 + $0xf8] sm:$0xff] }
  0x36   :  { %1578 = vmatpush3.bf16.msra.mxu1 %v1678_v25  ;;  %1521 = vmatprep.subr.bf16.mxu0 %v1679_v26  ;;  %v1306_v19 = vcombine.high %v42_v14, %v46_v15  ;;  %v1305_v25 = vcombine.low %v42_v14, %v46_v15 }
  0x37   :  { %1579 = vmatprep.subr.bf16.mxu1 %v1681_v28  ;;  %v57_v28 = vld [vmem:[%s2157_s0 + $0x150] sm:$0xff] }
  0x39   :  { %1522 = vmatpush3.bf16.msra.mxu0 %v1680_v27  ;;  %v1314_v27 = vcombine.high %v50_v22, %v54_v23 }
  0x3a   :  { %1580 = vmatpush3.bf16.msra.mxu1 %v1682_v29  ;;  %1523 = vmatprep.subr.bf16.mxu0 %v1683_v35  ;;  %v61_v29 = vld [vmem:[%s2157_s0 + $0x170] sm:$0xff]  ;;  %v1322_v35 = vcombine.high %v58_v30, %v62_v31 }
  0x3b   :  { %904 = vmatmul.mubr.bf16.gmra.mrb[12].mxu0 %v1299_v16  ;;  %1581 = vmatprep.subr.bf16.mxu1 %v1685_v40  ;;  %v1295_v16 = vcombine.low %v33_v4, %v37_v5 }
  0x3c   :  { %992 = vmatmul.mubr.bf16.gmra.mrb[12].mxu1 %v1301_v20  ;;  %911 = vmatprep.mubr.bf16.mxu0 %v1308_v21  ;;  %v49_v20 = vld [vmem:[%s2157_s0 + $0x110] sm:$0xff] }
  0x3d   :  { %999 = vmatprep.mubr.bf16.mxu1 %v1310_v24  ;;  %1524 = vmatpush3.bf16.msra.mxu0 %v1684_v38  ;;  %v53_v21 = vld [vmem:[%s2157_s0 + $0x130] sm:$0xff]  ;;  %v1303_v24 = vcombine.low %v41_v12, %v45_v13  ;;  %v1319_v38 = vcombine.low %v57_v28, %v61_v29 }
  0x3e   :  { %1582 = vmatpush3.bf16.msra.mxu1 %v1686_v41  ;;  %1525 = vmatprep.subr.bf16.mxu0 %v1691_v44  ;;  %v1312_v26 = vcombine.high %v49_v20, %v53_v21  ;;  %v1311_v32 = vcombine.low %v49_v20, %v53_v21 }
  0x3f   :  { %1583 = vmatprep.subr.bf16.mxu1 %v1693_v46 }
  0x41   :  { %1526 = vmatpush3.bf16.msra.mxu0 %v1692_v45 }
  0x42   :  { %1584 = vmatpush3.bf16.msra.mxu1 %v1694_v48 }
  0x43   :  { %912 = vmatmul.mubr.bf16.gmra.mrb[16].mxu0 %v1307_v34  ;;  %v1320_v34 = vcombine.high %v57_v28, %v61_v29 }
  0x44   :  { %1000 = vmatmul.mubr.bf16.gmra.mrb[16].mxu1 %v1309_v36  ;;  %919 = vmatprep.mubr.bf16.mxu0 %v1316_v37  ;;  %v65_v36 = vld [vmem:[%s2157_s0 + $0x190] sm:$0xff]  ;;  %v66_v37 = vld [vmem:[%s2157_s0 + $0x198] sm:$0xff] }
  0x45   :  { %1007 = vmatprep.mubr.bf16.mxu1 %v1318_v39  ;;  %v1321_v39 = vcombine.low %v58_v30, %v62_v31  ;;  %v1328_v40 = vcombine.high %v65_v36, %v65_v36  ;;  %v1330_v41 = vcombine.high %v66_v37, %v66_v37  ;;  %v1327_v42 = vcombine.low %v65_v36, %v65_v36 }
  0x46   :  { %v1329_v43 = vcombine.low %v66_v37, %v66_v37 }
  0x4b   :  { %920 = vmatmul.mubr.bf16.gmra.mrb[20].mxu0 %v1315_v47 }
  0x4c   :  { %1008 = vmatmul.mubr.bf16.gmra.mrb[20].mxu1 %v1317_v49  ;;  %927 = vmatprep.mubr.bf16.mxu0 %v1324_v50 }
  0x4d   :  { %1015 = vmatprep.mubr.bf16.mxu1 %v1326_v51 }
  0x53   :  { %928 = vmatmul.mubr.bf16.gmra.mrb[24].mxu0 %v1323_v56 }
  0x54   :  { %1016 = vmatmul.mubr.bf16.gmra.mrb[24].mxu1 %v1325_v57  ;;  %1055 = vmatprep.mubr.bf16.mxu0 %v1280_v58 }
  0x55   :  { %1143 = vmatprep.mubr.bf16.mxu1 %v1282_v59 }
  0x5b   :  { %1056 = vmatmul.mubr.bf16.vlgmr.msra.gmra.mrb[28].mxu0 %v1279_v0 }
  0x5c   :  { %1144 = vmatmul.mubr.bf16.vlgmr.msra.gmra.mrb[28].mxu1 %v1281_v1  ;;  %1063 = vmatprep.mubr.bf16.mxu0 %v1288_v2 }
  0x5d   :  { %1151 = vmatprep.mubr.bf16.mxu1 %v1290_v3 }
  0x63   :  { %1064 = vmatmul.mubr.bf16.gmra.mrb[32].mxu0 %v1287_v8 }
  0x64   :  { %1152 = vmatmul.mubr.bf16.gmra.mrb[32].mxu1 %v1289_v9  ;;  %1071 = vmatprep.mubr.bf16.mxu0 %v1296_v10 }
  0x65   :  { %1159 = vmatprep.mubr.bf16.mxu1 %v1298_v11 }
  0x6b   :  { %1072 = vmatmul.mubr.bf16.gmra.mrb[36].mxu0 %v1295_v16 }
  0x6c   :  { %1160 = vmatmul.mubr.bf16.gmra.mrb[36].mxu1 %v1297_v17  ;;  %1079 = vmatprep.mubr.bf16.mxu0 %v1304_v18 }
  0x6d   :  { %1167 = vmatprep.mubr.bf16.mxu1 %v1306_v19 }
  0x73   :  { %1080 = vmatmul.mubr.bf16.gmra.mrb[40].mxu0 %v1303_v24 }
  0x74   :  { %1168 = vmatmul.mubr.bf16.gmra.mrb[40].mxu1 %v1305_v25  ;;  %1087 = vmatprep.mubr.bf16.mxu0 %v1312_v26 }
  0x75   :  { %1175 = vmatprep.mubr.bf16.mxu1 %v1314_v27 }
  0x7b   :  { %1088 = vmatmul.mubr.bf16.gmra.mrb[44].mxu0 %v1311_v32 }
  0x7c   :  { %1176 = vmatmul.mubr.bf16.gmra.mrb[44].mxu1 %v1313_v33  ;;  %1095 = vmatprep.mubr.bf16.mxu0 %v1320_v34 }
  0x7d   :  { %1183 = vmatprep.mubr.bf16.mxu1 %v1322_v35 }
  0x83   :  { %1096 = vmatmul.mubr.bf16.gmra.mrb[48].mxu0 %v1319_v38 }
  0x84   :  { %1184 = vmatmul.mubr.bf16.gmra.mrb[48].mxu1 %v1321_v39  ;;  %1103 = vmatprep.mubr.bf16.mxu0 %v1328_v40 }
  0x85   :  { %1191 = vmatprep.mubr.bf16.mxu1 %v1330_v41 }
  0x8b   :  { %1104 = vmatmul.mubr.bf16.gmra.mrb[52].mxu0 %v1327_v42 }
  0x8c   :  { %1192 = vmatmul.mubr.bf16.gmra.mrb[52].mxu1 %v1329_v43 }
  0xf6   :  { %v1411_v44 = vpop.f32.mrb[0].mxu0 }
  0xf7   :  { %v1469_v45 = vpop.f32.mrb[0].mxu1  ;;  %v1412_v46 = vpop.f32.mrb[1].mxu0 }
  0xf8   :  { %v1413_v47 = vadd.f32 %v1412_v46, %v1411_v44  ;;  %v1470_v48 = vpop.f32.mrb[1].mxu1  ;;  %v1414_v49 = vpop.f32.mrb[2].mxu0 }
  0xf9   :  { %v1471_v50 = vadd.f32 %v1470_v48, %v1469_v45  ;;  %v1472_v51 = vpop.f32.mrb[2].mxu1  ;;  %v1415_v52 = vpop.f32.mrb[3].mxu0 }
  0xfa   :  { %v1416_v53 = vadd.f32 %v1415_v52, %v1414_v49  ;;  %v1473_v54 = vpop.f32.mrb[3].mxu1 }
  0xfb   :  { %v2072_v55 = vadd.f32 %v1471_v50, %v1413_v47  ;;  %v1474_v56 = vadd.f32 %v1473_v54, %v1472_v51 }
  0xfd   :  { %v2074_v57 = vadd.f32 %v1474_v56, %v1416_v53 }
  0xfe   :  { %v1417_v58 = vpop.f32.mrb[4].mxu0 }
  0xff   :  { %v1475_v59 = vpop.f32.mrb[4].mxu1  ;;  %v1418_v60 = vpop.f32.mrb[5].mxu0 }
 0x100   :  { %v1419_v61 = vadd.f32 %v1418_v60, %v1417_v58  ;;  %v1476_v62 = vpop.f32.mrb[5].mxu1  ;;  %v1420_v63 = vpop.f32.mrb[6].mxu0 }
 0x101   :  { %v1477_v0 = vadd.f32 %v1476_v62, %v1475_v59  ;;  %v1478_v1 = vpop.f32.mrb[6].mxu1  ;;  %v1421_v2 = vpop.f32.mrb[7].mxu0 }
 0x102   :  { %v1422_v3 = vadd.f32 %v1421_v2, %v1420_v63  ;;  %v1479_v4 = vpop.f32.mrb[7].mxu1 }
 0x103   :  { %v2076_v5 = vadd.f32 %v1477_v0, %v1419_v61  ;;  %v1480_v6 = vadd.f32 %v1479_v4, %v1478_v1 }
 0x105   :  { %v2078_v7 = vadd.f32 %v1480_v6, %v1422_v3 }
 0x106   :  { %v1423_v8 = vpop.f32.mrb[8].mxu0 }
 0x107   :  { %v1481_v9 = vpop.f32.mrb[8].mxu1  ;;  %v1424_v10 = vpop.f32.mrb[9].mxu0 }
 0x108   :  { %v1425_v11 = vadd.f32 %v1424_v10, %v1423_v8  ;;  %v1482_v12 = vpop.f32.mrb[9].mxu1  ;;  %v1426_v13 = vpop.f32.mrb[10].mxu0 }
 0x109   :  { %v1483_v14 = vadd.f32 %v1482_v12, %v1481_v9  ;;  %v1484_v15 = vpop.f32.mrb[10].mxu1  ;;  %v1427_v16 = vpop.f32.mrb[11].mxu0 }
 0x10a   :  { %v1428_v17 = vadd.f32 %v1427_v16, %v1426_v13  ;;  %v1485_v18 = vpop.f32.mrb[11].mxu1 }
 0x10b   :  { %v2080_v19 = vadd.f32 %v1483_v14, %v1425_v11  ;;  %v1486_v20 = vadd.f32 %v1485_v18, %v1484_v15 }
 0x10d   :  { %v2082_v21 = vadd.f32 %v1486_v20, %v1428_v17 }
 0x10e   :  { %v1429_v22 = vpop.f32.mrb[12].mxu0 }
 0x10f   :  { %v1487_v23 = vpop.f32.mrb[12].mxu1  ;;  %v1430_v24 = vpop.f32.mrb[13].mxu0 }
 0x110   :  { %v1431_v25 = vadd.f32 %v1430_v24, %v1429_v22  ;;  %v1488_v26 = vpop.f32.mrb[13].mxu1  ;;  %v1432_v27 = vpop.f32.mrb[14].mxu0 }
 0x111   :  { %v1489_v28 = vadd.f32 %v1488_v26, %v1487_v23  ;;  %v1490_v29 = vpop.f32.mrb[14].mxu1  ;;  %v1433_v30 = vpop.f32.mrb[15].mxu0 }
 0x112   :  { %v1434_v31 = vadd.f32 %v1433_v30, %v1432_v27  ;;  %v1491_v32 = vpop.f32.mrb[15].mxu1 }
 0x113   :  { %v2084_v33 = vadd.f32 %v1489_v28, %v1431_v25  ;;  %v1492_v34 = vadd.f32 %v1491_v32, %v1490_v29 }
 0x115   :  { %v2086_v35 = vadd.f32 %v1492_v34, %v1434_v31 }
 0x116   :  { %v1435_v36 = vpop.f32.mrb[16].mxu0 }
 0x117   :  { %v1493_v37 = vpop.f32.mrb[16].mxu1  ;;  %v1436_v38 = vpop.f32.mrb[17].mxu0 }
 0x118   :  { %v1437_v39 = vadd.f32 %v1436_v38, %v1435_v36  ;;  %v1494_v40 = vpop.f32.mrb[17].mxu1  ;;  %v1438_v41 = vpop.f32.mrb[18].mxu0 }
 0x119   :  { %v1495_v42 = vadd.f32 %v1494_v40, %v1493_v37  ;;  %v1496_v43 = vpop.f32.mrb[18].mxu1  ;;  %v1439_v44 = vpop.f32.mrb[19].mxu0 }
 0x11a   :  { %v1440_v45 = vadd.f32 %v1439_v44, %v1438_v41  ;;  %v1497_v46 = vpop.f32.mrb[19].mxu1 }
 0x11b   :  { %v2088_v47 = vadd.f32 %v1495_v42, %v1437_v39  ;;  %v1498_v48 = vadd.f32 %v1497_v46, %v1496_v43 }
 0x11d   :  { %v2090_v49 = vadd.f32 %v1498_v48, %v1440_v45 }
 0x11e   :  { %v1441_v50 = vpop.f32.mrb[20].mxu0 }
 0x11f   :  { %v1499_v51 = vpop.f32.mrb[20].mxu1  ;;  %v1442_v52 = vpop.f32.mrb[21].mxu0 }
 0x120   :  { %v1443_v53 = vadd.f32 %v1442_v52, %v1441_v50  ;;  %v1500_v54 = vpop.f32.mrb[21].mxu1  ;;  %v1444_v56 = vpop.f32.mrb[22].mxu0 }
 0x121   :  { %v1501_v58 = vadd.f32 %v1500_v54, %v1499_v51  ;;  %v1502_v59 = vpop.f32.mrb[22].mxu1  ;;  %v1445_v60 = vpop.f32.mrb[23].mxu0 }
 0x122   :  { %v1446_v61 = vadd.f32 %v1445_v60, %v1444_v56  ;;  %v1503_v62 = vpop.f32.mrb[23].mxu1 }
 0x123   :  { %v2092_v63 = vadd.f32 %v1501_v58, %v1443_v53  ;;  %v1504_v0 = vadd.f32 %v1503_v62, %v1502_v59 }
 0x125   :  { %v2094_v1 = vadd.f32 %v1504_v0, %v1446_v61 }
 0x126   :  { %v1447_v2 = vpop.f32.mrb[24].mxu0 }
 0x127   :  { %v1505_v3 = vpop.f32.mrb[24].mxu1  ;;  %v1448_v4 = vpop.f32.mrb[25].mxu0 }
 0x128   :  { %v1449_v6 = vadd.f32 %v1448_v4, %v1447_v2  ;;  %v1506_v8 = vpop.f32.mrb[25].mxu1  ;;  %v1450_v9 = vpop.f32.mrb[26].mxu0 }
 0x129   :  { %v1507_v10 = vadd.f32 %v1506_v8, %v1505_v3  ;;  %v1508_v11 = vpop.f32.mrb[26].mxu1  ;;  %v1451_v12 = vpop.f32.mrb[27].mxu0 }
 0x12a   :  { %v1509_v13 = vpop.f32.mrb[27].mxu1 }
 0x12b   :  { %v2096_v14 = vadd.f32 %v1507_v10, %v1449_v6 }
 0x12e   :  { %v1527_v15 = vpop.f32.mrb[28].mxu0 }
 0x12f   :  { %v1585_v16 = vpop.f32.mrb[28].mxu1  ;;  %v1528_v17 = vpop.f32.mrb[29].mxu0 }
 0x130   :  { %v1529_v18 = vadd.f32 %v1528_v17, %v1527_v15  ;;  %v1586_v20 = vpop.f32.mrb[29].mxu1  ;;  %v1530_v22 = vpop.f32.mrb[30].mxu0 }
 0x131   :  { %v1587_v23 = vadd.f32 %v1586_v20, %v1585_v16  ;;  %v1588_v24 = vpop.f32.mrb[30].mxu1  ;;  %v1531_v25 = vpop.f32.mrb[31].mxu0 }
 0x132   :  { %v1058_v26 = vadd.f32 %v1529_v18, %v2072_v55  ;;  %v1532_v27 = vadd.f32 %v1531_v25, %v1530_v22  ;;  %v1589_v28 = vpop.f32.mrb[31].mxu1 }
 0x133   :  { %v1590_v29 = vadd.f32 %v1589_v28, %v1588_v24 }
 0x134   :  { %v1146_v30 = vadd.f32 %v1587_v23, %v1058_v26  ;;  %v1061_v31 = vadd.f32 %v1532_v27, %v2074_v57 }
 0x136   :  { %1199 = vst [vmem:[%s2158_s2] sm:$0xff] %v1146_v30  ;;  %v1149_v32 = vadd.f32 %v1590_v29, %v1061_v31  ;;  %v1533_v34 = vpop.f32.mrb[32].mxu0  ;;  %v1231_v38 = vmul.f32 %v1146_v30, %v1146_v30 }
 0x137   :  { %v1591_v36 = vpop.f32.mrb[32].mxu1  ;;  %v1534_v37 = vpop.f32.mrb[33].mxu0 }
 0x138   :  { %1200 = vst [vmem:[%s2158_s2 + $0x8] sm:$0xff] %v1149_v32  ;;  %v1212_v55 = vadd.f32 %v1149_v32, %v1146_v30  ;;  %v1232_v39 = vmul.f32 %v1149_v32, %v1149_v32  ;;  %v1535_v40 = vadd.f32 %v1534_v37, %v1533_v34  ;;  %v1592_v41 = vpop.f32.mrb[33].mxu1  ;;  %v1536_v42 = vpop.f32.mrb[34].mxu0 }
 0x139   :  { %v1593_v43 = vadd.f32 %v1592_v41, %v1591_v36  ;;  %v1594_v57 = vpop.f32.mrb[34].mxu1  ;;  %v1537_v44 = vpop.f32.mrb[35].mxu0 }
 0x13a   :  { %v1244_v45 = vadd.f32 %v1232_v39, %v1231_v38  ;;  %v1066_v46 = vadd.f32 %v1535_v40, %v2076_v5  ;;  %v1538_v48 = vadd.f32 %v1537_v44, %v1536_v42  ;;  %v1595_v50 = vpop.f32.mrb[35].mxu1 }
 0x13b   :  { %v1596_v51 = vadd.f32 %v1595_v50, %v1594_v57 }
 0x13c   :  { %v1154_v52 = vadd.f32 %v1593_v43, %v1066_v46  ;;  %v1069_v53 = vadd.f32 %v1538_v48, %v2078_v7 }
 0x13e   :  { %1201 = vst [vmem:[%s2158_s2 + $0x10] sm:$0xff] %v1154_v52  ;;  %v1213_v54 = vadd.f32 %v1212_v55, %v1154_v52  ;;  %v1233_v56 = vmul.f32 %v1154_v52, %v1154_v52  ;;  %v1157_v58 = vadd.f32 %v1596_v51, %v1069_v53  ;;  %v1539_v59 = vpop.f32.mrb[36].mxu0 }
 0x13f   :  { %v1597_v60 = vpop.f32.mrb[36].mxu1  ;;  %v1540_v61 = vpop.f32.mrb[37].mxu0 }
 0x140   :  { %v1245_v62 = vadd.f32 %v1244_v45, %v1233_v56  ;;  %1202 = vst [vmem:[%s2158_s2 + $0x18] sm:$0xff] %v1157_v58  ;;  %v1214_v5 = vadd.f32 %v1213_v54, %v1157_v58  ;;  %v1234_v0 = vmul.f32 %v1157_v58, %v1157_v58  ;;  %v1541_v2 = vadd.f32 %v1540_v61, %v1539_v59  ;;  %v1598_v3 = vpop.f32.mrb[37].mxu1  ;;  %v1542_v7 = vpop.f32.mrb[38].mxu0 }
 0x141   :  { %v1599_v4 = vadd.f32 %v1598_v3, %v1597_v60  ;;  %v1600_v6 = vpop.f32.mrb[38].mxu1  ;;  %v1543_v8 = vpop.f32.mrb[39].mxu0 }
 0x142   :  { %v1246_v9 = vadd.f32 %v1245_v62, %v1234_v0  ;;  %v1074_v10 = vadd.f32 %v1541_v2, %v2080_v19  ;;  %v1544_v11 = vadd.f32 %v1543_v8, %v1542_v7  ;;  %v1601_v12 = vpop.f32.mrb[39].mxu1 }
 0x143   :  { %v1602_v13 = vadd.f32 %v1601_v12, %v1600_v6 }
 0x144   :  { %v1162_v15 = vadd.f32 %v1599_v4, %v1074_v10  ;;  %v1077_v16 = vadd.f32 %v1544_v11, %v2082_v21 }
 0x146   :  { %1203 = vst [vmem:[%s2158_s2 + $0x20] sm:$0xff] %v1162_v15  ;;  %v1215_v17 = vadd.f32 %v1214_v5, %v1162_v15  ;;  %v1235_v18 = vmul.f32 %v1162_v15, %v1162_v15  ;;  %v1165_v20 = vadd.f32 %v1602_v13, %v1077_v16  ;;  %v1545_v22 = vpop.f32.mrb[40].mxu0 }
 0x147   :  { %v1603_v23 = vpop.f32.mrb[40].mxu1  ;;  %v1546_v24 = vpop.f32.mrb[41].mxu0 }
 0x148   :  { %v1247_v25 = vadd.f32 %v1246_v9, %v1235_v18  ;;  %1204 = vst [vmem:[%s2158_s2 + $0x28] sm:$0xff] %v1165_v20  ;;  %v1216_v19 = vadd.f32 %v1215_v17, %v1165_v20  ;;  %v1236_v26 = vmul.f32 %v1165_v20, %v1165_v20  ;;  %v1547_v27 = vadd.f32 %v1546_v24, %v1545_v22  ;;  %v1604_v28 = vpop.f32.mrb[41].mxu1  ;;  %v1548_v21 = vpop.f32.mrb[42].mxu0 }
 0x149   :  { %v1605_v29 = vadd.f32 %v1604_v28, %v1603_v23  ;;  %v1606_v30 = vpop.f32.mrb[42].mxu1  ;;  %v1549_v31 = vpop.f32.mrb[43].mxu0 }
 0x14a   :  { %v1248_v32 = vadd.f32 %v1247_v25, %v1236_v26  ;;  %v1082_v34 = vadd.f32 %v1547_v27, %v2084_v33  ;;  %v1550_v36 = vadd.f32 %v1549_v31, %v1548_v21  ;;  %v1607_v37 = vpop.f32.mrb[43].mxu1 }
 0x14b   :  { %v1608_v38 = vadd.f32 %v1607_v37, %v1606_v30 }
 0x14c   :  { %v1170_v55 = vadd.f32 %v1605_v29, %v1082_v34  ;;  %v1085_v39 = vadd.f32 %v1550_v36, %v2086_v35 }
 0x14e   :  { %1205 = vst [vmem:[%s2158_s2 + $0x30] sm:$0xff] %v1170_v55  ;;  %v1217_v40 = vadd.f32 %v1216_v19, %v1170_v55  ;;  %v1237_v41 = vmul.f32 %v1170_v55, %v1170_v55  ;;  %v1173_v42 = vadd.f32 %v1608_v38, %v1085_v39  ;;  %v1551_v43 = vpop.f32.mrb[44].mxu0 }
 0x14f   :  { %v1609_v57 = vpop.f32.mrb[44].mxu1  ;;  %v1552_v44 = vpop.f32.mrb[45].mxu0 }
 0x150   :  { %v1249_v45 = vadd.f32 %v1248_v32, %v1237_v41  ;;  %1206 = vst [vmem:[%s2158_s2 + $0x38] sm:$0xff] %v1173_v42  ;;  %v1218_v33 = vadd.f32 %v1217_v40, %v1173_v42  ;;  %v1238_v46 = vmul.f32 %v1173_v42, %v1173_v42  ;;  %v1553_v48 = vadd.f32 %v1552_v44, %v1551_v43  ;;  %v1610_v50 = vpop.f32.mrb[45].mxu1  ;;  %v1554_v35 = vpop.f32.mrb[46].mxu0 }
 0x151   :  { %v1611_v51 = vadd.f32 %v1610_v50, %v1609_v57  ;;  %v1612_v52 = vpop.f32.mrb[46].mxu1  ;;  %v1555_v53 = vpop.f32.mrb[47].mxu0 }
 0x152   :  { %v1250_v54 = vadd.f32 %v1249_v45, %v1238_v46  ;;  %v1090_v56 = vadd.f32 %v1553_v48, %v2088_v47  ;;  %v1556_v58 = vadd.f32 %v1555_v53, %v1554_v35  ;;  %v1613_v59 = vpop.f32.mrb[47].mxu1 }
 0x153   :  { %v1614_v60 = vadd.f32 %v1613_v59, %v1612_v52 }
 0x154   :  { %v1178_v61 = vadd.f32 %v1611_v51, %v1090_v56  ;;  %v1093_v62 = vadd.f32 %v1556_v58, %v2090_v49 }
 0x156   :  { %1207 = vst [vmem:[%s2158_s2 + $0x40] sm:$0xff] %v1178_v61  ;;  %v1219_v5 = vadd.f32 %v1218_v33, %v1178_v61  ;;  %v1239_v0 = vmul.f32 %v1178_v61, %v1178_v61  ;;  %v1181_v2 = vadd.f32 %v1614_v60, %v1093_v62  ;;  %v1557_v3 = vpop.f32.mrb[48].mxu0 }
 0x157   :  { %v1615_v7 = vpop.f32.mrb[48].mxu1  ;;  %v1558_v4 = vpop.f32.mrb[49].mxu0 }
 0x158   :  { %v1251_v6 = vadd.f32 %v1250_v54, %v1239_v0  ;;  %1208 = vst [vmem:[%s2158_s2 + $0x48] sm:$0xff] %v1181_v2  ;;  %v1220_v47 = vadd.f32 %v1219_v5, %v1181_v2  ;;  %v1240_v8 = vmul.f32 %v1181_v2, %v1181_v2  ;;  %v1559_v9 = vadd.f32 %v1558_v4, %v1557_v3  ;;  %v1616_v10 = vpop.f32.mrb[49].mxu1  ;;  %v1560_v49 = vpop.f32.mrb[50].mxu0 }
 0x159   :  { %v1617_v11 = vadd.f32 %v1616_v10, %v1615_v7  ;;  %v1618_v12 = vpop.f32.mrb[50].mxu1  ;;  %v1561_v13 = vpop.f32.mrb[51].mxu0 }
 0x15a   :  { %v1252_v15 = vadd.f32 %v1251_v6, %v1240_v8  ;;  %v1098_v16 = vadd.f32 %v1559_v9, %v2092_v63  ;;  %v1562_v17 = vadd.f32 %v1561_v13, %v1560_v49  ;;  %v1619_v18 = vpop.f32.mrb[51].mxu1 }
 0x15b   :  { %v1620_v20 = vadd.f32 %v1619_v18, %v1618_v12 }
 0x15c   :  { %v1186_v22 = vadd.f32 %v1617_v11, %v1098_v16  ;;  %v1101_v23 = vadd.f32 %v1562_v17, %v2094_v1 }
 0x15e   :  { %1209 = vst [vmem:[%s2158_s2 + $0x50] sm:$0xff] %v1186_v22  ;;  %v1221_v24 = vadd.f32 %v1220_v47, %v1186_v22  ;;  %v1241_v25 = vmul.f32 %v1186_v22, %v1186_v22  ;;  %v1189_v19 = vadd.f32 %v1620_v20, %v1101_v23  ;;  %v1563_v26 = vpop.f32.mrb[52].mxu0 }
 0x15f   :  { %v1621_v27 = vpop.f32.mrb[52].mxu1  ;;  %v1564_v28 = vpop.f32.mrb[53].mxu0 }
 0x160   :  { %v1253_v21 = vadd.f32 %v1252_v15, %v1241_v25  ;;  %1210 = vst [vmem:[%s2158_s2 + $0x58] sm:$0xff] %v1189_v19  ;;  %v1222_v63 = vadd.f32 %v1221_v24, %v1189_v19  ;;  %v1242_v29 = vmul.f32 %v1189_v19, %v1189_v19  ;;  %v1565_v30 = vadd.f32 %v1564_v28, %v1563_v26  ;;  %v1622_v31 = vpop.f32.mrb[53].mxu1  ;;  %v1566_v1 = vpop.f32.mrb[54].mxu0 }
 0x161   :  { %v1623_v32 = vadd.f32 %v1622_v31, %v1621_v27  ;;  %v1624_v34 = vpop.f32.mrb[54].mxu1  ;;  %v1567_v36 = vpop.f32.mrb[55].mxu0 }
 0x162   :  { %v1254_v37 = vadd.f32 %v1253_v21, %v1242_v29  ;;  %v1106_v38 = vadd.f32 %v1565_v30, %v2096_v14  ;;  %v1625_v55 = vpop.f32.mrb[55].mxu1 }
 0x164   :  { %v1194_v39 = vadd.f32 %v1623_v32, %v1106_v38 }
 0x166   :  { %1211 = vst [vmem:[%s2158_s2 + $0x60] sm:$0xff] %v1194_v39  ;;  %v1223_v40 = vadd.f32 %v1222_v63, %v1194_v39  ;;  %v1243_v41 = vmul.f32 %v1194_v39, %v1194_v39 }
 0x168   :  { %v1224_v42 = vrot.slane %v1223_v40, 4  ;;  %v1255_v43 = vadd.f32 %v1254_v37, %v1243_v41 }
 0x16a   :  { %v1225_v57 = vadd.f32 %v1224_v42, %v1223_v40  ;;  %v1256_v44 = vrot.slane %v1255_v43, 4 }
 0x16c   :  { %v1226_v45 = vrot.slane %v1225_v57, 2  ;;  %v1257_v33 = vadd.f32 %v1256_v44, %v1255_v43 }
 0x16e   :  { %v1227_v46 = vadd.f32 %v1226_v45, %v1225_v57  ;;  %v1258_v48 = vrot.slane %v1257_v33, 2 }
 0x170   :  { %v1228_v50 = vrot.slane %v1227_v46, 1  ;;  %v1259_v35 = vadd.f32 %v1258_v48, %v1257_v33 }
 0x172   :  { %v1229_v51 = vadd.f32 %v1228_v50, %v1227_v46  ;;  %v1260_v14 = vrot.slane %v1259_v35, 1 }
 0x174   :  { %1230 = vst [vmem:[%s2159_s3] sm:$0x1] %v1229_v51  ;;  %v1261_v52 = vadd.f32 %v1260_v14, %v1259_v35 }
 0x176   :  { %1262 = vst [vmem:[%s2160_s4] sm:$0x1] %v1261_v52 }

// kernel: nlayer_discriminator.15
= control target key start
LH: loop header
LB: loop body
LE: loop exit
PB: predicated region body
PF: predicated region fallthrough
CT: control target
= control target key end

     0   :  { %s3546_s1 = inlined_call_operand.vmem [shape: bf16[2048,128], index: 1, kind: input, shape index: {}]   ;;  %s3547_s0 = inlined_call_operand.vmem [shape: bf16[72,2048], index: 0, kind: input, shape index: {}]   ;;  %s3548_s2 = inlined_call_operand.vmem [shape: f32[1,128], index: 2, kind: input, shape index: {}]   ;;  %s3549_s3 = inlined_call_operand.vmem [shape: f32[72,128], index: 3, kind: output, shape index: {}]  }
   0x1   :  { %v2660_v0 = vld [vmem:[%s3546_s1 + $0x40] sm:$0xff]   ;;  %v2664_v4 = vld [vmem:[%s3546_s1 + $0x48] sm:$0xff]   ;;  %v2668_v8 = vld [vmem:[%s3546_s1 + $0x50] sm:$0xff]  }
   0x2   :  { %v2661_v1 = vld [vmem:[%s3546_s1 + $0xc0] sm:$0xff]   ;;  %2292 = vmatprep.subr.bf16.mxu0 %v2660_v0  ;;  %v2665_v5 = vld [vmem:[%s3546_s1 + $0xc8] sm:$0xff]   ;;  %v2669_v9 = vld [vmem:[%s3546_s1 + $0xd0] sm:$0xff]  }
   0x3   :  { %v2662_v2 = vld [vmem:[%s3546_s1] sm:$0xff]   ;;  %2338 = vmatprep.subr.bf16.mxu1 %v2661_v1  ;;  %v2666_v6 = vld [vmem:[%s3546_s1 + $0x8] sm:$0xff]   ;;  %v2670_v10 = vld [vmem:[%s3546_s1 + $0x10] sm:$0xff]  }
   0x4   :  { %v2663_v3 = vld [vmem:[%s3546_s1 + $0x80] sm:$0xff]   ;;  %2293 = vmatpush3.bf16.msra.mxu0 %v2662_v2  ;;  %v2667_v7 = vld [vmem:[%s3546_s1 + $0x88] sm:$0xff]   ;;  %v2671_v11 = vld [vmem:[%s3546_s1 + $0x90] sm:$0xff]  }
   0x5   :  { %2339 = vmatpush3.bf16.msra.mxu1 %v2663_v3  ;;  %2294 = vmatprep.subr.bf16.mxu0 %v2664_v4  ;;  %v2672_v12 = vld [vmem:[%s3546_s1 + $0x58] sm:$0xff]   ;;  %v2676_v16 = vld [vmem:[%s3546_s1 + $0x60] sm:$0xff]   ;;  %v2680_v20 = vld [vmem:[%s3546_s1 + $0x68] sm:$0xff]  }
   0x6   :  { %2340 = vmatprep.subr.bf16.mxu1 %v2665_v5  ;;  %v2673_v13 = vld [vmem:[%s3546_s1 + $0xd8] sm:$0xff]   ;;  %v2677_v17 = vld [vmem:[%s3546_s1 + $0xe0] sm:$0xff]   ;;  %v2681_v21 = vld [vmem:[%s3546_s1 + $0xe8] sm:$0xff]  }
   0x7   :  { %v2674_v14 = vld [vmem:[%s3546_s1 + $0x18] sm:$0xff]   ;;  %v2678_v18 = vld [vmem:[%s3546_s1 + $0x20] sm:$0xff]   ;;  %v2682_v22 = vld [vmem:[%s3546_s1 + $0x28] sm:$0xff]  }
   0x8   :  { %2295 = vmatpush3.bf16.msra.mxu0 %v2666_v6  ;;  %v2675_v15 = vld [vmem:[%s3546_s1 + $0x98] sm:$0xff]   ;;  %v2679_v19 = vld [vmem:[%s3546_s1 + $0xa0] sm:$0xff]   ;;  %v2683_v23 = vld [vmem:[%s3546_s1 + $0xa8] sm:$0xff]  }
   0x9   :  { %2341 = vmatpush3.bf16.msra.mxu1 %v2667_v7  ;;  %2296 = vmatprep.subr.bf16.mxu0 %v2668_v8  ;;  %v2684_v24 = vld [vmem:[%s3546_s1 + $0x70] sm:$0xff]   ;;  %v2688_v28 = vld [vmem:[%s3546_s1 + $0x78] sm:$0xff]   ;;  %v15_v32 = vld [vmem:[%s3547_s0] sm:$0xff] }
   0xa   :  { %2342 = vmatprep.subr.bf16.mxu1 %v2669_v9  ;;  %v2685_v25 = vld [vmem:[%s3546_s1 + $0xf0] sm:$0xff]   ;;  %v2689_v29 = vld [vmem:[%s3546_s1 + $0xf8] sm:$0xff]   ;;  %v23_v33 = vld [vmem:[%s3547_s0 + $0x40] sm:$0xff] }
   0xb   :  { %v2686_v26 = vld [vmem:[%s3546_s1 + $0x30] sm:$0xff]   ;;  %v2690_v30 = vld [vmem:[%s3546_s1 + $0x38] sm:$0xff]   ;;  %v16_v34 = vld [vmem:[%s3547_s0 + $0x8] sm:$0xff]  ;;  %v2084_v35 = vcombine.low %v15_v32, %v23_v33  ;;  %v2085_v36 = vcombine.high %v15_v32, %v23_v33 }
   0xc   :  { %2297 = vmatpush3.bf16.msra.mxu0 %v2670_v10  ;;  %v2687_v27 = vld [vmem:[%s3546_s1 + $0xb0] sm:$0xff]   ;;  %v2691_v31 = vld [vmem:[%s3546_s1 + $0xb8] sm:$0xff]   ;;  %v24_v37 = vld [vmem:[%s3547_s0 + $0x48] sm:$0xff] }
   0xd   :  { %2343 = vmatpush3.bf16.msra.mxu1 %v2671_v11  ;;  %2298 = vmatprep.subr.bf16.mxu0 %v2672_v12  ;;  %v2086_v38 = vcombine.low %v16_v34, %v24_v37  ;;  %v2087_v39 = vcombine.high %v16_v34, %v24_v37  ;;  %v2692_v40 = vld [vmem:[%s3546_s1 + $0x140] sm:$0xff]   ;;  %v2696_v44 = vld [vmem:[%s3546_s1 + $0x148] sm:$0xff]   ;;  %v2700_v56 = vld [vmem:[%s3546_s1 + $0x150] sm:$0xff]  }
   0xe   :  { %2344 = vmatprep.subr.bf16.mxu1 %v2673_v13  ;;  %1526 = vmatprep.mubr.bf16.mxu0 %v2085_v36  ;;  %v2693_v41 = vld [vmem:[%s3546_s1 + $0x100] sm:$0xff]   ;;  %v2697_v45 = vld [vmem:[%s3546_s1 + $0x108] sm:$0xff]   ;;  %v2701_v57 = vld [vmem:[%s3546_s1 + $0x110] sm:$0xff]  }
   0xf   :  { %1598 = vmatprep.mubr.bf16.mxu1 %v2087_v39  ;;  %v2694_v42 = vld [vmem:[%s3546_s1 + $0x1c0] sm:$0xff]   ;;  %v32_v49 = vld [vmem:[%s3547_s0 + $0x88] sm:$0xff]  ;;  %v2702_v58 = vld [vmem:[%s3546_s1 + $0x1d0] sm:$0xff]  }
  0x10   :  { %2299 = vmatpush3.bf16.msra.mxu0 %v2674_v14  ;;  %v2695_v43 = vld [vmem:[%s3546_s1 + $0x180] sm:$0xff]   ;;  %v40_v50 = vld [vmem:[%s3547_s0 + $0xc8] sm:$0xff]  ;;  %v2703_v59 = vld [vmem:[%s3546_s1 + $0x190] sm:$0xff]  }
  0x11   :  { %2345 = vmatpush3.bf16.msra.mxu1 %v2675_v15  ;;  %2300 = vmatprep.subr.bf16.mxu0 %v2676_v16  ;;  %v31_v46 = vld [vmem:[%s3547_s0 + $0x80] sm:$0xff]  ;;  %v2103_v52 = vcombine.high %v32_v49, %v40_v50  ;;  %v2698_v53 = vld [vmem:[%s3546_s1 + $0x1c8] sm:$0xff]   ;;  %v2102_v54 = vcombine.low %v32_v49, %v40_v50  ;;  %v2704_v2 = vld [vmem:[%s3546_s1 + $0x158] sm:$0xff]  }
  0x12   :  { %2346 = vmatprep.subr.bf16.mxu1 %v2677_v17  ;;  %v39_v47 = vld [vmem:[%s3547_s0 + $0xc0] sm:$0xff]  ;;  %v2699_v55 = vld [vmem:[%s3546_s1 + $0x188] sm:$0xff]   ;;  %v2705_v5 = vld [vmem:[%s3546_s1 + $0x118] sm:$0xff]  }
  0x13   :  { %v2101_v48 = vcombine.high %v31_v46, %v39_v47  ;;  %v2100_v51 = vcombine.low %v31_v46, %v39_v47  ;;  %v47_v60 = vld [vmem:[%s3547_s0 + $0x100] sm:$0xff]  ;;  %v48_v62 = vld [vmem:[%s3547_s0 + $0x108] sm:$0xff]  ;;  %v2706_v6 = vld [vmem:[%s3546_s1 + $0x1d8] sm:$0xff]  }
  0x14   :  { %2301 = vmatpush3.bf16.msra.mxu0 %v2678_v18  ;;  %v55_v61 = vld [vmem:[%s3547_s0 + $0x140] sm:$0xff]  ;;  %v56_v63 = vld [vmem:[%s3547_s0 + $0x148] sm:$0xff]  ;;  %v2707_v7 = vld [vmem:[%s3546_s1 + $0x198] sm:$0xff]  }
  0x15   :  { %2347 = vmatpush3.bf16.msra.mxu1 %v2679_v19  ;;  %2302 = vmatprep.subr.bf16.mxu0 %v2680_v20  ;;  %v2117_v0 = vcombine.high %v47_v60, %v55_v61  ;;  %v2119_v1 = vcombine.high %v48_v62, %v56_v63  ;;  %v2116_v3 = vcombine.low %v47_v60, %v55_v61  ;;  %v2708_v8 = vld [vmem:[%s3546_s1 + $0x160] sm:$0xff]   ;;  %v64_v13 = vld [vmem:[%s3547_s0 + $0x188] sm:$0xff]  ;;  %v2723_v33 = vld [vmem:[%s3546_s1 + $0x1b0] sm:$0xff]  }
  0x16   :  { %2348 = vmatprep.subr.bf16.mxu1 %v2681_v21  ;;  %v2118_v4 = vcombine.low %v48_v62, %v56_v63  ;;  %v2709_v9 = vld [vmem:[%s3546_s1 + $0x120] sm:$0xff]   ;;  %v72_v15 = vld [vmem:[%s3547_s0 + $0x1c8] sm:$0xff]  ;;  %v2724_v34 = vld [vmem:[%s3546_s1 + $0x178] sm:$0xff]  }
  0x17   :  { %v2710_v10 = vld [vmem:[%s3546_s1 + $0x1e0] sm:$0xff]   ;;  %v2135_v17 = vcombine.high %v64_v13, %v72_v15  ;;  %v2134_v19 = vcombine.low %v64_v13, %v72_v15  ;;  %v2712_v20 = vld [vmem:[%s3546_s1 + $0x168] sm:$0xff]   ;;  %v2726_v36 = vld [vmem:[%s3546_s1 + $0x1f8] sm:$0xff]  }
  0x18   :  { %2303 = vmatpush3.bf16.msra.mxu0 %v2682_v22  ;;  %v63_v11 = vld [vmem:[%s3547_s0 + $0x180] sm:$0xff]  ;;  %v2713_v21 = vld [vmem:[%s3546_s1 + $0x128] sm:$0xff]   ;;  %v2727_v37 = vld [vmem:[%s3546_s1 + $0x1b8] sm:$0xff]  }
  0x19   :  { %2349 = vmatpush3.bf16.msra.mxu1 %v2683_v23  ;;  %2304 = vmatprep.subr.bf16.mxu0 %v2684_v24  ;;  %v71_v12 = vld [vmem:[%s3547_s0 + $0x1c0] sm:$0xff]  ;;  %v2714_v22 = vld [vmem:[%s3546_s1 + $0x1e8] sm:$0xff]   ;;  %v2716_v24 = vld [vmem:[%s3546_s1 + $0x170] sm:$0xff]  }
  0x1a   :  { %2350 = vmatprep.subr.bf16.mxu1 %v2685_v25  ;;  %v2133_v14 = vcombine.high %v63_v11, %v71_v12  ;;  %v2132_v16 = vcombine.low %v63_v11, %v71_v12  ;;  %v2711_v18 = vld [vmem:[%s3546_s1 + $0x1a0] sm:$0xff]   ;;  %v2715_v23 = vld [vmem:[%s3546_s1 + $0x1a8] sm:$0xff]   ;;  %v25_v39 = vld [vmem:[%s3547_s0 + $0x50] sm:$0xff] }
  0x1b   :  { %v79_v25 = vld [vmem:[%s3547_s0 + $0x200] sm:$0xff]  ;;  %v2732_v50 = vld [vmem:[%s3546_s1 + $0x248] sm:$0xff]   ;;  %v2736_v62 = vld [vmem:[%s3546_s1 + $0x250] sm:$0xff]  }
  0x1c   :  { %2305 = vmatpush3.bf16.msra.mxu0 %v2686_v26  ;;  %v80_v26 = vld [vmem:[%s3547_s0 + $0x208] sm:$0xff]  ;;  %v2729_v47 = vld [vmem:[%s3546_s1 + $0x200] sm:$0xff]   ;;  %v2737_v63 = vld [vmem:[%s3546_s1 + $0x210] sm:$0xff]  }
  0x1d   :  { %2351 = vmatpush3.bf16.msra.mxu1 %v2687_v27  ;;  %2306 = vmatprep.subr.bf16.mxu0 %v2688_v28  ;;  %v2149_v27 = vcombine.high %v79_v25, %v79_v25  ;;  %v2151_v28 = vcombine.high %v80_v26, %v80_v26  ;;  %v2150_v32 = vcombine.low %v80_v26, %v80_v26  ;;  %v2731_v49 = vld [vmem:[%s3546_s1 + $0x280] sm:$0xff]   ;;  %v2735_v60 = vld [vmem:[%s3546_s1 + $0x288] sm:$0xff]   ;;  %v2742_v11 = vld [vmem:[%s3546_s1 + $0x2d8] sm:$0xff]  }
  0x1e   :  { %2352 = vmatprep.subr.bf16.mxu1 %v2689_v29  ;;  %v2719_v29 = vld [vmem:[%s3546_s1 + $0x130] sm:$0xff]   ;;  %v2743_v13 = vld [vmem:[%s3546_s1 + $0x298] sm:$0xff]   ;;  %v2745_v15 = vld [vmem:[%s3546_s1 + $0x220] sm:$0xff]  }
  0x20   :  { %2307 = vmatpush3.bf16.msra.mxu0 %v2690_v30  ;;  %v2148_v30 = vcombine.low %v79_v25, %v79_v25  ;;  %v2748_v25 = vld [vmem:[%s3546_s1 + $0x268] sm:$0xff]  }
  0x21   :  { %2353 = vmatpush3.bf16.msra.mxu1 %v2691_v31  ;;  %2384 = vmatprep.subr.bf16.mxu0 %v2692_v40  ;;  %v2722_v31 = vld [vmem:[%s3546_s1 + $0x1f0] sm:$0xff]   ;;  %v18_v40 = vld [vmem:[%s3547_s0 + $0x18] sm:$0xff] }
  0x22   :  { %2430 = vmatprep.subr.bf16.mxu1 %v2694_v42  ;;  %v26_v42 = vld [vmem:[%s3547_s0 + $0x58] sm:$0xff] }
  0x23   :  { %1527 = vmatmul.mubr.bf16.vlgmr.msra.gmra.mrb[0].mxu0 %v2084_v35  ;;  %v2725_v35 = vld [vmem:[%s3546_s1 + $0x138] sm:$0xff]   ;;  %v2090_v46 = vcombine.low %v18_v40, %v26_v42 }
  0x24   :  { %1599 = vmatmul.mubr.bf16.vlgmr.msra.gmra.mrb[0].mxu1 %v2086_v38  ;;  %2385 = vmatpush3.bf16.msra.mxu0 %v2693_v41  ;;  %v17_v38 = vld [vmem:[%s3547_s0 + $0x10] sm:$0xff] }
  0x25   :  { %2431 = vmatpush3.bf16.msra.mxu1 %v2695_v43  ;;  %2386 = vmatprep.subr.bf16.mxu0 %v2696_v44  ;;  %v2089_v41 = vcombine.high %v17_v38, %v25_v39  ;;  %v2088_v43 = vcombine.low %v17_v38, %v25_v39  ;;  %v2091_v44 = vcombine.high %v18_v40, %v26_v42  ;;  %v2760_v39 = vld [vmem:[%s3546_s1 + $0x278] sm:$0xff]  }
  0x26   :  { %1534 = vmatprep.mubr.bf16.mxu0 %v2101_v48  ;;  %1606 = vmatprep.mubr.bf16.mxu1 %v2103_v52  ;;  %v2730_v48 = vld [vmem:[%s3546_s1 + $0x2c0] sm:$0xff]   ;;  %v33_v52 = vld [vmem:[%s3547_s0 + $0x90] sm:$0xff]  ;;  %v2762_v42 = vld [vmem:[%s3546_s1 + $0x2f8] sm:$0xff]  }
  0x27   :  { %2432 = vmatprep.subr.bf16.mxu1 %v2698_v53  ;;  %v41_v53 = vld [vmem:[%s3547_s0 + $0xd0] sm:$0xff] }
  0x28   :  { %2387 = vmatpush3.bf16.msra.mxu0 %v2697_v45  ;;  %v2728_v45 = vld [vmem:[%s3546_s1 + $0x240] sm:$0xff]  }
  0x29   :  { %2433 = vmatpush3.bf16.msra.mxu1 %v2699_v55  ;;  %2388 = vmatprep.subr.bf16.mxu0 %v2700_v56  ;;  %v34_v55 = vld [vmem:[%s3547_s0 + $0x98] sm:$0xff] }
  0x2a   :  { %2434 = vmatprep.subr.bf16.mxu1 %v2702_v58  ;;  %v42_v56 = vld [vmem:[%s3547_s0 + $0xd8] sm:$0xff]  ;;  %v2734_v58 = vld [vmem:[%s3546_s1 + $0x2c8] sm:$0xff]  }
  0x2b   :  { %1535 = vmatmul.mubr.bf16.gmra.mrb[4].mxu0 %v2100_v51  ;;  %v2733_v51 = vld [vmem:[%s3546_s1 + $0x208] sm:$0xff]   ;;  %v2106_v61 = vcombine.low %v34_v55, %v42_v56 }
  0x2c   :  { %1607 = vmatmul.mubr.bf16.gmra.mrb[4].mxu1 %v2102_v54  ;;  %2389 = vmatpush3.bf16.msra.mxu0 %v2701_v57  ;;  %v2105_v54 = vcombine.high %v33_v52, %v41_v53  ;;  %v2107_v57 = vcombine.high %v34_v55, %v42_v56  ;;  %v2767_v55 = vld [vmem:[%s3546_s1 + $0x380] sm:$0xff]   ;;  %v2768_v56 = vld [vmem:[%s3546_s1 + $0x348] sm:$0xff]  }
  0x2d   :  { %2435 = vmatpush3.bf16.msra.mxu1 %v2703_v59  ;;  %1542 = vmatprep.mubr.bf16.mxu0 %v2117_v0  ;;  %v2104_v59 = vcombine.low %v33_v52, %v41_v53  ;;  %v2738_v0 = vld [vmem:[%s3546_s1 + $0x2d0] sm:$0xff]   ;;  %v2766_v53 = vld [vmem:[%s3546_s1 + $0x3c0] sm:$0xff]  }
  0x2e   :  { %1614 = vmatprep.mubr.bf16.mxu1 %v2119_v1  ;;  %2390 = vmatprep.subr.bf16.mxu0 %v2704_v2  ;;  %v2739_v1 = vld [vmem:[%s3546_s1 + $0x290] sm:$0xff]  }
  0x2f   :  { %2436 = vmatprep.subr.bf16.mxu1 %v2706_v6  ;;  %v49_v2 = vld [vmem:[%s3547_s0 + $0x110] sm:$0xff] }
  0x30   :  { %2391 = vmatpush3.bf16.msra.mxu0 %v2705_v5  ;;  %v58_v5 = vld [vmem:[%s3547_s0 + $0x158] sm:$0xff] }
  0x31   :  { %2437 = vmatpush3.bf16.msra.mxu1 %v2707_v7  ;;  %2392 = vmatprep.subr.bf16.mxu0 %v2708_v8  ;;  %v2740_v8 = vld [vmem:[%s3546_s1 + $0x258] sm:$0xff]  }
  0x32   :  { %2438 = vmatprep.subr.bf16.mxu1 %v2710_v10 }
  0x33   :  { %1543 = vmatmul.mubr.bf16.gmra.mrb[8].mxu0 %v2116_v3  ;;  %v57_v3 = vld [vmem:[%s3547_s0 + $0x150] sm:$0xff] }
  0x34   :  { %1615 = vmatmul.mubr.bf16.gmra.mrb[8].mxu1 %v2118_v4  ;;  %2393 = vmatpush3.bf16.msra.mxu0 %v2709_v9  ;;  %v50_v4 = vld [vmem:[%s3547_s0 + $0x118] sm:$0xff]  ;;  %v2121_v6 = vcombine.high %v49_v2, %v57_v3  ;;  %v2120_v10 = vcombine.low %v49_v2, %v57_v3  ;;  %v2772_v2 = vld [vmem:[%s3546_s1 + $0x350] sm:$0xff]  }
  0x35   :  { %1550 = vmatprep.mubr.bf16.mxu0 %v2133_v14  ;;  %1622 = vmatprep.mubr.bf16.mxu1 %v2135_v17  ;;  %v2123_v7 = vcombine.high %v50_v4, %v58_v5  ;;  %v2741_v9 = vld [vmem:[%s3546_s1 + $0x218] sm:$0xff]   ;;  %v2122_v12 = vcombine.low %v50_v4, %v58_v5  ;;  %v2744_v14 = vld [vmem:[%s3546_s1 + $0x260] sm:$0xff]   ;;  %v65_v17 = vld [vmem:[%s3547_s0 + $0x190] sm:$0xff] }
  0x36   :  { %2439 = vmatpush3.bf16.msra.mxu1 %v2711_v18  ;;  %2394 = vmatprep.subr.bf16.mxu0 %v2712_v20  ;;  %v73_v18 = vld [vmem:[%s3547_s0 + $0x1d0] sm:$0xff] }
  0x37   :  { %2440 = vmatprep.subr.bf16.mxu1 %v2714_v22  ;;  %v2137_v20 = vcombine.high %v65_v17, %v73_v18  ;;  %v2773_v4 = vld [vmem:[%s3546_s1 + $0x310] sm:$0xff]  }
  0x38   :  { %2395 = vmatpush3.bf16.msra.mxu0 %v2713_v21  ;;  %v74_v21 = vld [vmem:[%s3547_s0 + $0x1d8] sm:$0xff] }
  0x39   :  { %2396 = vmatprep.subr.bf16.mxu0 %v2716_v24  ;;  %v2136_v24 = vcombine.low %v65_v17, %v73_v18  ;;  %v2779_v17 = vld [vmem:[%s3546_s1 + $0x398] sm:$0xff]  }
  0x3a   :  { %2441 = vmatpush3.bf16.msra.mxu1 %v2715_v23  ;;  %v2747_v23 = vld [vmem:[%s3546_s1 + $0x2a0] sm:$0xff]  }
  0x3b   :  { %1551 = vmatmul.mubr.bf16.gmra.mrb[12].mxu0 %v2132_v16  ;;  %2442 = vmatprep.subr.bf16.mxu1 %v2722_v31  ;;  %v2746_v16 = vld [vmem:[%s3546_s1 + $0x2e0] sm:$0xff]   ;;  %v81_v31 = vld [vmem:[%s3547_s0 + $0x210] sm:$0xff] }
  0x3c   :  { %1623 = vmatmul.mubr.bf16.gmra.mrb[12].mxu1 %v2134_v19  ;;  %1558 = vmatprep.mubr.bf16.mxu0 %v2149_v27  ;;  %v66_v19 = vld [vmem:[%s3547_s0 + $0x198] sm:$0xff]  ;;  %v2749_v27 = vld [vmem:[%s3546_s1 + $0x228] sm:$0xff]   ;;  %v2152_v38 = vcombine.low %v81_v31, %v81_v31 }
  0x3d   :  { %1630 = vmatprep.mubr.bf16.mxu1 %v2151_v28  ;;  %2397 = vmatpush3.bf16.msra.mxu0 %v2719_v29  ;;  %v2139_v22 = vcombine.high %v66_v19, %v74_v21  ;;  %v2138_v26 = vcombine.low %v66_v19, %v74_v21  ;;  %v2750_v28 = vld [vmem:[%s3546_s1 + $0x2e8] sm:$0xff]   ;;  %v2780_v19 = vld [vmem:[%s3546_s1 + $0x360] sm:$0xff]  }
  0x3e   :  { %2443 = vmatpush3.bf16.msra.mxu1 %v2723_v33  ;;  %2398 = vmatprep.subr.bf16.mxu0 %v2724_v34  ;;  %v2751_v29 = vld [vmem:[%s3546_s1 + $0x2a8] sm:$0xff]   ;;  %v2153_v33 = vcombine.high %v81_v31, %v81_v31  ;;  %v2781_v21 = vld [vmem:[%s3546_s1 + $0x320] sm:$0xff]  }
  0x3f   :  { %2444 = vmatprep.subr.bf16.mxu1 %v2726_v36  ;;  %v2758_v36 = vld [vmem:[%s3546_s1 + $0x2f0] sm:$0xff]   ;;  %v2785_v31 = vld [vmem:[%s3546_s1 + $0x328] sm:$0xff]  }
  0x41   :  { %2399 = vmatpush3.bf16.msra.mxu0 %v2725_v35  ;;  %v2755_v35 = vld [vmem:[%s3546_s1 + $0x230] sm:$0xff]  }
  0x42   :  { %2445 = vmatpush3.bf16.msra.mxu1 %v2727_v37  ;;  %2476 = vmatprep.subr.bf16.mxu0 %v2728_v45  ;;  %v2759_v37 = vld [vmem:[%s3546_s1 + $0x2b0] sm:$0xff]   ;;  %v27_v45 = vld [vmem:[%s3547_s0 + $0x60] sm:$0xff] }
  0x43   :  { %1559 = vmatmul.mubr.bf16.gmra.mrb[16].mxu0 %v2148_v30  ;;  %2522 = vmatprep.subr.bf16.mxu1 %v2730_v48  ;;  %v2752_v30 = vld [vmem:[%s3546_s1 + $0x270] sm:$0xff]   ;;  %v28_v48 = vld [vmem:[%s3547_s0 + $0x68] sm:$0xff] }
  0x44   :  { %1631 = vmatmul.mubr.bf16.gmra.mrb[16].mxu1 %v2150_v32  ;;  %1670 = vmatprep.mubr.bf16.mxu0 %v2089_v41  ;;  %v82_v32 = vld [vmem:[%s3547_s0 + $0x218] sm:$0xff] }
  0x45   :  { %1742 = vmatprep.mubr.bf16.mxu1 %v2091_v44  ;;  %v2155_v34 = vcombine.high %v82_v32, %v82_v32  ;;  %v2154_v40 = vcombine.low %v82_v32, %v82_v32  ;;  %v2761_v41 = vld [vmem:[%s3546_s1 + $0x238] sm:$0xff]   ;;  %v19_v44 = vld [vmem:[%s3547_s0 + $0x20] sm:$0xff] }
  0x46   :  { %v2092_v52 = vcombine.low %v19_v44, %v27_v45 }
  0x4b   :  { %1671 = vmatmul.mubr.bf16.vlgmr.msra.gmra.mrb[20].mxu0 %v2088_v43  ;;  %v2763_v43 = vld [vmem:[%s3546_s1 + $0x2b8] sm:$0xff]  }
  0x4c   :  { %1743 = vmatmul.mubr.bf16.vlgmr.msra.gmra.mrb[20].mxu1 %v2090_v46  ;;  %2477 = vmatpush3.bf16.msra.mxu0 %v2729_v47  ;;  %v20_v46 = vld [vmem:[%s3547_s0 + $0x28] sm:$0xff]  ;;  %v2093_v47 = vcombine.high %v19_v44, %v27_v45  ;;  %v2796_v44 = vld [vmem:[%s3546_s1 + $0x378] sm:$0xff]  }
  0x4d   :  { %2523 = vmatpush3.bf16.msra.mxu1 %v2731_v49  ;;  %2478 = vmatprep.subr.bf16.mxu0 %v2732_v50  ;;  %v2095_v49 = vcombine.high %v20_v46, %v28_v48  ;;  %v2764_v50 = vld [vmem:[%s3546_s1 + $0x340] sm:$0xff]   ;;  %v2797_v45 = vld [vmem:[%s3546_s1 + $0x338] sm:$0xff]  }
  0x4e   :  { %1678 = vmatprep.mubr.bf16.mxu0 %v2105_v54  ;;  %1750 = vmatprep.mubr.bf16.mxu1 %v2107_v57  ;;  %v2094_v54 = vcombine.low %v20_v46, %v28_v48  ;;  %v2769_v57 = vld [vmem:[%s3546_s1 + $0x308] sm:$0xff]  }
  0x4f   :  { %2524 = vmatprep.subr.bf16.mxu1 %v2734_v58  ;;  %v35_v58 = vld [vmem:[%s3547_s0 + $0xa0] sm:$0xff] }
  0x50   :  { %2479 = vmatpush3.bf16.msra.mxu0 %v2733_v51  ;;  %v2765_v51 = vld [vmem:[%s3546_s1 + $0x300] sm:$0xff]  }
  0x51   :  { %2525 = vmatpush3.bf16.msra.mxu1 %v2735_v60  ;;  %2480 = vmatprep.subr.bf16.mxu0 %v2736_v62  ;;  %v44_v62 = vld [vmem:[%s3547_s0 + $0xe8] sm:$0xff] }
  0x52   :  { %2526 = vmatprep.subr.bf16.mxu1 %v2738_v0  ;;  %v2770_v0 = vld [vmem:[%s3546_s1 + $0x3c8] sm:$0xff]  }
  0x53   :  { %1679 = vmatmul.mubr.bf16.gmra.mrb[24].mxu0 %v2104_v59  ;;  %v43_v59 = vld [vmem:[%s3547_s0 + $0xe0] sm:$0xff] }
  0x54   :  { %1751 = vmatmul.mubr.bf16.gmra.mrb[24].mxu1 %v2106_v61  ;;  %2481 = vmatpush3.bf16.msra.mxu0 %v2737_v63  ;;  %v2109_v60 = vcombine.high %v35_v58, %v43_v59  ;;  %v36_v61 = vld [vmem:[%s3547_s0 + $0xa8] sm:$0xff]  ;;  %v2108_v3 = vcombine.low %v35_v58, %v43_v59  ;;  %v38_v58 = vld [vmem:[%s3547_s0 + $0xb8] sm:$0xff] }
  0x55   :  { %2527 = vmatpush3.bf16.msra.mxu1 %v2739_v1  ;;  %1686 = vmatprep.mubr.bf16.mxu0 %v2121_v6  ;;  %v2111_v63 = vcombine.high %v36_v61, %v44_v62  ;;  %v2771_v1 = vld [vmem:[%s3546_s1 + $0x388] sm:$0xff]   ;;  %v2110_v5 = vcombine.low %v36_v61, %v44_v62  ;;  %v2774_v6 = vld [vmem:[%s3546_s1 + $0x3d0] sm:$0xff]   ;;  %v46_v59 = vld [vmem:[%s3547_s0 + $0xf8] sm:$0xff] }
  0x56   :  { %1758 = vmatprep.mubr.bf16.mxu1 %v2123_v7  ;;  %2482 = vmatprep.subr.bf16.mxu0 %v2740_v8  ;;  %v2775_v7 = vld [vmem:[%s3546_s1 + $0x390] sm:$0xff]   ;;  %v51_v8 = vld [vmem:[%s3547_s0 + $0x120] sm:$0xff] }
  0x57   :  { %2528 = vmatprep.subr.bf16.mxu1 %v2742_v11  ;;  %v60_v11 = vld [vmem:[%s3547_s0 + $0x168] sm:$0xff] }
  0x58   :  { %2483 = vmatpush3.bf16.msra.mxu0 %v2741_v9  ;;  %v59_v9 = vld [vmem:[%s3547_s0 + $0x160] sm:$0xff] }
  0x59   :  { %2529 = vmatpush3.bf16.msra.mxu1 %v2743_v13  ;;  %2484 = vmatprep.subr.bf16.mxu0 %v2744_v14  ;;  %v2776_v14 = vld [vmem:[%s3546_s1 + $0x358] sm:$0xff]   ;;  %v2124_v18 = vcombine.low %v51_v8, %v59_v9 }
  0x5a   :  { %2530 = vmatprep.subr.bf16.mxu1 %v2746_v16  ;;  %v2778_v16 = vld [vmem:[%s3546_s1 + $0x3d8] sm:$0xff]  }
  0x5b   :  { %1687 = vmatmul.mubr.bf16.gmra.mrb[28].mxu0 %v2120_v10  ;;  %v52_v10 = vld [vmem:[%s3547_s0 + $0x128] sm:$0xff] }
  0x5c   :  { %1759 = vmatmul.mubr.bf16.gmra.mrb[28].mxu1 %v2122_v12  ;;  %2485 = vmatpush3.bf16.msra.mxu0 %v2745_v15  ;;  %v2125_v12 = vcombine.high %v51_v8, %v59_v9  ;;  %v2127_v13 = vcombine.high %v52_v10, %v60_v11  ;;  %v2777_v15 = vld [vmem:[%s3546_s1 + $0x318] sm:$0xff]   ;;  %v69_v8 = vld [vmem:[%s3547_s0 + $0x1b0] sm:$0xff] }
  0x5d   :  { %1694 = vmatprep.mubr.bf16.mxu0 %v2137_v20  ;;  %1766 = vmatprep.mubr.bf16.mxu1 %v2139_v22  ;;  %v2126_v20 = vcombine.low %v52_v10, %v60_v11  ;;  %v2782_v22 = vld [vmem:[%s3546_s1 + $0x3e0] sm:$0xff]   ;;  %v77_v9 = vld [vmem:[%s3547_s0 + $0x1f0] sm:$0xff]  ;;  %v70_v10 = vld [vmem:[%s3547_s0 + $0x1b8] sm:$0xff] }
  0x5e   :  { %2531 = vmatpush3.bf16.msra.mxu1 %v2747_v23  ;;  %2486 = vmatprep.subr.bf16.mxu0 %v2748_v25  ;;  %v67_v23 = vld [vmem:[%s3547_s0 + $0x1a0] sm:$0xff]  ;;  %v68_v25 = vld [vmem:[%s3547_s0 + $0x1a8] sm:$0xff]  ;;  %v78_v11 = vld [vmem:[%s3547_s0 + $0x1f8] sm:$0xff] }
  0x5f   :  { %2532 = vmatprep.subr.bf16.mxu1 %v2750_v28 }
  0x60   :  { %2487 = vmatpush3.bf16.msra.mxu0 %v2749_v27  ;;  %v76_v27 = vld [vmem:[%s3547_s0 + $0x1e8] sm:$0xff] }
  0x61   :  { %2488 = vmatprep.subr.bf16.mxu0 %v2752_v30  ;;  %v2143_v28 = vcombine.high %v68_v25, %v76_v27  ;;  %v2784_v30 = vld [vmem:[%s3546_s1 + $0x368] sm:$0xff]  }
  0x62   :  { %2533 = vmatpush3.bf16.msra.mxu1 %v2751_v29  ;;  %v2783_v29 = vld [vmem:[%s3546_s1 + $0x3a0] sm:$0xff]  }
  0x63   :  { %1695 = vmatmul.mubr.bf16.gmra.mrb[32].mxu0 %v2136_v24  ;;  %2534 = vmatprep.subr.bf16.mxu1 %v2758_v36  ;;  %v75_v24 = vld [vmem:[%s3547_s0 + $0x1e0] sm:$0xff]  ;;  %v2788_v36 = vld [vmem:[%s3546_s1 + $0x370] sm:$0xff]  }
  0x64   :  { %1767 = vmatmul.mubr.bf16.gmra.mrb[32].mxu1 %v2138_v26  ;;  %1702 = vmatprep.mubr.bf16.mxu0 %v2153_v33  ;;  %v2141_v26 = vcombine.high %v67_v23, %v75_v24  ;;  %v2140_v32 = vcombine.low %v67_v23, %v75_v24  ;;  %v2786_v33 = vld [vmem:[%s3546_s1 + $0x3e8] sm:$0xff]  }
  0x65   :  { %1774 = vmatprep.mubr.bf16.mxu1 %v2155_v34  ;;  %2489 = vmatpush3.bf16.msra.mxu0 %v2755_v35  ;;  %v2142_v34 = vcombine.low %v68_v25, %v76_v27  ;;  %v2787_v35 = vld [vmem:[%s3546_s1 + $0x3a8] sm:$0xff]  }
  0x66   :  { %2535 = vmatpush3.bf16.msra.mxu1 %v2759_v37  ;;  %2490 = vmatprep.subr.bf16.mxu0 %v2760_v39  ;;  %v83_v37 = vld [vmem:[%s3547_s0 + $0x220] sm:$0xff] }
  0x67   :  { %2536 = vmatprep.subr.bf16.mxu1 %v2762_v42  ;;  %v2157_v39 = vcombine.high %v83_v37, %v83_v37  ;;  %v2794_v42 = vld [vmem:[%s3546_s1 + $0x3f0] sm:$0xff]   ;;  %v2156_v46 = vcombine.low %v83_v37, %v83_v37 }
  0x69   :  { %2491 = vmatpush3.bf16.msra.mxu0 %v2761_v41  ;;  %v2791_v41 = vld [vmem:[%s3546_s1 + $0x330] sm:$0xff]  }
  0x6a   :  { %2537 = vmatpush3.bf16.msra.mxu1 %v2763_v43  ;;  %2568 = vmatprep.subr.bf16.mxu0 %v2764_v50  ;;  %v2795_v43 = vld [vmem:[%s3546_s1 + $0x3b0] sm:$0xff]  }
  0x6b   :  { %1703 = vmatmul.mubr.bf16.gmra.mrb[36].mxu0 %v2152_v38  ;;  %2614 = vmatprep.subr.bf16.mxu1 %v2766_v53  ;;  %v84_v38 = vld [vmem:[%s3547_s0 + $0x228] sm:$0xff]  ;;  %v21_v50 = vld [vmem:[%s3547_s0 + $0x30] sm:$0xff] }
  0x6c   :  { %1775 = vmatmul.mubr.bf16.gmra.mrb[36].mxu1 %v2154_v40  ;;  %1814 = vmatprep.mubr.bf16.mxu0 %v2093_v47  ;;  %v2159_v40 = vcombine.high %v84_v38, %v84_v38  ;;  %v2798_v47 = vld [vmem:[%s3546_s1 + $0x3f8] sm:$0xff]   ;;  %v2158_v48 = vcombine.low %v84_v38, %v84_v38 }
  0x6d   :  { %1886 = vmatprep.mubr.bf16.mxu1 %v2095_v49  ;;  %v2799_v49 = vld [vmem:[%s3546_s1 + $0x3b8] sm:$0xff]  }
  0x73   :  { %1815 = vmatmul.mubr.bf16.vlgmr.msra.gmra.mrb[40].mxu0 %v2092_v52  ;;  %v22_v52 = vld [vmem:[%s3547_s0 + $0x38] sm:$0xff] }
  0x74   :  { %1887 = vmatmul.mubr.bf16.vlgmr.msra.gmra.mrb[40].mxu1 %v2094_v54  ;;  %2569 = vmatpush3.bf16.msra.mxu0 %v2765_v51  ;;  %v29_v51 = vld [vmem:[%s3547_s0 + $0x70] sm:$0xff]  ;;  %v30_v54 = vld [vmem:[%s3547_s0 + $0x78] sm:$0xff] }
  0x75   :  { %2615 = vmatpush3.bf16.msra.mxu1 %v2767_v55  ;;  %2570 = vmatprep.subr.bf16.mxu0 %v2768_v56  ;;  %v2097_v53 = vcombine.high %v21_v50, %v29_v51  ;;  %v2099_v55 = vcombine.high %v22_v52, %v30_v54  ;;  %v37_v56 = vld [vmem:[%s3547_s0 + $0xb0] sm:$0xff]  ;;  %v2098_v61 = vcombine.low %v22_v52, %v30_v54 }
  0x76   :  { %1822 = vmatprep.mubr.bf16.mxu0 %v2109_v60  ;;  %1894 = vmatprep.mubr.bf16.mxu1 %v2111_v63  ;;  %v2096_v60 = vcombine.low %v21_v50, %v29_v51  ;;  %v2115_v63 = vcombine.high %v38_v58, %v46_v59 }
  0x77   :  { %2616 = vmatprep.subr.bf16.mxu1 %v2770_v0  ;;  %v53_v0 = vld [vmem:[%s3547_s0 + $0x130] sm:$0xff] }
  0x78   :  { %2571 = vmatpush3.bf16.msra.mxu0 %v2769_v57  ;;  %v45_v57 = vld [vmem:[%s3547_s0 + $0xf0] sm:$0xff] }
  0x79   :  { %2617 = vmatpush3.bf16.msra.mxu1 %v2771_v1  ;;  %2572 = vmatprep.subr.bf16.mxu0 %v2772_v2  ;;  %v2113_v62 = vcombine.high %v37_v56, %v45_v57  ;;  %v61_v1 = vld [vmem:[%s3547_s0 + $0x170] sm:$0xff]  ;;  %v54_v2 = vld [vmem:[%s3547_s0 + $0x138] sm:$0xff] }
  0x7a   :  { %2618 = vmatprep.subr.bf16.mxu1 %v2774_v6  ;;  %v2129_v6 = vcombine.high %v53_v0, %v61_v1 }
  0x7b   :  { %1823 = vmatmul.mubr.bf16.gmra.mrb[44].mxu0 %v2108_v3  ;;  %v62_v3 = vld [vmem:[%s3547_s0 + $0x178] sm:$0xff] }
  0x7c   :  { %1895 = vmatmul.mubr.bf16.gmra.mrb[44].mxu1 %v2110_v5  ;;  %2573 = vmatpush3.bf16.msra.mxu0 %v2773_v4  ;;  %v2112_v4 = vcombine.low %v37_v56, %v45_v57  ;;  %v2114_v5 = vcombine.low %v38_v58, %v46_v59 }
  0x7d   :  { %2619 = vmatpush3.bf16.msra.mxu1 %v2775_v7  ;;  %1830 = vmatprep.mubr.bf16.mxu0 %v2125_v12  ;;  %v2131_v7 = vcombine.high %v54_v2, %v62_v3  ;;  %v2128_v12 = vcombine.low %v53_v0, %v61_v1 }
  0x7e   :  { %1902 = vmatprep.mubr.bf16.mxu1 %v2127_v13  ;;  %2574 = vmatprep.subr.bf16.mxu0 %v2776_v14  ;;  %v2130_v13 = vcombine.low %v54_v2, %v62_v3  ;;  %v2145_v14 = vcombine.high %v69_v8, %v77_v9 }
  0x7f   :  { %2620 = vmatprep.subr.bf16.mxu1 %v2778_v16  ;;  %v85_v16 = vld [vmem:[%s3547_s0 + $0x230] sm:$0xff] }
  0x80   :  { %2575 = vmatpush3.bf16.msra.mxu0 %v2777_v15  ;;  %v2147_v15 = vcombine.high %v70_v10, %v78_v11 }
  0x81   :  { %2621 = vmatpush3.bf16.msra.mxu1 %v2779_v17  ;;  %2576 = vmatprep.subr.bf16.mxu0 %v2780_v19  ;;  %v86_v17 = vld [vmem:[%s3547_s0 + $0x238] sm:$0xff]  ;;  %v2146_v19 = vcombine.low %v70_v10, %v78_v11 }
  0x82   :  { %2622 = vmatprep.subr.bf16.mxu1 %v2782_v22  ;;  %v2160_v22 = vcombine.low %v85_v16, %v85_v16  ;;  %v2162_v23 = vcombine.low %v86_v17, %v86_v17 }
  0x83   :  { %1831 = vmatmul.mubr.bf16.gmra.mrb[48].mxu0 %v2124_v18  ;;  %v2144_v18 = vcombine.low %v69_v8, %v77_v9 }
  0x84   :  { %1903 = vmatmul.mubr.bf16.gmra.mrb[48].mxu1 %v2126_v20  ;;  %2577 = vmatpush3.bf16.msra.mxu0 %v2781_v21  ;;  %v2161_v20 = vcombine.high %v85_v16, %v85_v16  ;;  %v2163_v21 = vcombine.high %v86_v17, %v86_v17 }
  0x85   :  { %1838 = vmatprep.mubr.bf16.mxu0 %v2141_v26  ;;  %1910 = vmatprep.mubr.bf16.mxu1 %v2143_v28  ;;  %v3427_v26 = vld [vmem:[%s3548_s2] ss:$0 sm:$0xff] }
  0x86   :  { %2623 = vmatpush3.bf16.msra.mxu1 %v2783_v29  ;;  %2578 = vmatprep.subr.bf16.mxu0 %v2784_v30 }
  0x87   :  { %2624 = vmatprep.subr.bf16.mxu1 %v2786_v33 }
  0x88   :  { %2579 = vmatpush3.bf16.msra.mxu0 %v2785_v31 }
  0x89   :  { %2580 = vmatprep.subr.bf16.mxu0 %v2788_v36 }
  0x8a   :  { %2625 = vmatpush3.bf16.msra.mxu1 %v2787_v35 }
  0x8b   :  { %1839 = vmatmul.mubr.bf16.gmra.mrb[52].mxu0 %v2140_v32  ;;  %2626 = vmatprep.subr.bf16.mxu1 %v2794_v42 }
  0x8c   :  { %1911 = vmatmul.mubr.bf16.gmra.mrb[52].mxu1 %v2142_v34  ;;  %1846 = vmatprep.mubr.bf16.mxu0 %v2157_v39 }
  0x8d   :  { %1918 = vmatprep.mubr.bf16.mxu1 %v2159_v40  ;;  %2581 = vmatpush3.bf16.msra.mxu0 %v2791_v41 }
  0x8e   :  { %2627 = vmatpush3.bf16.msra.mxu1 %v2795_v43  ;;  %2582 = vmatprep.subr.bf16.mxu0 %v2796_v44 }
  0x8f   :  { %2628 = vmatprep.subr.bf16.mxu1 %v2798_v47 }
  0x91   :  { %2583 = vmatpush3.bf16.msra.mxu0 %v2797_v45 }
  0x92   :  { %2629 = vmatpush3.bf16.msra.mxu1 %v2799_v49 }
  0x93   :  { %1847 = vmatmul.mubr.bf16.gmra.mrb[56].mxu0 %v2156_v46 }
  0x94   :  { %1919 = vmatmul.mubr.bf16.gmra.mrb[56].mxu1 %v2158_v48  ;;  %1958 = vmatprep.mubr.bf16.mxu0 %v2097_v53 }
  0x95   :  { %2030 = vmatprep.mubr.bf16.mxu1 %v2099_v55 }
  0x9b   :  { %1959 = vmatmul.mubr.bf16.vlgmr.msra.gmra.mrb[60].mxu0 %v2096_v60 }
  0x9c   :  { %2031 = vmatmul.mubr.bf16.vlgmr.msra.gmra.mrb[60].mxu1 %v2098_v61  ;;  %1966 = vmatprep.mubr.bf16.mxu0 %v2113_v62 }
  0x9d   :  { %2038 = vmatprep.mubr.bf16.mxu1 %v2115_v63 }
  0xa3   :  { %1967 = vmatmul.mubr.bf16.gmra.mrb[64].mxu0 %v2112_v4 }
  0xa4   :  { %2039 = vmatmul.mubr.bf16.gmra.mrb[64].mxu1 %v2114_v5  ;;  %1974 = vmatprep.mubr.bf16.mxu0 %v2129_v6 }
  0xa5   :  { %2046 = vmatprep.mubr.bf16.mxu1 %v2131_v7 }
  0xab   :  { %1975 = vmatmul.mubr.bf16.gmra.mrb[68].mxu0 %v2128_v12 }
  0xac   :  { %2047 = vmatmul.mubr.bf16.gmra.mrb[68].mxu1 %v2130_v13  ;;  %1982 = vmatprep.mubr.bf16.mxu0 %v2145_v14 }
  0xad   :  { %2054 = vmatprep.mubr.bf16.mxu1 %v2147_v15 }
  0xb3   :  { %1983 = vmatmul.mubr.bf16.gmra.mrb[72].mxu0 %v2144_v18 }
  0xb4   :  { %2055 = vmatmul.mubr.bf16.gmra.mrb[72].mxu1 %v2146_v19  ;;  %1990 = vmatprep.mubr.bf16.mxu0 %v2161_v20 }
  0xb5   :  { %2062 = vmatprep.mubr.bf16.mxu1 %v2163_v21 }
  0xbb   :  { %1991 = vmatmul.mubr.bf16.gmra.mrb[76].mxu0 %v2160_v22 }
  0xbc   :  { %2063 = vmatmul.mubr.bf16.gmra.mrb[76].mxu1 %v2162_v23 }
  0xf6   :  { %v2308_v24 = vpop.f32.mrb[0].mxu0 }
  0xf7   :  { %v2354_v25 = vpop.f32.mrb[0].mxu1  ;;  %v2309_v27 = vpop.f32.mrb[1].mxu0 }
  0xf8   :  { %v2310_v28 = vadd.f32 %v2309_v27, %v2308_v24  ;;  %v2355_v29 = vpop.f32.mrb[1].mxu1  ;;  %v2311_v30 = vpop.f32.mrb[2].mxu0 }
  0xf9   :  { %v2356_v31 = vadd.f32 %v2355_v29, %v2354_v25  ;;  %v2357_v32 = vpop.f32.mrb[2].mxu1  ;;  %v2312_v33 = vpop.f32.mrb[3].mxu0 }
  0xfa   :  { %v1529_v34 = vadd.f32 %v2310_v28, %v3427_v26  ;;  %v2313_v35 = vadd.f32 %v2312_v33, %v2311_v30  ;;  %v2358_v36 = vpop.f32.mrb[3].mxu1 }
  0xfb   :  { %v2359_v37 = vadd.f32 %v2358_v36, %v2357_v32 }
  0xfc   :  { %v3430_v38 = vadd.f32 %v2356_v31, %v1529_v34  ;;  %v1532_v39 = vadd.f32 %v2313_v35, %v3427_v26 }
  0xfe   :  { %v3433_v40 = vadd.f32 %v2359_v37, %v1532_v39  ;;  %v2314_v41 = vpop.f32.mrb[4].mxu0 }
  0xff   :  { %v2360_v42 = vpop.f32.mrb[4].mxu1  ;;  %v2315_v43 = vpop.f32.mrb[5].mxu0 }
 0x100   :  { %v2316_v44 = vadd.f32 %v2315_v43, %v2314_v41  ;;  %v2361_v45 = vpop.f32.mrb[5].mxu1  ;;  %v2317_v46 = vpop.f32.mrb[6].mxu0 }
 0x101   :  { %v2362_v47 = vadd.f32 %v2361_v45, %v2360_v42  ;;  %v2363_v48 = vpop.f32.mrb[6].mxu1  ;;  %v2318_v49 = vpop.f32.mrb[7].mxu0 }
 0x102   :  { %v1537_v50 = vadd.f32 %v2316_v44, %v3427_v26  ;;  %v2319_v51 = vadd.f32 %v2318_v49, %v2317_v46  ;;  %v2364_v52 = vpop.f32.mrb[7].mxu1 }
 0x103   :  { %v2365_v53 = vadd.f32 %v2364_v52, %v2363_v48 }
 0x104   :  { %v3436_v54 = vadd.f32 %v2362_v47, %v1537_v50  ;;  %v1540_v55 = vadd.f32 %v2319_v51, %v3427_v26 }
 0x106   :  { %v3439_v56 = vadd.f32 %v2365_v53, %v1540_v55  ;;  %v2320_v57 = vpop.f32.mrb[8].mxu0 }
 0x107   :  { %v2366_v58 = vpop.f32.mrb[8].mxu1  ;;  %v2321_v59 = vpop.f32.mrb[9].mxu0 }
 0x108   :  { %v2322_v60 = vadd.f32 %v2321_v59, %v2320_v57  ;;  %v2367_v61 = vpop.f32.mrb[9].mxu1  ;;  %v2323_v62 = vpop.f32.mrb[10].mxu0 }
 0x109   :  { %v2368_v63 = vadd.f32 %v2367_v61, %v2366_v58  ;;  %v2369_v0 = vpop.f32.mrb[10].mxu1  ;;  %v2324_v1 = vpop.f32.mrb[11].mxu0 }
 0x10a   :  { %v1545_v2 = vadd.f32 %v2322_v60, %v3427_v26  ;;  %v2325_v3 = vadd.f32 %v2324_v1, %v2323_v62  ;;  %v2370_v4 = vpop.f32.mrb[11].mxu1 }
 0x10b   :  { %v2371_v5 = vadd.f32 %v2370_v4, %v2369_v0 }
 0x10c   :  { %v3442_v6 = vadd.f32 %v2368_v63, %v1545_v2  ;;  %v1548_v7 = vadd.f32 %v2325_v3, %v3427_v26 }
 0x10e   :  { %v3445_v8 = vadd.f32 %v2371_v5, %v1548_v7  ;;  %v2326_v9 = vpop.f32.mrb[12].mxu0 }
 0x10f   :  { %v2372_v10 = vpop.f32.mrb[12].mxu1  ;;  %v2327_v11 = vpop.f32.mrb[13].mxu0 }
 0x110   :  { %v2328_v12 = vadd.f32 %v2327_v11, %v2326_v9  ;;  %v2373_v13 = vpop.f32.mrb[13].mxu1  ;;  %v2329_v14 = vpop.f32.mrb[14].mxu0 }
 0x111   :  { %v2374_v15 = vadd.f32 %v2373_v13, %v2372_v10  ;;  %v2375_v16 = vpop.f32.mrb[14].mxu1  ;;  %v2330_v17 = vpop.f32.mrb[15].mxu0 }
 0x112   :  { %v1553_v18 = vadd.f32 %v2328_v12, %v3427_v26  ;;  %v2331_v19 = vadd.f32 %v2330_v17, %v2329_v14  ;;  %v2376_v20 = vpop.f32.mrb[15].mxu1 }
 0x113   :  { %v2377_v21 = vadd.f32 %v2376_v20, %v2375_v16 }
 0x114   :  { %v3448_v22 = vadd.f32 %v2374_v15, %v1553_v18  ;;  %v1556_v23 = vadd.f32 %v2331_v19, %v3427_v26 }
 0x116   :  { %v3451_v24 = vadd.f32 %v2377_v21, %v1556_v23  ;;  %v2332_v25 = vpop.f32.mrb[16].mxu0 }
 0x117   :  { %v2378_v27 = vpop.f32.mrb[16].mxu1  ;;  %v2333_v28 = vpop.f32.mrb[17].mxu0 }
 0x118   :  { %v2334_v29 = vadd.f32 %v2333_v28, %v2332_v25  ;;  %v2379_v30 = vpop.f32.mrb[17].mxu1  ;;  %v2335_v31 = vpop.f32.mrb[18].mxu0 }
 0x119   :  { %v2380_v32 = vadd.f32 %v2379_v30, %v2378_v27  ;;  %v2381_v33 = vpop.f32.mrb[18].mxu1  ;;  %v2336_v34 = vpop.f32.mrb[19].mxu0 }
 0x11a   :  { %v1561_v35 = vadd.f32 %v2334_v29, %v3427_v26  ;;  %v2382_v36 = vpop.f32.mrb[19].mxu1 }
 0x11c   :  { %v3454_v37 = vadd.f32 %v2380_v32, %v1561_v35 }
 0x11e   :  { %v2400_v39 = vpop.f32.mrb[20].mxu0 }
 0x11f   :  { %v2446_v41 = vpop.f32.mrb[20].mxu1  ;;  %v2401_v42 = vpop.f32.mrb[21].mxu0 }
 0x120   :  { %v2402_v43 = vadd.f32 %v2401_v42, %v2400_v39  ;;  %v2447_v44 = vpop.f32.mrb[21].mxu1  ;;  %v2403_v45 = vpop.f32.mrb[22].mxu0 }
 0x121   :  { %v2448_v46 = vadd.f32 %v2447_v44, %v2446_v41  ;;  %v2449_v47 = vpop.f32.mrb[22].mxu1  ;;  %v2404_v48 = vpop.f32.mrb[23].mxu0 }
 0x122   :  { %v1673_v49 = vadd.f32 %v2402_v43, %v3430_v38  ;;  %v2405_v50 = vadd.f32 %v2404_v48, %v2403_v45  ;;  %v2450_v51 = vpop.f32.mrb[23].mxu1 }
 0x123   :  { %v2451_v52 = vadd.f32 %v2450_v51, %v2449_v47 }
 0x124   :  { %v3457_v53 = vadd.f32 %v2448_v46, %v1673_v49  ;;  %v1676_v26 = vadd.f32 %v2405_v50, %v3433_v40 }
 0x126   :  { %v3460_v55 = vadd.f32 %v2451_v52, %v1676_v26  ;;  %v2406_v57 = vpop.f32.mrb[24].mxu0 }
 0x127   :  { %v2452_v58 = vpop.f32.mrb[24].mxu1  ;;  %v2407_v59 = vpop.f32.mrb[25].mxu0 }
 0x128   :  { %v2408_v60 = vadd.f32 %v2407_v59, %v2406_v57  ;;  %v2453_v61 = vpop.f32.mrb[25].mxu1  ;;  %v2409_v62 = vpop.f32.mrb[26].mxu0 }
 0x129   :  { %v2454_v63 = vadd.f32 %v2453_v61, %v2452_v58  ;;  %v2455_v0 = vpop.f32.mrb[26].mxu1  ;;  %v2410_v1 = vpop.f32.mrb[27].mxu0 }
 0x12a   :  { %v1681_v38 = vadd.f32 %v2408_v60, %v3436_v54  ;;  %v2411_v2 = vadd.f32 %v2410_v1, %v2409_v62  ;;  %v2456_v3 = vpop.f32.mrb[27].mxu1 }
 0x12b   :  { %v2457_v4 = vadd.f32 %v2456_v3, %v2455_v0 }
 0x12c   :  { %v3463_v5 = vadd.f32 %v2454_v63, %v1681_v38  ;;  %v1684_v40 = vadd.f32 %v2411_v2, %v3439_v56 }
 0x12e   :  { %v3466_v7 = vadd.f32 %v2457_v4, %v1684_v40  ;;  %v2412_v9 = vpop.f32.mrb[28].mxu0 }
 0x12f   :  { %v2458_v10 = vpop.f32.mrb[28].mxu1  ;;  %v2413_v11 = vpop.f32.mrb[29].mxu0 }
 0x130   :  { %v2414_v12 = vadd.f32 %v2413_v11, %v2412_v9  ;;  %v2459_v13 = vpop.f32.mrb[29].mxu1  ;;  %v2415_v14 = vpop.f32.mrb[30].mxu0 }
 0x131   :  { %v2460_v15 = vadd.f32 %v2459_v13, %v2458_v10  ;;  %v2461_v16 = vpop.f32.mrb[30].mxu1  ;;  %v2416_v17 = vpop.f32.mrb[31].mxu0 }
 0x132   :  { %v1689_v54 = vadd.f32 %v2414_v12, %v3442_v6  ;;  %v2417_v18 = vadd.f32 %v2416_v17, %v2415_v14  ;;  %v2462_v19 = vpop.f32.mrb[31].mxu1 }
 0x133   :  { %v2463_v20 = vadd.f32 %v2462_v19, %v2461_v16 }
 0x134   :  { %v3469_v21 = vadd.f32 %v2460_v15, %v1689_v54  ;;  %v1692_v56 = vadd.f32 %v2417_v18, %v3445_v8 }
 0x136   :  { %v3472_v23 = vadd.f32 %v2463_v20, %v1692_v56  ;;  %v2418_v25 = vpop.f32.mrb[32].mxu0 }
 0x137   :  { %v2464_v27 = vpop.f32.mrb[32].mxu1  ;;  %v2419_v28 = vpop.f32.mrb[33].mxu0 }
 0x138   :  { %v2420_v29 = vadd.f32 %v2419_v28, %v2418_v25  ;;  %v2465_v30 = vpop.f32.mrb[33].mxu1  ;;  %v2421_v31 = vpop.f32.mrb[34].mxu0 }
 0x139   :  { %v2466_v32 = vadd.f32 %v2465_v30, %v2464_v27  ;;  %v2467_v33 = vpop.f32.mrb[34].mxu1  ;;  %v2422_v34 = vpop.f32.mrb[35].mxu0 }
 0x13a   :  { %v1697_v6 = vadd.f32 %v2420_v29, %v3448_v22  ;;  %v2423_v35 = vadd.f32 %v2422_v34, %v2421_v31  ;;  %v2468_v36 = vpop.f32.mrb[35].mxu1 }
 0x13b   :  { %v2469_v39 = vadd.f32 %v2468_v36, %v2467_v33 }
 0x13c   :  { %v3475_v41 = vadd.f32 %v2466_v32, %v1697_v6  ;;  %v1700_v8 = vadd.f32 %v2423_v35, %v3451_v24 }
 0x13e   :  { %v3478_v42 = vadd.f32 %v2469_v39, %v1700_v8  ;;  %v2424_v43 = vpop.f32.mrb[36].mxu0 }
 0x13f   :  { %v2470_v44 = vpop.f32.mrb[36].mxu1  ;;  %v2425_v45 = vpop.f32.mrb[37].mxu0 }
 0x140   :  { %v2426_v46 = vadd.f32 %v2425_v45, %v2424_v43  ;;  %v2471_v47 = vpop.f32.mrb[37].mxu1  ;;  %v2427_v48 = vpop.f32.mrb[38].mxu0 }
 0x141   :  { %v2472_v49 = vadd.f32 %v2471_v47, %v2470_v44  ;;  %v2473_v50 = vpop.f32.mrb[38].mxu1  ;;  %v2428_v51 = vpop.f32.mrb[39].mxu0 }
 0x142   :  { %v1705_v22 = vadd.f32 %v2426_v46, %v3454_v37  ;;  %v2474_v52 = vpop.f32.mrb[39].mxu1 }
 0x144   :  { %v3481_v26 = vadd.f32 %v2472_v49, %v1705_v22 }
 0x146   :  { %v2492_v57 = vpop.f32.mrb[40].mxu0 }
 0x147   :  { %v2538_v58 = vpop.f32.mrb[40].mxu1  ;;  %v2493_v59 = vpop.f32.mrb[41].mxu0 }
 0x148   :  { %v2494_v24 = vadd.f32 %v2493_v59, %v2492_v57  ;;  %v2539_v60 = vpop.f32.mrb[41].mxu1  ;;  %v2495_v61 = vpop.f32.mrb[42].mxu0 }
 0x149   :  { %v2540_v62 = vadd.f32 %v2539_v60, %v2538_v58  ;;  %v2541_v63 = vpop.f32.mrb[42].mxu1  ;;  %v2496_v0 = vpop.f32.mrb[43].mxu0 }
 0x14a   :  { %v1817_v1 = vadd.f32 %v2494_v24, %v3457_v53  ;;  %v2497_v38 = vadd.f32 %v2496_v0, %v2495_v61  ;;  %v2542_v2 = vpop.f32.mrb[43].mxu1 }
 0x14b   :  { %v2543_v3 = vadd.f32 %v2542_v2, %v2541_v63 }
 0x14c   :  { %v3484_v4 = vadd.f32 %v2540_v62, %v1817_v1  ;;  %v1820_v37 = vadd.f32 %v2497_v38, %v3460_v55 }
 0x14e   :  { %v3487_v40 = vadd.f32 %v2543_v3, %v1820_v37  ;;  %v2498_v9 = vpop.f32.mrb[44].mxu0 }
 0x14f   :  { %v2544_v10 = vpop.f32.mrb[44].mxu1  ;;  %v2499_v11 = vpop.f32.mrb[45].mxu0 }
 0x150   :  { %v2500_v12 = vadd.f32 %v2499_v11, %v2498_v9  ;;  %v2545_v13 = vpop.f32.mrb[45].mxu1  ;;  %v2501_v14 = vpop.f32.mrb[46].mxu0 }
 0x151   :  { %v2546_v15 = vadd.f32 %v2545_v13, %v2544_v10  ;;  %v2547_v16 = vpop.f32.mrb[46].mxu1  ;;  %v2502_v17 = vpop.f32.mrb[47].mxu0 }
 0x152   :  { %v1825_v53 = vadd.f32 %v2500_v12, %v3463_v5  ;;  %v2503_v54 = vadd.f32 %v2502_v17, %v2501_v14  ;;  %v2548_v18 = vpop.f32.mrb[47].mxu1 }
 0x153   :  { %v2549_v19 = vadd.f32 %v2548_v18, %v2547_v16 }
 0x154   :  { %v3490_v20 = vadd.f32 %v2546_v15, %v1825_v53  ;;  %v1828_v55 = vadd.f32 %v2503_v54, %v3466_v7 }
 0x156   :  { %v3493_v56 = vadd.f32 %v2549_v19, %v1828_v55  ;;  %v2504_v25 = vpop.f32.mrb[48].mxu0 }
 0x157   :  { %v2550_v27 = vpop.f32.mrb[48].mxu1  ;;  %v2505_v28 = vpop.f32.mrb[49].mxu0 }
 0x158   :  { %v2506_v29 = vadd.f32 %v2505_v28, %v2504_v25  ;;  %v2551_v30 = vpop.f32.mrb[49].mxu1  ;;  %v2507_v31 = vpop.f32.mrb[50].mxu0 }
 0x159   :  { %v2552_v32 = vadd.f32 %v2551_v30, %v2550_v27  ;;  %v2553_v33 = vpop.f32.mrb[50].mxu1  ;;  %v2508_v34 = vpop.f32.mrb[51].mxu0 }
 0x15a   :  { %v1833_v5 = vadd.f32 %v2506_v29, %v3469_v21  ;;  %v2509_v6 = vadd.f32 %v2508_v34, %v2507_v31  ;;  %v2554_v35 = vpop.f32.mrb[51].mxu1 }
 0x15b   :  { %v2555_v36 = vadd.f32 %v2554_v35, %v2553_v33 }
 0x15c   :  { %v3496_v39 = vadd.f32 %v2552_v32, %v1833_v5  ;;  %v1836_v7 = vadd.f32 %v2509_v6, %v3472_v23 }
 0x15e   :  { %v3499_v8 = vadd.f32 %v2555_v36, %v1836_v7  ;;  %v2510_v43 = vpop.f32.mrb[52].mxu0 }
 0x15f   :  { %v2556_v44 = vpop.f32.mrb[52].mxu1  ;;  %v2511_v45 = vpop.f32.mrb[53].mxu0 }
 0x160   :  { %v2512_v46 = vadd.f32 %v2511_v45, %v2510_v43  ;;  %v2557_v47 = vpop.f32.mrb[53].mxu1  ;;  %v2513_v48 = vpop.f32.mrb[54].mxu0 }
 0x161   :  { %v2558_v49 = vadd.f32 %v2557_v47, %v2556_v44  ;;  %v2559_v50 = vpop.f32.mrb[54].mxu1  ;;  %v2514_v51 = vpop.f32.mrb[55].mxu0 }
 0x162   :  { %v1841_v21 = vadd.f32 %v2512_v46, %v3475_v41  ;;  %v2515_v22 = vadd.f32 %v2514_v51, %v2513_v48  ;;  %v2560_v52 = vpop.f32.mrb[55].mxu1 }
 0x163   :  { %v2561_v57 = vadd.f32 %v2560_v52, %v2559_v50 }
 0x164   :  { %v3502_v58 = vadd.f32 %v2558_v49, %v1841_v21  ;;  %v1844_v23 = vadd.f32 %v2515_v22, %v3478_v42 }
 0x166   :  { %v3505_v59 = vadd.f32 %v2561_v57, %v1844_v23  ;;  %v2516_v24 = vpop.f32.mrb[56].mxu0 }
 0x167   :  { %v2562_v60 = vpop.f32.mrb[56].mxu1  ;;  %v2517_v61 = vpop.f32.mrb[57].mxu0 }
 0x168   :  { %v2518_v62 = vadd.f32 %v2517_v61, %v2516_v24  ;;  %v2563_v63 = vpop.f32.mrb[57].mxu1  ;;  %v2519_v0 = vpop.f32.mrb[58].mxu0 }
 0x169   :  { %v2564_v1 = vadd.f32 %v2563_v63, %v2562_v60  ;;  %v2565_v38 = vpop.f32.mrb[58].mxu1  ;;  %v2520_v2 = vpop.f32.mrb[59].mxu0 }
 0x16a   :  { %v1849_v41 = vadd.f32 %v2518_v62, %v3481_v26  ;;  %v2566_v3 = vpop.f32.mrb[59].mxu1 }
 0x16c   :  { %v3508_v37 = vadd.f32 %v2564_v1, %v1849_v41 }
 0x16e   :  { %v2584_v9 = vpop.f32.mrb[60].mxu0 }
 0x16f   :  { %v2630_v10 = vpop.f32.mrb[60].mxu1  ;;  %v2585_v11 = vpop.f32.mrb[61].mxu0 }
 0x170   :  { %v2586_v42 = vadd.f32 %v2585_v11, %v2584_v9  ;;  %v2631_v12 = vpop.f32.mrb[61].mxu1  ;;  %v2587_v13 = vpop.f32.mrb[62].mxu0 }
 0x171   :  { %v2632_v14 = vadd.f32 %v2631_v12, %v2630_v10  ;;  %v2633_v15 = vpop.f32.mrb[62].mxu1  ;;  %v2588_v16 = vpop.f32.mrb[63].mxu0 }
 0x172   :  { %v1961_v17 = vadd.f32 %v2586_v42, %v3484_v4  ;;  %v2589_v53 = vadd.f32 %v2588_v16, %v2587_v13  ;;  %v2634_v54 = vpop.f32.mrb[63].mxu1 }
 0x173   :  { %v2635_v18 = vadd.f32 %v2634_v54, %v2633_v15 }
 0x174   :  { %v2033_v19 = vadd.f32 %v2632_v14, %v1961_v17  ;;  %v1964_v26 = vadd.f32 %v2589_v53, %v3487_v40 }
 0x176   :  { %2070 = vst [vmem:[%s3549_s3] sm:$0xff] %v2033_v19  ;;  %v2036_v55 = vadd.f32 %v2635_v18, %v1964_v26  ;;  %v2590_v25 = vpop.f32.mrb[64].mxu0 }
 0x177   :  { %v2636_v27 = vpop.f32.mrb[64].mxu1  ;;  %v2591_v28 = vpop.f32.mrb[65].mxu0 }
 0x178   :  { %2071 = vst [vmem:[%s3549_s3 + $0x8] sm:$0xff] %v2036_v55  ;;  %v2592_v29 = vadd.f32 %v2591_v28, %v2590_v25  ;;  %v2637_v4 = vpop.f32.mrb[65].mxu1  ;;  %v2593_v30 = vpop.f32.mrb[66].mxu0 }
 0x179   :  { %v2638_v31 = vadd.f32 %v2637_v4, %v2636_v27  ;;  %v2639_v32 = vpop.f32.mrb[66].mxu1  ;;  %v2594_v33 = vpop.f32.mrb[67].mxu0 }
 0x17a   :  { %v1969_v40 = vadd.f32 %v2592_v29, %v3490_v20  ;;  %v2595_v34 = vadd.f32 %v2594_v33, %v2593_v30  ;;  %v2640_v5 = vpop.f32.mrb[67].mxu1 }
 0x17b   :  { %v2641_v6 = vadd.f32 %v2640_v5, %v2639_v32 }
 0x17c   :  { %v2041_v35 = vadd.f32 %v2638_v31, %v1969_v40  ;;  %v1972_v36 = vadd.f32 %v2595_v34, %v3493_v56 }
 0x17e   :  { %2072 = vst [vmem:[%s3549_s3 + $0x10] sm:$0xff] %v2041_v35  ;;  %v2044_v7 = vadd.f32 %v2641_v6, %v1972_v36  ;;  %v2596_v43 = vpop.f32.mrb[68].mxu0 }
 0x17f   :  { %v2642_v44 = vpop.f32.mrb[68].mxu1  ;;  %v2597_v45 = vpop.f32.mrb[69].mxu0 }
 0x180   :  { %2073 = vst [vmem:[%s3549_s3 + $0x18] sm:$0xff] %v2044_v7  ;;  %v2598_v46 = vadd.f32 %v2597_v45, %v2596_v43  ;;  %v2643_v20 = vpop.f32.mrb[69].mxu1  ;;  %v2599_v47 = vpop.f32.mrb[70].mxu0 }
 0x181   :  { %v2644_v48 = vadd.f32 %v2643_v20, %v2642_v44  ;;  %v2645_v49 = vpop.f32.mrb[70].mxu1  ;;  %v2600_v50 = vpop.f32.mrb[71].mxu0 }
 0x182   :  { %v1977_v56 = vadd.f32 %v2598_v46, %v3496_v39  ;;  %v2601_v51 = vadd.f32 %v2600_v50, %v2599_v47  ;;  %v2646_v21 = vpop.f32.mrb[71].mxu1 }
 0x183   :  { %v2647_v22 = vadd.f32 %v2646_v21, %v2645_v49 }
 0x184   :  { %v2049_v52 = vadd.f32 %v2644_v48, %v1977_v56  ;;  %v1980_v57 = vadd.f32 %v2601_v51, %v3499_v8 }
 0x186   :  { %2074 = vst [vmem:[%s3549_s3 + $0x20] sm:$0xff] %v2049_v52  ;;  %v2052_v23 = vadd.f32 %v2647_v22, %v1980_v57  ;;  %v2602_v24 = vpop.f32.mrb[72].mxu0 }
 0x187   :  { %v2648_v60 = vpop.f32.mrb[72].mxu1  ;;  %v2603_v61 = vpop.f32.mrb[73].mxu0 }
 0x188   :  { %2075 = vst [vmem:[%s3549_s3 + $0x28] sm:$0xff] %v2052_v23  ;;  %v2604_v62 = vadd.f32 %v2603_v61, %v2602_v24  ;;  %v2649_v39 = vpop.f32.mrb[73].mxu1  ;;  %v2605_v63 = vpop.f32.mrb[74].mxu0 }
 0x189   :  { %v2650_v0 = vadd.f32 %v2649_v39, %v2648_v60  ;;  %v2651_v1 = vpop.f32.mrb[74].mxu1  ;;  %v2606_v38 = vpop.f32.mrb[75].mxu0 }
 0x18a   :  { %v1985_v8 = vadd.f32 %v2604_v62, %v3502_v58  ;;  %v2607_v2 = vadd.f32 %v2606_v38, %v2605_v63  ;;  %v2652_v41 = vpop.f32.mrb[75].mxu1 }
 0x18b   :  { %v2653_v3 = vadd.f32 %v2652_v41, %v2651_v1 }
 0x18c   :  { %v2057_v9 = vadd.f32 %v2650_v0, %v1985_v8  ;;  %v1988_v10 = vadd.f32 %v2607_v2, %v3505_v59 }
 0x18e   :  { %2076 = vst [vmem:[%s3549_s3 + $0x30] sm:$0xff] %v2057_v9  ;;  %v2060_v11 = vadd.f32 %v2653_v3, %v1988_v10  ;;  %v2608_v42 = vpop.f32.mrb[76].mxu0 }
 0x18f   :  { %v2654_v12 = vpop.f32.mrb[76].mxu1  ;;  %v2609_v13 = vpop.f32.mrb[77].mxu0 }
 0x190   :  { %2077 = vst [vmem:[%s3549_s3 + $0x38] sm:$0xff] %v2060_v11  ;;  %v2610_v14 = vadd.f32 %v2609_v13, %v2608_v42  ;;  %v2655_v58 = vpop.f32.mrb[77].mxu1  ;;  %v2611_v15 = vpop.f32.mrb[78].mxu0 }
 0x191   :  { %v2656_v16 = vadd.f32 %v2655_v58, %v2654_v12  ;;  %v2657_v17 = vpop.f32.mrb[78].mxu1  ;;  %v2612_v53 = vpop.f32.mrb[79].mxu0 }
 0x192   :  { %v1993_v59 = vadd.f32 %v2610_v14, %v3508_v37  ;;  %v2658_v54 = vpop.f32.mrb[79].mxu1 }
 0x194   :  { %v2065_v18 = vadd.f32 %v2656_v16, %v1993_v59 }
 0x196   :  { %2078 = vst [vmem:[%s3549_s3 + $0x40] sm:$0xff] %v2065_v18 }

</bundles_post_ra>
